<compile_context>
chip_gen: v6e
topology: v6e:2x2x1
jax: 0.10.0
libtpu: 0.0.40
codegen_flags: <defaults>
</compile_context>

<pallas_src>
import jax
import jax.numpy as jnp
from jax.experimental import pallas as pl
from jax.experimental.pallas import tpu as pltpu


# ----------------------------- schedules (plain JAX glue) ---------------------
def ddpm_schedules(beta1, beta2, T):
    """Pre-computed DDPM schedules (JAX port of the reference function)."""
    assert beta1 < beta2 < 1.0, "beta1 and beta2 must be in (0, 1)"
    beta_t = (beta2 - beta1) * jnp.arange(0, T + 1, dtype=jnp.float32) / T + beta1
    sqrt_beta_t = jnp.sqrt(beta_t)
    alpha_t = 1.0 - beta_t
    log_alpha_t = jnp.log(alpha_t)
    alphabar_t = jnp.exp(jnp.cumsum(log_alpha_t, axis=0))
    sqrtab = jnp.sqrt(alphabar_t)
    oneover_sqrta = 1.0 / jnp.sqrt(alpha_t)
    sqrtmab = jnp.sqrt(1.0 - alphabar_t)
    mab_over_sqrtmab = (1.0 - alpha_t) / sqrtmab
    return {
        "alpha_t": alpha_t,
        "oneover_sqrta": oneover_sqrta,
        "sqrt_beta_t": sqrt_beta_t,
        "alphabar_t": alphabar_t,
        "sqrtab": sqrtab,
        "sqrtmab": sqrtmab,
        "mab_over_sqrtmab": mab_over_sqrtmab,
    }


# ----------------------------- Pallas kernel ----------------------------------
TILE_B = 128  # batch rows per grid step (MXU M dimension)


def ddpm_forward_kernel(
    x_ref,      # (TILE_B, D)   flattened clean images, f32
    noise_ref,  # (TILE_B, D)   gaussian noise, f32
    scal_ref,   # (TILE_B, 3)   lane-packed per-row scalars: sqrtab, sqrtmab, row-mask
    emb_ref,    # (TILE_B, Hd)  conditioning embedding (class gather + time), f32
    w1_ref,     # (D, Hd)       bf16, VMEM-resident across grid steps
    b1_ref,     # (1, Hd)       f32
    w2_ref,     # (Hd, D)       bf16, VMEM-resident across grid steps
    b2_ref,     # (1, D)        f32
    part_ref,   # (8, D)        output: per-tile lane-dense partial sum of squared error
):
    x = x_ref[...]
    noise = noise_ref[...]
    scal = scal_ref[...]
    sab = scal[:, 0:1]      # sqrtab[t]   per-row scalar
    smab = scal[:, 1:2]     # sqrtmab[t]  per-row scalar
    rmask = scal[:, 2:3]    # 1.0 for real rows, 0.0 for batch padding

    # forward diffusion: x_t = sqrtab[t] * x + sqrtmab[t] * noise  (f32 on VPU)
    x_t = sab * x + smab * noise

    # synthetic eps-prediction model (conditional GELU MLP).
    # Matmuls in bf16 on the MXU with f32 accumulation; elementwise stays f32.
    h = jnp.dot(x_t.astype(jnp.bfloat16), w1_ref[...],
                preferred_element_type=jnp.float32)
    h = jax.nn.gelu(h + b1_ref[...] + emb_ref[...], approximate=True)
    eps = jnp.dot(h.astype(jnp.bfloat16), w2_ref[...],
                  preferred_element_type=jnp.float32) + b2_ref[...]

    # masked squared error, reduced over rows (sublane/XLU), written as a
    # lane-dense (8, D) block (each sublane duplicates the per-lane row sums).
    d = (noise - eps) * rmask
    row_sums = jnp.sum(d * d, axis=0, keepdims=True)          # (1, D)
    part_ref[...] = jnp.broadcast_to(row_sums, part_ref.shape)  # (8, D)


# ----------------------------- DDPM wrapper -----------------------------------
class DDPM:
    def __init__(self, params, betas, n_T, drop_prob=0.1, n_classes=10):
        self.params = params
        self.sched = ddpm_schedules(betas[0], betas[1], n_T)
        self.n_T = n_T
        self.drop_prob = drop_prob
        self.n_classes = n_classes

    def forward(self, key, x, c):
        """Training forward pass: returns scalar MSE loss (like the PyTorch module)."""
        B, C, H, W = x.shape
        D = C * H * W
        w1, b1, wc, wt, w2, b2 = self.params
        hidden = w1.shape[1]

        k_t, k_noise, k_mask = jax.random.split(key, 3)

        # random timesteps in [1, n_T], gaussian noise, bernoulli context mask
        _ts = jax.random.randint(k_t, (B,), 1, self.n_T + 1)
        noise = jax.random.normal(k_noise, x.shape, x.dtype)
        context_mask = jax.random.bernoulli(
            k_mask, 1.0 - self.drop_prob, (B,)
        ).astype(jnp.float32)

        # per-sample schedule scalars + row-validity mask, lane-packed together
        sab = self.sched["sqrtab"][_ts]
        smab = self.sched["sqrtmab"][_ts]
        rowmask = jnp.ones((B,), jnp.float32)
        scal = jnp.stack([sab, smab, rowmask], axis=1)            # (B, 3)

        # conditioning embedding: class-row gather + time broadcast-mul.
        # (replaces the degenerate K=10 one-hot matmul and K=1 time matmul)
        tnorm = _ts.astype(jnp.float32) / self.n_T
        emb = context_mask[:, None] * wc[c] + tnorm[:, None] * wt  # (B, hidden)

        x_flat = x.reshape(B, D)
        noise_flat = noise.reshape(B, D)

        # pad the batch to an MXU-friendly multiple of TILE_B (masked in-kernel)
        num_tiles = pl.cdiv(B, TILE_B)
        B_pad = num_tiles * TILE_B
        pad = B_pad - B
        if pad:
            x_flat = jnp.pad(x_flat, ((0, pad), (0, 0)))
            noise_flat = jnp.pad(noise_flat, ((0, pad), (0, 0)))
            scal = jnp.pad(scal, ((0, pad), (0, 0)))
            emb = jnp.pad(emb, ((0, pad), (0, 0)))

        row_spec = lambda i: (i, 0)    # batch-tiled inputs / output
        const_spec = lambda i: (0, 0)  # weights stay VMEM-resident

        flops = 4 * B_pad * D * hidden + 10 * B_pad * D
        bytes_accessed = (
            (x_flat.size + noise_flat.size + scal.size + emb.size) * 4
            + w1.size * w1.dtype.itemsize + w2.size * w2.dtype.itemsize
            + (b1.size + b2.size) * 4
            + num_tiles * 8 * D * 4
        )

        partial = pl.pallas_call(
            ddpm_forward_kernel,
            out_shape=jax.ShapeDtypeStruct((num_tiles * 8, D), jnp.float32),
            grid=(num_tiles,),
            in_specs=[
                pl.BlockSpec((TILE_B, D), row_spec),       # x
                pl.BlockSpec((TILE_B, D), row_spec),       # noise
                pl.BlockSpec((TILE_B, 3), row_spec),       # sqrtab / sqrtmab / row mask
                pl.BlockSpec((TILE_B, hidden), row_spec),  # conditioning embedding
                pl.BlockSpec((D, hidden), const_spec),     # w1 (bf16, resident)
                pl.BlockSpec((1, hidden), const_spec),     # b1
                pl.BlockSpec((hidden, D), const_spec),     # w2 (bf16, resident)
                pl.BlockSpec((1, D), const_spec),          # b2
            ],
            out_specs=pl.BlockSpec((8, D), row_spec),
            compiler_params=pltpu.CompilerParams(
                dimension_semantics=("parallel",),
                vmem_limit_bytes=32 * 1024 * 1024,
            ),
            cost_estimate=pl.CostEstimate(
                flops=int(flops),
                transcendentals=int(B_pad * hidden),
                bytes_accessed=int(bytes_accessed),
            ),
        )(x_flat, noise_flat, scal, emb, w1, b1, w2, b2)

        # each 8-row group duplicates that tile's per-lane partial sums:
        # take one row per tile, sum over tiles and lanes, normalize by true B*D.
        total = partial.reshape(num_tiles, 8, D)[:, 0, :].sum()
        return total / (B * D)


def make_params(key, in_dim, hidden, n_classes):
    """Deterministic synthetic parameters for the eps-prediction model."""
    k1, k2, k3, k4 = jax.random.split(key, 4)
    w1 = (jax.random.normal(k1, (in_dim, hidden), jnp.float32)
          / jnp.sqrt(float(in_dim))).astype(jnp.bfloat16)
    b1 = jnp.zeros((1, hidden), jnp.float32)
    wc = 0.1 * jax.random.normal(k2, (n_classes, hidden), jnp.float32)
    wt = 0.1 * jax.random.normal(k3, (1, hidden), jnp.float32)
    w2 = (jax.random.normal(k4, (hidden, in_dim), jnp.float32)
          / jnp.sqrt(float(hidden))).astype(jnp.bfloat16)
    b2 = jnp.zeros((1, in_dim), jnp.float32)
    return (w1, b1, wc, wt, w2, b2)


# ----------------------------- main --------------------------------------------
if __name__ == "__main__":
    key = jax.random.PRNGKey(0)

    B, C, H, W = 2, 4, 16, 16          # small NCHW image batch
    hidden = 128
    n_classes = 10
    n_T = 400
    betas = (1e-4, 0.02)

    kp, kx, kc, kf = jax.random.split(key, 4)
    params = make_params(kp, C * H * W, hidden, n_classes)
    x = jax.random.normal(kx, (B, C, H, W), jnp.float32)
    c = jax.random.randint(kc, (B,), 0, n_classes)

    model = DDPM(params, betas, n_T, drop_prob=0.1, n_classes=n_classes)
    loss = model.forward(kf, x, c)
    loss = jax.block_until_ready(loss)

    assert loss.shape == () and jnp.isfinite(loss), f"bad loss: {loss}"
    print("KERNEL_OK")
</pallas_src>

<mosaic_0001>
module attributes {stable_mosaic.version = 11 : i64} {
  func.func @ddpm_forward_kernel(%arg0: i32, %arg1: memref<128x1024xf32, #tpu.memory_space<vmem>>, %arg2: memref<128x1024xf32, #tpu.memory_space<vmem>>, %arg3: memref<128x3xf32, #tpu.memory_space<vmem>>, %arg4: memref<128x128xf32, #tpu.memory_space<vmem>>, %arg5: memref<1024x128xbf16, #tpu.memory_space<vmem>>, %arg6: memref<1x128xf32, #tpu.memory_space<vmem>>, %arg7: memref<128x1024xbf16, #tpu.memory_space<vmem>>, %arg8: memref<1x1024xf32, #tpu.memory_space<vmem>>, %arg9: memref<8x1024xf32, #tpu.memory_space<vmem>>) attributes {dimension_semantics = [#tpu.dimension_semantics<parallel>], iteration_bounds = array<i64: 1>, scalar_prefetch = 0 : i64, scratch_operands = 0 : i64, tpu.core_type = #tpu.core_type<tc>, window_params = [{transform_indices = @transform_0, window_bounds = array<i64: 128, 1024>}, {transform_indices = @transform_1, window_bounds = array<i64: 128, 1024>}, {transform_indices = @transform_2, window_bounds = array<i64: 128, 3>}, {transform_indices = @transform_3, window_bounds = array<i64: 128, 128>}, {pipeline_mode = #tpu.pipeline_mode<synchronous>, transform_indices = @transform_4, window_bounds = array<i64: 1024, 128>}, {pipeline_mode = #tpu.pipeline_mode<synchronous>, transform_indices = @transform_5, window_bounds = array<i64: 1, 128>}, {pipeline_mode = #tpu.pipeline_mode<synchronous>, transform_indices = @transform_6, window_bounds = array<i64: 128, 1024>}, {pipeline_mode = #tpu.pipeline_mode<synchronous>, transform_indices = @transform_7, window_bounds = array<i64: 1, 1024>}, {transform_indices = @transform_8, window_bounds = array<i64: 8, 1024>}]} {
    %c0 = arith.constant 0 : index
    %c0_0 = arith.constant 0 : index
    %0 = vector.load %arg1[%c0, %c0_0] : memref<128x1024xf32, #tpu.memory_space<vmem>>, vector<128x1024xf32>
    %c0_1 = arith.constant 0 : index
    %c0_2 = arith.constant 0 : index
    %1 = vector.load %arg2[%c0_1, %c0_2] : memref<128x1024xf32, #tpu.memory_space<vmem>>, vector<128x1024xf32>
    %c0_3 = arith.constant 0 : index
    %c0_4 = arith.constant 0 : index
    %2 = vector.load %arg3[%c0_3, %c0_4] : memref<128x3xf32, #tpu.memory_space<vmem>>, vector<128x3xf32>
    %3 = vector.extract_strided_slice %2 {offsets = [0, 0], sizes = [128, 1], strides = [1, 1]} : vector<128x3xf32> to vector<128x1xf32>
    %4 = vector.extract_strided_slice %2 {offsets = [0, 1], sizes = [128, 1], strides = [1, 1]} : vector<128x3xf32> to vector<128x1xf32>
    %5 = vector.extract_strided_slice %2 {offsets = [0, 2], sizes = [128, 1], strides = [1, 1]} : vector<128x3xf32> to vector<128x1xf32>
    %6 = vector.broadcast %3 : vector<128x1xf32> to vector<128x1024xf32>
    %7 = arith.mulf %6, %0 : vector<128x1024xf32>
    %8 = vector.broadcast %4 : vector<128x1xf32> to vector<128x1024xf32>
    %9 = arith.mulf %8, %1 : vector<128x1024xf32>
    %10 = arith.addf %7, %9 : vector<128x1024xf32>
    %11 = arith.truncf %10 : vector<128x1024xf32> to vector<128x1024xbf16>
    %c0_5 = arith.constant 0 : index
    %c0_6 = arith.constant 0 : index
    %12 = vector.load %arg5[%c0_5, %c0_6] : memref<1024x128xbf16, #tpu.memory_space<vmem>>, vector<1024x128xbf16>
    %cst = arith.constant dense<0.000000e+00> : vector<128x128xf32>
    %13 = tpu.matmul %11, %12, %cst {dimension_numbers = #tpu.dot_dimension_numbers<[1], [0], [0], [1], [0, 0, 1, 1], [], []>} : vector<128x1024xbf16>, vector<1024x128xbf16>, vector<128x128xf32> -> vector<128x128xf32>
    %c0_7 = arith.constant 0 : index
    %c0_8 = arith.constant 0 : index
    %14 = vector.load %arg6[%c0_7, %c0_8] : memref<1x128xf32, #tpu.memory_space<vmem>>, vector<1x128xf32>
    %15 = vector.broadcast %14 : vector<1x128xf32> to vector<128x128xf32>
    %16 = arith.addf %13, %15 : vector<128x128xf32>
    %c0_9 = arith.constant 0 : index
    %c0_10 = arith.constant 0 : index
    %17 = vector.load %arg4[%c0_9, %c0_10] : memref<128x128xf32, #tpu.memory_space<vmem>>, vector<128x128xf32>
    %18 = arith.addf %16, %17 : vector<128x128xf32>
    %19 = arith.mulf %18, %18 : vector<128x128xf32>
    %20 = arith.mulf %18, %19 : vector<128x128xf32>
    %cst_11 = arith.constant 4.471500e-02 : f32
    %21 = vector.broadcast %cst_11 : f32 to vector<128x128xf32>
    %22 = arith.mulf %21, %20 : vector<128x128xf32>
    %23 = arith.addf %18, %22 : vector<128x128xf32>
    %cst_12 = arith.constant 0.797884583 : f32
    %24 = vector.broadcast %cst_12 : f32 to vector<128x128xf32>
    %25 = arith.mulf %24, %23 : vector<128x128xf32>
    %26 = math.tanh %25 : vector<128x128xf32>
    %cst_13 = arith.constant 1.000000e+00 : f32
    %27 = vector.broadcast %cst_13 : f32 to vector<128x128xf32>
    %28 = arith.addf %27, %26 : vector<128x128xf32>
    %cst_14 = arith.constant 5.000000e-01 : f32
    %29 = vector.broadcast %cst_14 : f32 to vector<128x128xf32>
    %30 = arith.mulf %29, %28 : vector<128x128xf32>
    %31 = arith.mulf %18, %30 : vector<128x128xf32>
    %32 = arith.truncf %31 : vector<128x128xf32> to vector<128x128xbf16>
    %c0_15 = arith.constant 0 : index
    %c0_16 = arith.constant 0 : index
    %33 = vector.load %arg7[%c0_15, %c0_16] : memref<128x1024xbf16, #tpu.memory_space<vmem>>, vector<128x1024xbf16>
    %cst_17 = arith.constant dense<0.000000e+00> : vector<128x1024xf32>
    %34 = tpu.matmul %32, %33, %cst_17 {dimension_numbers = #tpu.dot_dimension_numbers<[1], [0], [0], [1], [0, 0, 1, 1], [], []>} : vector<128x128xbf16>, vector<128x1024xbf16>, vector<128x1024xf32> -> vector<128x1024xf32>
    %c0_18 = arith.constant 0 : index
    %c0_19 = arith.constant 0 : index
    %35 = vector.load %arg8[%c0_18, %c0_19] : memref<1x1024xf32, #tpu.memory_space<vmem>>, vector<1x1024xf32>
    %36 = vector.broadcast %35 : vector<1x1024xf32> to vector<128x1024xf32>
    %37 = arith.addf %34, %36 : vector<128x1024xf32>
    %38 = arith.subf %1, %37 : vector<128x1024xf32>
    %39 = vector.broadcast %5 : vector<128x1xf32> to vector<128x1024xf32>
    %40 = arith.mulf %38, %39 : vector<128x1024xf32>
    %41 = arith.mulf %40, %40 : vector<128x1024xf32>
    %cst_20 = arith.constant dense<0.000000e+00> : vector<1024xf32>
    %42 = vector.multi_reduction <add>, %41, %cst_20 [0] : vector<128x1024xf32> to vector<1024xf32>
    %43 = vector.shape_cast %42 : vector<1024xf32> to vector<1x1024xf32>
    %44 = vector.shape_cast %43 : vector<1x1024xf32> to vector<1x1024xf32>
    %45 = vector.broadcast %44 : vector<1x1024xf32> to vector<8x1024xf32>
    %c0_21 = arith.constant 0 : index
    %c0_22 = arith.constant 0 : index
    %46 = vector.load %arg9[%c0_21, %c0_22] : memref<8x1024xf32, #tpu.memory_space<vmem>>, vector<8x1024xf32>
    tpu.vector_store %arg9[%c0_21, %c0_22], %45 {strides = array<i32>} : memref<8x1024xf32, #tpu.memory_space<vmem>>, vector<8x1024xf32>,
    return
  }
  func.func @transform_0(%arg0: i32) -> (i32, i32) {
    %c0_i32 = arith.constant 0 : i32
    %c0_i32_0 = arith.constant 0 : i32
    return %arg0, %c0_i32 : i32, i32
  }
  func.func @transform_1(%arg0: i32) -> (i32, i32) {
    %c0_i32 = arith.constant 0 : i32
    %c0_i32_0 = arith.constant 0 : i32
    return %arg0, %c0_i32 : i32, i32
  }
  func.func @transform_2(%arg0: i32) -> (i32, i32) {
    %c0_i32 = arith.constant 0 : i32
    %c0_i32_0 = arith.constant 0 : i32
    return %arg0, %c0_i32 : i32, i32
  }
  func.func @transform_3(%arg0: i32) -> (i32, i32) {
    %c0_i32 = arith.constant 0 : i32
    %c0_i32_0 = arith.constant 0 : i32
    return %arg0, %c0_i32 : i32, i32
  }
  func.func @transform_4(%arg0: i32) -> (i32, i32) {
    %c0_i32 = arith.constant 0 : i32
    %c0_i32_0 = arith.constant 0 : i32
    %c0_i32_1 = arith.constant 0 : i32
    return %c0_i32, %c0_i32_0 : i32, i32
  }
  func.func @transform_5(%arg0: i32) -> (i32, i32) {
    %c0_i32 = arith.constant 0 : i32
    %c0_i32_0 = arith.constant 0 : i32
    %c0_i32_1 = arith.constant 0 : i32
    return %c0_i32, %c0_i32_0 : i32, i32
  }
  func.func @transform_6(%arg0: i32) -> (i32, i32) {
    %c0_i32 = arith.constant 0 : i32
    %c0_i32_0 = arith.constant 0 : i32
    %c0_i32_1 = arith.constant 0 : i32
    return %c0_i32, %c0_i32_0 : i32, i32
  }
  func.func @transform_7(%arg0: i32) -> (i32, i32) {
    %c0_i32 = arith.constant 0 : i32
    %c0_i32_0 = arith.constant 0 : i32
    %c0_i32_1 = arith.constant 0 : i32
    return %c0_i32, %c0_i32_0 : i32, i32
  }
  func.func @transform_8(%arg0: i32) -> (i32, i32) {
    %c0_i32 = arith.constant 0 : i32
    %c0_i32_0 = arith.constant 0 : i32
    return %arg0, %c0_i32 : i32, i32
  }
}

</mosaic_0001>

<bundles_post_ra>
// kernel: tpu_custom_call.1
= control target key start
LH: loop header
LB: loop body
LE: loop exit
PB: predicated region body
PF: predicated region fallthrough
CT: control target
= control target key end

     0   :  { %13 = vsyncpa [#allocation3], 0  ;;  %s6274_s0 = inlined_call_operand.hbm [shape: f32[128,1024], index: 0, kind: input, shape index: {}]   ;;  %s6275_s1 = inlined_call_operand.hbm [shape: f32[128,1024], index: 1, kind: input, shape index: {}]   ;;  %s6276_s2 = inlined_call_operand.vmem [shape: f32[128,3], index: 2, kind: input, shape index: {}]   ;;  %s6277_s3 = inlined_call_operand.vmem [shape: f32[128,128], index: 3, kind: input, shape index: {}]   ;;  %s6278_s4 = inlined_call_operand.hbm [shape: bf16[1024,128], index: 4, kind: input, shape index: {}]   ;;  %s6279_s5 = inlined_call_operand.vmem [shape: f32[1,128], index: 5, kind: input, shape index: {}]   ;;  %s6280_s6 = inlined_call_operand.hbm [shape: bf16[128,1024], index: 6, kind: input, shape index: {}]   ;;  %s6281_s7 = inlined_call_operand.vmem [shape: f32[1,1024], index: 7, kind: input, shape index: {}]   ;;  %s6282_s8 = inlined_call_operand.hbm [shape: f32[8,1024], index: 8, kind: output, shape index: {}]  }
   0x1   :  { %14 = vsyncpa [#allocation6], 0 }
   0x2   :  { %15 = vsyncpa [#allocation9], 0 }
   0x3   :  { %16 = vsyncpa [#allocation4], 0  ;;  %s4329_s27 = smov [#allocation5]   ;;  %s4330_s29 = smov [#allocation2]  }
   0x4   :  { %s34_s28 = sshll.u32 %s4329_s27, 4  ;;  %s22_s30 = sshll.u32 %s4330_s29, 4  ;;  %s35_s28 = int_to_ptr.vmem [resolvable:$true] %s34_s28  ;;  %s23_s30 = int_to_ptr.vmem [resolvable:$true] %s22_s30 }
   0x5   :  { %s4229_s9 = scalar_lea.vmem %s35_s28, 16384  ;;  %p4234_p1 = scmp.lt.s32.totalorder %s35_s28, %s35_s28 }
   0x6   :  { %p4230_p0 = scmp.ne.s32.totalorder %s35_s28, %s4229_s9  ;;  %p4235_p2 = scmp.lt.s32.totalorder %s4229_s9, %s4229_s9 }
   0x8   :  { %p4236_p3 = por %p4235_p2, %p4234_p1 }
   0xa   :  { %p4237_p4 = pnand %p4236_p3, %p4230_p0 }
   0xc   :  { %4240 = shalt.err (!%p4237_p4)
}
   0xd   :  { %s4331_s10 = smov 1024   ;;  %s4332_s11 = smov 64  }
   0xe   :  { %40 = dma.hbm_to_vmem [thread:$0]  %s6275_s1, 16384, %s35_s28, [#allocation6], %s4331_s10, %s4331_s10, %s4332_s11  }
   0xf   :  { %s4249_s14 = scalar_lea.vmem %s23_s30, 16384  ;;  %p4254_p6 = scmp.lt.s32.totalorder %s23_s30, %s23_s30 }
  0x10   :  { %p4250_p5 = scmp.ne.s32.totalorder %s23_s30, %s4249_s14  ;;  %p4255_p7 = scmp.lt.s32.totalorder %s4249_s14, %s4249_s14 }
  0x12   :  { %p4256_p8 = por %p4255_p7, %p4254_p6 }
  0x14   :  { %p4257_p9 = pnand %p4256_p8, %p4250_p5 }
  0x16   :  { %4260 = shalt.err (!%p4257_p9)
}
  0x17   :  { %28 = dma.hbm_to_vmem [thread:$0]  %s6274_s0, 16384, %s23_s30, [#allocation3], %s4331_s10, %s4331_s10, %s4332_s11  }
  0x18   :  { %s4333_s17 = smov [#allocation7]   ;;  %s4334_s19 = smov [#allocation8]  }
  0x19   :  { %s50_s18 = sshll.u32 %s4333_s17, 4  ;;  %s64_s20 = sshll.u32 %s4334_s19, 4  ;;  %s51_s18 = int_to_ptr.vmem [resolvable:$true] %s50_s18  ;;  %s65_s20 = int_to_ptr.vmem [resolvable:$true] %s64_s20 }
  0x1a   :  { %s4269_s21 = scalar_lea.vmem %s51_s18, 8192  ;;  %p4274_p11 = scmp.lt.s32.totalorder %s51_s18, %s51_s18 }
  0x1b   :  { %p4270_p10 = scmp.ne.s32.totalorder %s51_s18, %s4269_s21  ;;  %p4275_p12 = scmp.lt.s32.totalorder %s4269_s21, %s4269_s21 }
  0x1d   :  { %p4276_p13 = por %p4275_p12, %p4274_p11 }
  0x1f   :  { %p4277_p0 = pnand %p4276_p13, %p4270_p10 }
  0x21   :  { %4280 = shalt.err (!%p4277_p0)
}
  0x22   :  { %s4335_s1 = smov 4   ;;  %s4289_s24 = scalar_lea.vmem %s65_s20, 8192 }
  0x23   :  { %56 = dma.hbm_to_vmem [thread:$0]  %s6278_s4, 8192, %s51_s18, [#allocation6], %s4332_s11, %s4332_s11, %s4335_s1  }
  0x24   :  { %p4290_p1 = scmp.ne.s32.totalorder %s65_s20, %s4289_s24  ;;  %p4294_p2 = scmp.lt.s32.totalorder %s65_s20, %s65_s20 }
  0x25   :  { %p4295_p3 = scmp.lt.s32.totalorder %s4289_s24, %s4289_s24 }
  0x27   :  { %p4296_p4 = por %p4295_p3, %p4294_p2 }
  0x29   :  { %p4297_p5 = pnand %p4296_p4, %p4290_p1 }
  0x2b   :  { %4300 = shalt.err (!%p4297_p5)
}
  0x2c   :  { %s4336_s0 = smov 512   ;;  %s4337_s25 = smov 32  }
  0x2d   :  { %70 = dma.hbm_to_vmem [thread:$0]  %s6280_s6, 8192, %s65_s20, [#allocation9], %s4336_s0, %s4336_s0, %s4337_s25  }
  0x2e   :  { %4321 = dma.done.wait [#allocation3], 16384  }
  0x2f   :  { %4322 = vsyncadd [#allocation3], 4294950912 }
  0x30   :  { %4323 = dma.done.wait [#allocation6], 24576  }
  0x31   :  { %4324 = vsyncadd [#allocation6], 4294942720 }
  0x32   :  { %4325 = dma.done.wait [#allocation9], 8192  }
  0x33   :  { %4326 = vsyncadd [#allocation9], 4294959104  ;;  %v4338_v0 = vmov 1   ;;  %v6283_v1 = vmov 0   ;;  %v342_v2 = vld [vmem:[%s6276_s2] sm:$0xff]  ;;  %v343_v3 = vld [vmem:[%s6276_s2 + $0x8] sm:$0xff] }
  0x34   :  { %3959 = vset.pattern.permute.xlu1 %v4338_v0  ;;  %3958 = vset.pattern.permute.xlu0 %v6283_v1  ;;  %v345_v4 = vld [vmem:[%s6276_s2 + $0x18] sm:$0xff]  ;;  %v344_v5 = vld [vmem:[%s6276_s2 + $0x10] sm:$0xff]  ;;  %v3989_v15 = vld [vmem:[#allocation7 + $0x68] sm:$0xff]  }
  0x35   :  { %567 = vperm.xlu1 %3959, %v342_v2   ;;  %360 = vperm.xlu0 %3958, %v342_v2   ;;  %v3981_v6 = vld [vmem:[#allocation7 + $0x78] sm:$0xff]   ;;  %v3985_v10 = vld [vmem:[#allocation7 + $0x70] sm:$0xff]   ;;  %v346_v16 = vld [vmem:[%s6276_s2 + $0x20] sm:$0xff] }
  0x36   :  { %v3982_v7 = vld [vmem:[#allocation7 + $0xf8] sm:$0xff]   ;;  %3689 = vmatprep.subr.bf16.mxu0 %v3981_v6  ;;  %v3986_v11 = vld [vmem:[#allocation7 + $0xf0] sm:$0xff]   ;;  %v3990_v17 = vld [vmem:[#allocation7 + $0xe8] sm:$0xff]  }
  0x37   :  { %v3983_v8 = vld [vmem:[#allocation7 + $0x38] sm:$0xff]   ;;  %3753 = vmatprep.subr.bf16.mxu1 %v3982_v7  ;;  %v3987_v12 = vld [vmem:[#allocation7 + $0x30] sm:$0xff]   ;;  %v3991_v18 = vld [vmem:[#allocation7 + $0x28] sm:$0xff]  }
  0x38   :  { %v3984_v9 = vld [vmem:[#allocation7 + $0xb8] sm:$0xff]   ;;  %3690 = vmatpush3.bf16.msra.mxu0 %v3983_v8  ;;  %v348_v13 = vld [vmem:[%s6276_s2 + $0x30] sm:$0xff]  ;;  %v3992_v19 = vld [vmem:[#allocation7 + $0xa8] sm:$0xff]  }
  0x39   :  { %571 = vperm.xlu1 %3959, %v343_v3   ;;  %365 = vperm.xlu0 %3958, %v343_v3   ;;  %v3988_v14 = vld [vmem:[#allocation7 + $0xb0] sm:$0xff]   ;;  %v347_v20 = vld [vmem:[%s6276_s2 + $0x28] sm:$0xff]  ;;  %v3993_v21 = vld [vmem:[#allocation7 + $0x60] sm:$0xff]  }
  0x3a   :  { %3754 = vmatpush3.bf16.msra.mxu1 %v3984_v9  ;;  %3691 = vmatprep.subr.bf16.mxu0 %v3985_v10  ;;  %v3994_v22 = vld [vmem:[#allocation7 + $0xe0] sm:$0xff]   ;;  %v3997_v25 = vld [vmem:[#allocation7 + $0x58] sm:$0xff]   ;;  %v351_v29 = vld [vmem:[%s6276_s2 + $0x48] sm:$0xff] }
  0x3b   :  { %3755 = vmatprep.subr.bf16.mxu1 %v3986_v11  ;;  %v3995_v23 = vld [vmem:[#allocation7 + $0x20] sm:$0xff]   ;;  %v3998_v26 = vld [vmem:[#allocation7 + $0xd8] sm:$0xff]   ;;  %v4001_v30 = vld [vmem:[#allocation7 + $0x50] sm:$0xff]  }
  0x3c   :  { %3692 = vmatpush3.bf16.msra.mxu0 %v3987_v12  ;;  %v3996_v24 = vld [vmem:[#allocation7 + $0xa0] sm:$0xff]   ;;  %v3999_v27 = vld [vmem:[#allocation7 + $0x18] sm:$0xff]   ;;  %v4002_v31 = vld [vmem:[#allocation7 + $0xd0] sm:$0xff]  }
  0x3d   :  { %3960 = vset.pattern.permute.xlu1 %v6283_v1  ;;  %370 = vperm.xlu0 %3958, %v344_v5   ;;  %v4000_v28 = vld [vmem:[#allocation7 + $0x98] sm:$0xff]   ;;  %v4003_v32 = vld [vmem:[#allocation7 + $0x10] sm:$0xff]   ;;  %v4005_v35 = vld [vmem:[#allocation7 + $0x48] sm:$0xff]  }
  0x3e   :  { %375 = vperm.xlu1 %3960, %v345_v4   ;;  %3756 = vmatpush3.bf16.msra.mxu1 %v3988_v14  ;;  %v349_v33 = vld [vmem:[%s6276_s2 + $0x38] sm:$0xff]  ;;  %v4004_v34 = vld [vmem:[#allocation7 + $0x90] sm:$0xff]   ;;  %v4006_v37 = vld [vmem:[#allocation7 + $0xc8] sm:$0xff]  }
  0x3f   :  { %3693 = vmatprep.subr.bf16.mxu0 %v3989_v15  ;;  %3757 = vmatprep.subr.bf16.mxu1 %v3990_v17  ;;  %v352_v36 = vld [vmem:[%s6276_s2 + $0x50] sm:$0xff]  ;;  %v4007_v38 = vld [vmem:[#allocation7 + $0x8] sm:$0xff]   ;;  %v4009_v40 = vld [vmem:[#allocation7 + $0x40] sm:$0xff]  }
  0x40   :  { %3694 = vmatpush3.bf16.msra.mxu0 %v3991_v18  ;;  %v4008_v39 = vld [vmem:[#allocation7 + $0x88] sm:$0xff]   ;;  %v4010_v41 = vld [vmem:[#allocation7 + $0xc0] sm:$0xff]   ;;  %v356_v46 = vld [vmem:[%s6276_s2 + $0x70] sm:$0xff] }
  0x41   :  { %3961 = vset.pattern.permute.xlu0 %v4338_v0  ;;  %3695 = vmatprep.subr.bf16.mxu0 %v3993_v21  ;;  %v4011_v42 = vld [vmem:[#allocation7] sm:$0xff]   ;;  %v355_v45 = vld [vmem:[%s6276_s2 + $0x68] sm:$0xff]  ;;  %v4013_v47 = vld [vmem:[#allocation7 + $0x178] sm:$0xff]  }
  0x42   :  { %3962 = vset.pattern.permute.xlu1 %v4338_v0  ;;  %575 = vperm.xlu0 %3961, %v344_v5   ;;  %v4012_v43 = vld [vmem:[#allocation7 + $0x80] sm:$0xff]   ;;  %v353_v48 = vld [vmem:[%s6276_s2 + $0x58] sm:$0xff]  ;;  %v87_v52 = vld [vmem:[#allocation2 + $0x8] sm:$0xff] }
  0x43   :  { %579 = vperm.xlu1 %3962, %v345_v4   ;;  %3758 = vmatpush3.bf16.msra.mxu1 %v3992_v19  ;;  %v350_v44 = vld [vmem:[%s6276_s2 + $0x40] sm:$0xff]  ;;  %v4015_v49 = vld [vmem:[#allocation7 + $0x1f8] sm:$0xff]   ;;  %v215_v53 = vld [vmem:[#allocation5 + $0x8] sm:$0xff] }
  0x44   :  { %3759 = vmatprep.subr.bf16.mxu1 %v3994_v22  ;;  %3696 = vmatpush3.bf16.msra.mxu0 %v3995_v23  ;;  %v354_v50 = vld [vmem:[%s6276_s2 + $0x60] sm:$0xff]  ;;  %v357_v51 = vld [vmem:[%s6276_s2 + $0x78] sm:$0xff]  ;;  %v88_v58 = vld [vmem:[#allocation2 + $0x10] sm:$0xff] }
  0x45   :  { %3697 = vmatprep.subr.bf16.mxu0 %v3997_v25  ;;  %v89_v54 = vld [vmem:[#allocation2 + $0x18] sm:$0xff]  ;;  %v86_v56 = vld [vmem:[#allocation2] sm:$0xff]  ;;  %v216_v59 = vld [vmem:[#allocation5 + $0x10] sm:$0xff] }
  0x46   :  { %591 = vperm.xlu0 %3961, %v348_v13   ;;  %v217_v55 = vld [vmem:[#allocation5 + $0x18] sm:$0xff]  ;;  %v214_v57 = vld [vmem:[#allocation5] sm:$0xff]  ;;  %v95_v62 = vld [vmem:[#allocation2 + $0x48] sm:$0xff] }
  0x47   :  { %3963 = vset.pattern.permute.xlu1 %v6283_v1  ;;  %3760 = vmatpush3.bf16.msra.mxu1 %v3996_v24  ;;  %v91_v63 = vld [vmem:[#allocation2 + $0x28] sm:$0xff]  ;;  %v93_v7 = vld [vmem:[#allocation2 + $0x38] sm:$0xff]  ;;  %v94_v11 = vld [vmem:[#allocation2 + $0x40] sm:$0xff] }
  0x48   :  { %380 = vperm.xlu1 %3963, %v346_v16   ;;  %3761 = vmatprep.subr.bf16.mxu1 %v3998_v26  ;;  %v219_v2 = vld [vmem:[#allocation5 + $0x28] sm:$0xff]  ;;  %v221_v8 = vld [vmem:[#allocation5 + $0x38] sm:$0xff]  ;;  %v222_v18 = vld [vmem:[#allocation5 + $0x40] sm:$0xff] }
  0x49   :  { %3698 = vmatpush3.bf16.msra.mxu0 %v3999_v27  ;;  %v223_v3 = vld [vmem:[#allocation5 + $0x48] sm:$0xff]  ;;  %v97_v9 = vld [vmem:[#allocation2 + $0x58] sm:$0xff]  ;;  %v96_v19 = vld [vmem:[#allocation2 + $0x50] sm:$0xff] }
  0x4a   :  { %3966 = vset.pattern.permute.xlu0 %v6283_v1  ;;  %3699 = vmatprep.subr.bf16.mxu0 %v4001_v30  ;;  %v225_v10 = vld [vmem:[#allocation5 + $0x58] sm:$0xff]  ;;  %v99_v27 = vld [vmem:[#allocation2 + $0x68] sm:$0xff] }
  0x4b   :  { %385 = vperm.xlu0 %3966, %v347_v20   ;;  %3762 = vmatpush3.bf16.msra.mxu1 %v4000_v28  ;;  %v227_v28 = vld [vmem:[#allocation5 + $0x68] sm:$0xff] }
  0x4c   :  { %3964 = vset.pattern.permute.xlu1 %v4338_v0  ;;  %3763 = vmatprep.subr.bf16.mxu1 %v4002_v31 }
  0x4d   :  { %583 = vperm.xlu1 %3964, %v346_v16   ;;  %3700 = vmatpush3.bf16.msra.mxu0 %v4003_v32 }
  0x4e   :  { %3701 = vmatprep.subr.bf16.mxu0 %v4005_v35  ;;  %v101_v35 = vld [vmem:[#allocation2 + $0x78] sm:$0xff] }
  0x4f   :  { %390 = vperm.xlu0 %3966, %v348_v13   ;;  %3764 = vmatpush3.bf16.msra.mxu1 %v4004_v34 }
  0x50   :  { %3765 = vmatprep.subr.bf16.mxu1 %v4006_v37 }
  0x51   :  { %587 = vperm.xlu1 %3964, %v347_v20   ;;  %3702 = vmatpush3.bf16.msra.mxu0 %v4007_v38  ;;  %v224_v20 = vld [vmem:[#allocation5 + $0x50] sm:$0xff] }
  0x52   :  { %3703 = vmatprep.subr.bf16.mxu0 %v4009_v40  ;;  %v103_v40 = vld [vmem:[#allocation2 + $0x88] sm:$0xff] }
  0x53   :  { %405 = vperm.xlu0 %3966, %v351_v29   ;;  %3766 = vmatpush3.bf16.msra.mxu1 %v4008_v39 }
  0x54   :  { %3767 = vmatprep.subr.bf16.mxu1 %v4010_v41  ;;  %v105_v41 = vld [vmem:[#allocation2 + $0x98] sm:$0xff] }
  0x55   :  { %3965 = vset.pattern.permute.xlu1 %v6283_v1  ;;  %3704 = vmatpush3.bf16.msra.mxu0 %v4011_v42 }
  0x56   :  { %395 = vperm.xlu1 %3965, %v349_v33   ;;  %3817 = vmatprep.subr.bf16.mxu0 %v4013_v47 }
  0x57   :  { %3971 = vset.pattern.permute.xlu0 %v4338_v0  ;;  %3768 = vmatpush3.bf16.msra.mxu1 %v4012_v43 }
  0x58   :  { %607 = vperm.xlu0 %3971, %v352_v36   ;;  %3881 = vmatprep.subr.bf16.mxu1 %v4015_v49 }
  0x5a   :  { %3967 = vset.pattern.permute.xlu1 %v4338_v0 }
  0x5b   :  { %595 = vperm.xlu1 %3967, %v349_v33  }
  0x5c   :  { %3972 = vset.pattern.permute.xlu0 %v6283_v1 }
  0x5d   :  { %410 = vperm.xlu0 %3972, %v352_v36  }
  0x5f   :  { %3968 = vset.pattern.permute.xlu1 %v6283_v1 }
  0x60   :  { %400 = vperm.xlu1 %3968, %v350_v44  }
  0x61   :  { %425 = vperm.xlu0 %3972, %v355_v45  }
  0x64   :  { %3969 = vset.pattern.permute.xlu1 %v4338_v0 }
  0x65   :  { %599 = vperm.xlu1 %3969, %v350_v44   ;;  %430 = vperm.xlu0 %3972, %v356_v46   ;;  %v111_v44 = vld [vmem:[#allocation2 + $0xc8] sm:$0xff] }
  0x69   :  { %603 = vperm.xlu1 %3969, %v351_v29   ;;  %3977 = vset.pattern.permute.xlu0 %v4338_v0 }
  0x6a   :  { %623 = vperm.xlu0 %3977, %v356_v46   ;;  %v102_v46 = vld [vmem:[#allocation2 + $0x80] sm:$0xff] }
  0x6d   :  { %3970 = vset.pattern.permute.xlu1 %v6283_v1 }
  0x6e   :  { %415 = vperm.xlu1 %3970, %v353_v48  }
  0x72   :  { %3973 = vset.pattern.permute.xlu1 %v4338_v0 }
  0x73   :  { %611 = vperm.xlu1 %3973, %v353_v48  }
  0x77   :  { %3974 = vset.pattern.permute.xlu1 %v6283_v1 }
  0x78   :  { %420 = vperm.xlu1 %3974, %v354_v50  }
  0x7c   :  { %3975 = vset.pattern.permute.xlu1 %v4338_v0 }
  0x7d   :  { %615 = vperm.xlu1 %3975, %v354_v50  }
  0x81   :  { %619 = vperm.xlu1 %3975, %v355_v45   ;;  %v113_v45 = vld [vmem:[#allocation2 + $0xd8] sm:$0xff] }
  0x85   :  { %3976 = vset.pattern.permute.xlu1 %v6283_v1 }
  0x86   :  { %435 = vperm.xlu1 %3976, %v357_v51  }
  0x8a   :  { %3978 = vset.pattern.permute.xlu1 %v4338_v0 }
  0x8b   :  { %627 = vperm.xlu1 %3978, %v357_v51  }
  0xb0   :  { %v4468_v60 = vpop.permute.xlu1 %567  ;;  %v4470_v61 = vpop.permute.xlu0 %360 }
  0xb1   :  { %v439_v4 = vmul.f32 %v4470_v61, %v87_v52  ;;  %v631_v0 = vmul.f32 %v4468_v60, %v215_v53  ;;  %v441_v5 = vmul.f32 %v4470_v61, %v89_v54  ;;  %v633_v6 = vmul.f32 %v4468_v60, %v217_v55  ;;  %v110_v52 = vld [vmem:[#allocation2 + $0xc0] sm:$0xff]  ;;  %v104_v53 = vld [vmem:[#allocation2 + $0x90] sm:$0xff] }
  0xb2   :  { %v438_v12 = vmul.f32 %v4470_v61, %v86_v56  ;;  %v630_v13 = vmul.f32 %v4468_v60, %v214_v57  ;;  %v440_v14 = vmul.f32 %v4470_v61, %v88_v58  ;;  %v632_v15 = vmul.f32 %v4468_v60, %v216_v59  ;;  %v112_v54 = vld [vmem:[#allocation2 + $0xd0] sm:$0xff] }
  0xb3   :  { %v759_v16 = vadd.f32 %v631_v0, %v439_v4  ;;  %v761_v17 = vadd.f32 %v633_v6, %v441_v5  ;;  %v443_v21 = vmul.f32 %v4470_v61, %v91_v63  ;;  %v635_v22 = vmul.f32 %v4468_v60, %v219_v2  ;;  %v233_v2 = vld [vmem:[#allocation5 + $0x98] sm:$0xff] }
  0xb4   :  { %v4482_v23 = vpop.permute.xlu1 %571  ;;  %v4484_v24 = vpop.permute.xlu0 %365  ;;  %v758_v25 = vadd.f32 %v630_v13, %v438_v12  ;;  %v760_v26 = vadd.f32 %v632_v15, %v440_v14  ;;  %v4487_v29 = vmul.f32 %v4470_v61, %v93_v7  ;;  %v4490_v30 = vmul.f32 %v4468_v60, %v221_v8  ;;  %v4014_v4 = vld [vmem:[#allocation7 + $0x138] sm:$0xff]   ;;  %v239_v8 = vld [vmem:[#allocation5 + $0xc8] sm:$0xff]  ;;  %v90_v12 = vld [vmem:[#allocation2 + $0x20] sm:$0xff] }
  0xb5   :  { %v447_v31 = vmul.f32 %v4484_v24, %v95_v62  ;;  %v639_v32 = vmul.f32 %v4482_v23, %v223_v3  ;;  %v449_v33 = vmul.f32 %v4484_v24, %v97_v9  ;;  %v641_v34 = vmul.f32 %v4482_v23, %v225_v10  ;;  %v231_v62 = vld [vmem:[#allocation5 + $0x88] sm:$0xff]  ;;  %v4016_v0 = vld [vmem:[#allocation7 + $0x1b8] sm:$0xff]   ;;  %v98_v13 = vld [vmem:[#allocation2 + $0x60] sm:$0xff] }
  0xb6   :  { %v446_v36 = vmul.f32 %v4484_v24, %v94_v11  ;;  %v638_v37 = vmul.f32 %v4482_v23, %v222_v18  ;;  %v448_v38 = vmul.f32 %v4484_v24, %v96_v19  ;;  %v640_v39 = vmul.f32 %v4482_v23, %v224_v20  ;;  %v229_v5 = vld [vmem:[#allocation5 + $0x78] sm:$0xff]  ;;  %v4017_v11 = vld [vmem:[#allocation7 + $0x170] sm:$0xff]   ;;  %v230_v14 = vld [vmem:[#allocation5 + $0x80] sm:$0xff] }
  0xb7   :  { %v767_v42 = vadd.f32 %v639_v32, %v447_v31  ;;  %v769_v43 = vadd.f32 %v641_v34, %v449_v33  ;;  %v451_v47 = vmul.f32 %v4484_v24, %v99_v27  ;;  %v643_v48 = vmul.f32 %v4482_v23, %v227_v28  ;;  %v4019_v19 = vld [vmem:[#allocation7 + $0x1f0] sm:$0xff]   ;;  %v241_v20 = vld [vmem:[#allocation5 + $0xd8] sm:$0xff] }
  0xb8   :  { %v4502_v49 = vpop.permute.xlu0 %370  ;;  %v766_v50 = vadd.f32 %v638_v37, %v446_v36  ;;  %v768_v51 = vadd.f32 %v640_v39, %v448_v38  ;;  %v4504_v55 = vadd.f32 %v635_v22, %v443_v21  ;;  %v4507_v56 = vmul.f32 %v4484_v24, %v101_v35  ;;  %v238_v21 = vld [vmem:[#allocation5 + $0xc0] sm:$0xff]  ;;  %v240_v22 = vld [vmem:[#allocation5 + $0xd0] sm:$0xff] }
  0xb9   :  { %v4509_v57 = vpop.permute.xlu1 %375  ;;  %v887_v58 = vpack.c.bf16 %v767_v42, %v759_v16  ;;  %v889_v59 = vpack.c.bf16 %v769_v43, %v761_v17  ;;  %v455_v63 = vmul.f32 %v4502_v49, %v103_v40  ;;  %v457_v3 = vmul.f32 %v4502_v49, %v105_v41  ;;  %v232_v17 = vld [vmem:[#allocation5 + $0x90] sm:$0xff]  ;;  %v263_v40 = vld [vmem:[#allocation5 + $0x188] sm:$0xff]  ;;  %v265_v41 = vld [vmem:[#allocation5 + $0x198] sm:$0xff] }
  0xba   :  { %6339 = vst [vmem:[#allocation15_spill] sm:$0xff] %v4504_v55  ;;  %v886_v6 = vpack.c.bf16 %v766_v50, %v758_v25  ;;  %v888_v7 = vpack.c.bf16 %v768_v51, %v760_v26  ;;  %v463_v9 = vmul.f32 %v4509_v57, %v111_v44  ;;  %v465_v10 = vmul.f32 %v4509_v57, %v113_v45  ;;  %v4018_v31 = vld [vmem:[#allocation7 + $0x130] sm:$0xff]   ;;  %v262_v45 = vld [vmem:[#allocation5 + $0x180] sm:$0xff] }
  0xbb   :  { %1501 = vmatprep.mubr.bf16.mxu0 %v887_v58  ;;  %1598 = vmatprep.mubr.bf16.mxu1 %v889_v59  ;;  %v454_v15 = vmul.f32 %v4502_v49, %v102_v46  ;;  %v462_v16 = vmul.f32 %v4509_v57, %v110_v52  ;;  %v456_v18 = vmul.f32 %v4502_v49, %v104_v53  ;;  %v264_v46 = vld [vmem:[#allocation5 + $0x190] sm:$0xff]  ;;  %v119_v53 = vld [vmem:[#allocation2 + $0x108] sm:$0xff] }
  0xbc   :  { %1502 = vmatmul.mubr.bf16.vlgmr.msra.gmra.mxu0 %v886_v6  ;;  %1599 = vmatmul.mubr.bf16.vlgmr.msra.gmra.mxu1 %v888_v7  ;;  %v464_v25 = vmul.f32 %v4509_v57, %v112_v54  ;;  %v4519_v26 = vadd.f32 %v643_v48, %v451_v47  ;;  %v4522_v27 = vmul.f32 %v4482_v23, %v229_v5  ;;  %v4021_v47 = vld [vmem:[#allocation7 + $0x168] sm:$0xff]   ;;  %v118_v5 = vld [vmem:[#allocation2 + $0x100] sm:$0xff]  ;;  %v120_v6 = vld [vmem:[#allocation2 + $0x110] sm:$0xff] }
  0xbd   :  { %v4524_v28 = vpop.permute.xlu0 %575  ;;  %3818 = vmatpush3.bf16.msra.mxu0 %v4014_v4  ;;  %3882 = vmatpush3.bf16.msra.mxu1 %v4016_v0  ;;  %v4528_v32 = vadd.f32 %v4490_v30, %v4487_v29  ;;  %v4531_v33 = vmul.f32 %v4470_v61, %v90_v12  ;;  %v4534_v34 = vmul.f32 %v4484_v24, %v98_v13  ;;  %v4020_v29 = vld [vmem:[#allocation7 + $0x1b0] sm:$0xff]   ;;  %v4023_v54 = vld [vmem:[#allocation7 + $0x1e8] sm:$0xff]   ;;  %v121_v0 = vld [vmem:[#allocation2 + $0x118] sm:$0xff] }
  0xbe   :  { %6340 = vst [vmem:[#allocation16_spill] sm:$0xff] %v4519_v26  ;;  %v4536_v35 = vpop.permute.xlu1 %579  ;;  %v647_v36 = vmul.f32 %v4524_v28, %v231_v62  ;;  %v649_v37 = vmul.f32 %v4524_v28, %v233_v2  ;;  %v646_v38 = vmul.f32 %v4524_v28, %v230_v14  ;;  %v648_v39 = vmul.f32 %v4524_v28, %v232_v17  ;;  %v127_v7 = vld [vmem:[#allocation2 + $0x148] sm:$0xff]  ;;  %v218_v13 = vld [vmem:[#allocation5 + $0x20] sm:$0xff] }
  0xbf   :  { %6341 = vst [vmem:[#allocation17_spill] sm:$0xff] %v4528_v32  ;;  %3819 = vmatprep.subr.bf16.mxu0 %v4017_v11  ;;  %v655_v30 = vmul.f32 %v4536_v35, %v239_v8  ;;  %v657_v42 = vmul.f32 %v4536_v35, %v241_v20  ;;  %v654_v43 = vmul.f32 %v4536_v35, %v238_v21  ;;  %v129_v8 = vld [vmem:[#allocation2 + $0x158] sm:$0xff]  ;;  %v126_v11 = vld [vmem:[#allocation2 + $0x140] sm:$0xff]  ;;  %v4022_v12 = vld [vmem:[#allocation7 + $0x128] sm:$0xff]  }
  0xc0   :  { %v656_v44 = vmul.f32 %v4536_v35, %v240_v22  ;;  %3883 = vmatprep.subr.bf16.mxu1 %v4019_v19  ;;  %v775_v48 = vadd.f32 %v647_v36, %v455_v63  ;;  %v777_v50 = vadd.f32 %v649_v37, %v457_v3  ;;  %v774_v51 = vadd.f32 %v646_v38, %v454_v15  ;;  %v226_v19 = vld [vmem:[#allocation5 + $0x60] sm:$0xff]  ;;  %v92_v20 = vld [vmem:[#allocation2 + $0x30] sm:$0xff]  ;;  %v4024_v38 = vld [vmem:[#allocation7 + $0x1a8] sm:$0xff]  }
  0xc1   :  { %v776_v52 = vadd.f32 %v648_v39, %v456_v18  ;;  %v783_v58 = vadd.f32 %v655_v30, %v463_v9  ;;  %v785_v59 = vadd.f32 %v657_v42, %v465_v10  ;;  %v782_v62 = vadd.f32 %v654_v43, %v462_v16  ;;  %v4546_v4 = vpop.permute.xlu0 %591  ;;  %3820 = vmatpush3.bf16.msra.mxu0 %v4018_v31  ;;  %v100_v21 = vld [vmem:[#allocation2 + $0x70] sm:$0xff]  ;;  %v4025_v39 = vld [vmem:[#allocation7 + $0x160] sm:$0xff]  }
  0xc2   :  { %v784_v2 = vadd.f32 %v656_v44, %v464_v25  ;;  %v4549_v63 = vmul.f32 %v4546_v4, %v263_v40  ;;  %v4552_v3 = vmul.f32 %v4546_v4, %v265_v41  ;;  %v4555_v9 = vmul.f32 %v4546_v4, %v262_v45  ;;  %3884 = vmatpush3.bf16.msra.mxu1 %v4020_v29  ;;  %v128_v36 = vld [vmem:[#allocation2 + $0x150] sm:$0xff]  ;;  %v247_v40 = vld [vmem:[#allocation5 + $0x108] sm:$0xff]  ;;  %v249_v41 = vld [vmem:[#allocation5 + $0x118] sm:$0xff] }
  0xc3   :  { %v4558_v10 = vmul.f32 %v4546_v4, %v264_v46  ;;  %v4560_v14 = vpop.permute.xlu1 %380  ;;  %v895_v15 = vpack.c.bf16 %v783_v58, %v775_v48  ;;  %v897_v16 = vpack.c.bf16 %v785_v59, %v777_v50  ;;  %v894_v17 = vpack.c.bf16 %v782_v62, %v774_v51  ;;  %3821 = vmatprep.subr.bf16.mxu0 %v4021_v47  ;;  %v4027_v29 = vld [vmem:[#allocation7 + $0x1e0] sm:$0xff]   ;;  %v248_v46 = vld [vmem:[#allocation5 + $0x110] sm:$0xff]  ;;  %v257_v62 = vld [vmem:[#allocation5 + $0x158] sm:$0xff] }
  0xc4   :  { %v896_v18 = vpack.c.bf16 %v784_v2, %v776_v52  ;;  %v471_v22 = vmul.f32 %v4560_v14, %v119_v53  ;;  %v473_v25 = vmul.f32 %v4560_v14, %v121_v0  ;;  %v470_v31 = vmul.f32 %v4560_v14, %v118_v5  ;;  %3885 = vmatprep.subr.bf16.mxu1 %v4023_v54  ;;  %v246_v45 = vld [vmem:[#allocation5 + $0x100] sm:$0xff]  ;;  %v220_v54 = vld [vmem:[#allocation5 + $0x30] sm:$0xff]  ;;  %v135_v2 = vld [vmem:[#allocation2 + $0x188] sm:$0xff] }
  0xc5   :  { %v472_v37 = vmul.f32 %v4560_v14, %v120_v6  ;;  %1509 = vmatprep.mubr.bf16.mxu0 %v895_v15  ;;  %1606 = vmatprep.mubr.bf16.mxu1 %v897_v16  ;;  %v4570_v42 = vadd.f32 %v4522_v27, %v4507_v56  ;;  %v634_v43 = vmul.f32 %v4468_v60, %v218_v13  ;;  %v4026_v47 = vld [vmem:[#allocation7 + $0x120] sm:$0xff]   ;;  %v228_v58 = vld [vmem:[#allocation5 + $0x70] sm:$0xff]  ;;  %v137_v0 = vld [vmem:[#allocation2 + $0x198] sm:$0xff] }
  0xc6   :  { %1510 = vmatmul.mubr.bf16.gmra.mxu0 %v894_v17  ;;  %1607 = vmatmul.mubr.bf16.gmra.mxu1 %v896_v18  ;;  %v4573_v44 = vpop.permute.xlu0 %385  ;;  %v642_v48 = vmul.f32 %v4482_v23, %v226_v19  ;;  %v4577_v50 = vmul.f32 %v4470_v61, %v92_v20  ;;  %v4580_v51 = vmul.f32 %v4484_v24, %v100_v21  ;;  %v107_v61 = vld [vmem:[#allocation2 + $0xa8] sm:$0xff]  ;;  %v4028_v5 = vld [vmem:[#allocation7 + $0x1a0] sm:$0xff]   ;;  %v136_v17 = vld [vmem:[#allocation2 + $0x190] sm:$0xff] }
  0xc7   :  { %6342 = vst [vmem:[#allocation18_spill] sm:$0xff] %v4570_v42  ;;  %v4583_v56 = vmul.f32 %v4573_v44, %v127_v7  ;;  %v4586_v27 = vmul.f32 %v4573_v44, %v129_v8  ;;  %v4589_v52 = vmul.f32 %v4573_v44, %v126_v11  ;;  %v4592_v53 = vmul.f32 %v4573_v44, %v128_v36  ;;  %v255_v24 = vld [vmem:[#allocation5 + $0x148] sm:$0xff]  ;;  %v134_v16 = vld [vmem:[#allocation2 + $0x180] sm:$0xff]  ;;  %v4029_v18 = vld [vmem:[#allocation7 + $0x158] sm:$0xff]  }
  0xc8   :  { %3822 = vmatpush3.bf16.msra.mxu0 %v4022_v12  ;;  %v4594_v59 = vpop.permute.xlu1 %583  ;;  %3886 = vmatpush3.bf16.msra.mxu1 %v4024_v38  ;;  %v4599_v7 = vadd.f32 %v634_v43, %v4531_v33  ;;  %v4602_v8 = vadd.f32 %v642_v48, %v4534_v34  ;;  %v254_v19 = vld [vmem:[#allocation5 + $0x140] sm:$0xff]  ;;  %v256_v20 = vld [vmem:[#allocation5 + $0x150] sm:$0xff]  ;;  %v4031_v33 = vld [vmem:[#allocation7 + $0x1d8] sm:$0xff]   ;;  %v4613_v36 = vmul.f32 %v4468_v60, %v220_v54 }
  0xc9   :  { %3823 = vmatprep.subr.bf16.mxu0 %v4025_v39  ;;  %v663_v11 = vmul.f32 %v4594_v59, %v247_v40  ;;  %v665_v12 = vmul.f32 %v4594_v59, %v249_v41  ;;  %v662_v13 = vmul.f32 %v4594_v59, %v246_v45  ;;  %v664_v15 = vmul.f32 %v4594_v59, %v248_v46  ;;  %v4030_v45 = vld [vmem:[#allocation7 + $0x118] sm:$0xff]   ;;  %v166_v30 = vld [vmem:[#allocation2 + $0x280] sm:$0xff]  ;;  %v152_v42 = vld [vmem:[#allocation2 + $0x210] sm:$0xff] }
  0xca   :  { %6343 = vst [vmem:[#allocation19_spill] sm:$0xff] %v4599_v7  ;;  %6344 = vst [vmem:[#allocation20_spill] sm:$0xff] %v4602_v8  ;;  %3887 = vmatprep.subr.bf16.mxu1 %v4027_v29  ;;  %v4608_v21 = vpop.permute.xlu0 %390  ;;  %v4616_v38 = vmul.f32 %v4482_v23, %v228_v58  ;;  %v4619_v39 = vmul.f32 %v4502_v49, %v107_v61  ;;  %v161_v58 = vld [vmem:[#allocation2 + $0x258] sm:$0xff]  ;;  %v150_v32 = vld [vmem:[#allocation2 + $0x200] sm:$0xff] }
  0xcb   :  { %v4621_v40 = vadd.f32 %v663_v11, %v471_v22  ;;  %v4623_v41 = vadd.f32 %v665_v12, %v473_v25  ;;  %v4625_v29 = vadd.f32 %v662_v13, %v470_v31  ;;  %v4627_v43 = vadd.f32 %v664_v15, %v472_v37  ;;  %v159_v22 = vld [vmem:[#allocation2 + $0x248] sm:$0xff]  ;;  %v4032_v25 = vld [vmem:[#allocation7 + $0x198] sm:$0xff]   ;;  %v158_v11 = vld [vmem:[#allocation2 + $0x240] sm:$0xff] }
  0xcc   :  { %3824 = vmatpush3.bf16.msra.mxu0 %v4026_v47  ;;  %v4629_v46 = vpop.permute.xlu1 %587  ;;  %v487_v60 = vmul.f32 %v4608_v21, %v135_v2  ;;  %v489_v23 = vmul.f32 %v4608_v21, %v137_v0  ;;  %v486_v48 = vmul.f32 %v4608_v21, %v134_v16  ;;  %v488_v54 = vmul.f32 %v4608_v21, %v136_v17  ;;  %v160_v2 = vld [vmem:[#allocation2 + $0x250] sm:$0xff]  ;;  %v143_v12 = vld [vmem:[#allocation2 + $0x1c8] sm:$0xff]  ;;  %v145_v15 = vld [vmem:[#allocation2 + $0x1d8] sm:$0xff] }
  0xcd   :  { %3888 = vmatpush3.bf16.msra.mxu1 %v4028_v5  ;;  %v671_v31 = vmul.f32 %v4629_v46, %v255_v24  ;;  %v673_v37 = vmul.f32 %v4629_v46, %v257_v62  ;;  %v670_v47 = vmul.f32 %v4629_v46, %v254_v19  ;;  %v672_v61 = vmul.f32 %v4629_v46, %v256_v20  ;;  %v4033_v0 = vld [vmem:[#allocation7 + $0x150] sm:$0xff]  }
  0xce   :  { %3825 = vmatprep.subr.bf16.mxu0 %v4029_v18  ;;  %v4640_v13 = vadd.f32 %v4549_v63, %v487_v60  ;;  %v4643_v5 = vadd.f32 %v4552_v3, %v489_v23  ;;  %v4645_v16 = vpop.permute.xlu0 %405  ;;  %v4648_v24 = vadd.f32 %v4555_v9, %v486_v48  ;;  %v4651_v62 = vadd.f32 %v4558_v10, %v488_v54  ;;  %v4035_v17 = vld [vmem:[#allocation7 + $0x1d0] sm:$0xff]   ;;  %v142_v3 = vld [vmem:[#allocation2 + $0x1c0] sm:$0xff]  ;;  %v295_v23 = vld [vmem:[#allocation5 + $0x288] sm:$0xff] }
  0xcf   :  { %3889 = vmatprep.subr.bf16.mxu1 %v4031_v33  ;;  %v799_v18 = vadd.f32 %v671_v31, %v4583_v56  ;;  %v801_v19 = vadd.f32 %v673_v37, %v4586_v27  ;;  %v798_v63 = vadd.f32 %v670_v47, %v4589_v52  ;;  %v800_v20 = vadd.f32 %v672_v61, %v4592_v53  ;;  %v144_v60 = vld [vmem:[#allocation2 + $0x1d0] sm:$0xff]  ;;  %v297_v27 = vld [vmem:[#allocation5 + $0x298] sm:$0xff]  ;;  %v294_v52 = vld [vmem:[#allocation5 + $0x280] sm:$0xff] }
  0xd0   :  { %3826 = vmatpush3.bf16.msra.mxu0 %v4030_v45  ;;  %v4658_v9 = vmul.f32 %v4645_v16, %v159_v22  ;;  %v4661_v10 = vmul.f32 %v4645_v16, %v161_v58  ;;  %v4664_v33 = vmul.f32 %v4645_v16, %v158_v11  ;;  %v4667_v56 = vmul.f32 %v4645_v16, %v160_v2  ;;  %v115_v53 = vld [vmem:[#allocation2 + $0xe8] sm:$0xff]  ;;  %v296_v31 = vld [vmem:[#allocation5 + $0x290] sm:$0xff] }
  0xd1   :  { %3890 = vmatpush3.bf16.msra.mxu1 %v4032_v25  ;;  %v4669_v48 = vpop.permute.xlu1 %395  ;;  %v903_v45 = vpack.c.bf16 %v799_v18, %v4621_v40  ;;  %v905_v54 = vpack.c.bf16 %v801_v19, %v4623_v41  ;;  %v902_v22 = vpack.c.bf16 %v798_v63, %v4625_v29  ;;  %v904_v58 = vpack.c.bf16 %v800_v20, %v4627_v43  ;;  %v4034_v37 = vld [vmem:[#allocation7 + $0x110] sm:$0xff]   ;;  %v271_v61 = vld [vmem:[#allocation5 + $0x1c8] sm:$0xff]  ;;  %v109_v19 = vld [vmem:[#allocation2 + $0xb8] sm:$0xff] }
  0xd2   :  { %3827 = vmatprep.subr.bf16.mxu0 %v4033_v0  ;;  %v4036_v47 = vld [vmem:[#allocation7 + $0x190] sm:$0xff]   ;;  %v495_v11 = vmul.f32 %v4669_v48, %v143_v12  ;;  %v497_v25 = vmul.f32 %v4669_v48, %v145_v15  ;;  %v494_v2 = vmul.f32 %v4669_v48, %v142_v3  ;;  %v496_v1 = vmul.f32 %v4669_v48, %v144_v60  ;;  %v4037_v40 = vld [vmem:[#allocation7 + $0x148] sm:$0xff]   ;;  %v273_v63 = vld [vmem:[#allocation5 + $0x1d8] sm:$0xff] }
  0xd3   :  { %3891 = vmatprep.subr.bf16.mxu1 %v4035_v17  ;;  %v4039_v41 = vld [vmem:[#allocation7 + $0x1c8] sm:$0xff]   ;;  %1517 = vmatprep.mubr.bf16.mxu0 %v903_v45  ;;  %v4679_v29 = vpop.permute.xlu0 %607  ;;  %v4683_v43 = vadd.f32 %v4613_v36, %v4577_v50  ;;  %v4687_v0 = vadd.f32 %v4616_v38, %v4580_v51  ;;  %v467_v15 = vmul.f32 %v4509_v57, %v115_v53  ;;  %v117_v17 = vld [vmem:[#allocation2 + $0xf8] sm:$0xff]  ;;  %v270_v20 = vld [vmem:[#allocation5 + $0x1c0] sm:$0xff] }
  0xd4   :  { %v235_v18 = vld [vmem:[#allocation5 + $0xa8] sm:$0xff]  ;;  %1614 = vmatprep.mubr.bf16.mxu1 %v905_v54  ;;  %6345 = vst [vmem:[#allocation21_spill] sm:$0xff] %v4679_v29  ;;  %1518 = vmatmul.mubr.bf16.gmra.mxu0 %v902_v22  ;;  %v272_v3 = vld [vmem:[#allocation5 + $0x1d0] sm:$0xff]  ;;  %v4691_v60 = vmul.f32 %v4679_v29, %v295_v23  ;;  %v4694_v50 = vmul.f32 %v4679_v29, %v297_v27  ;;  %v237_v54 = vld [vmem:[#allocation5 + $0xb8] sm:$0xff] }
  0xd5   :  { %6346 = vst [vmem:[#allocation22_spill] sm:$0xff] %v4683_v43  ;;  %6347 = vst [vmem:[#allocation23_spill] sm:$0xff] %v4687_v0  ;;  %v243_v12 = vld [vmem:[#allocation5 + $0xe8] sm:$0xff]  ;;  %1615 = vmatmul.mubr.bf16.gmra.mxu1 %v904_v58  ;;  %v4697_v36 = vmul.f32 %v4679_v29, %v294_v52  ;;  %v4700_v51 = vmul.f32 %v4679_v29, %v296_v31  ;;  %3828 = vmatpush3.bf16.msra.mxu0 %v4034_v37  ;;  %v245_v23 = vld [vmem:[#allocation5 + $0xf8] sm:$0xff] }
  0xd6   :  { %3892 = vmatpush3.bf16.msra.mxu1 %v4036_v47  ;;  %v4038_v38 = vld [vmem:[#allocation7 + $0x108] sm:$0xff]   ;;  %v651_v45 = vmul.f32 %v4524_v28, %v235_v18  ;;  %v4705_v22 = vpop.permute.xlu1 %595  ;;  %v169_v58 = vld [vmem:[#allocation2 + $0x298] sm:$0xff]  ;;  %3829 = vmatprep.subr.bf16.mxu0 %v4037_v40  ;;  %v659_v31 = vmul.f32 %v4536_v35, %v243_v12  ;;  %v4709_v37 = vmul.f32 %v4502_v49, %v109_v19  ;;  %v168_v40 = vld [vmem:[#allocation2 + $0x290] sm:$0xff] }
  0xd7   :  { %v167_v27 = vld [vmem:[#allocation2 + $0x288] sm:$0xff]  ;;  %3893 = vmatprep.subr.bf16.mxu1 %v4039_v41  ;;  %v4712_v47 = vmul.f32 %v4509_v57, %v117_v17  ;;  %v687_v53 = vmul.f32 %v4705_v22, %v271_v61  ;;  %v689_v18 = vmul.f32 %v4705_v22, %v273_v63  ;;  %v686_v34 = vmul.f32 %v4705_v22, %v270_v20  ;;  %v4041_v41 = vld [vmem:[#allocation7 + $0x140] sm:$0xff]   ;;  %v153_v29 = vld [vmem:[#allocation2 + $0x218] sm:$0xff] }
  0xd8   :  { %v4040_v52 = vld [vmem:[#allocation7 + $0x188] sm:$0xff]   ;;  %v688_v6 = vmul.f32 %v4705_v22, %v272_v3  ;;  %v4718_v43 = vpop.permute.xlu0 %410  ;;  %v4043_v0 = vld [vmem:[#allocation7 + $0x1c0] sm:$0xff]   ;;  %v4721_v19 = vadd.f32 %v651_v45, %v4619_v39  ;;  %v4723_v17 = vadd.f32 %v659_v31, %v467_v15  ;;  %v653_v61 = vmul.f32 %v4524_v28, %v237_v54  ;;  %v280_v31 = vld [vmem:[#allocation5 + $0x210] sm:$0xff] }
  0xd9   :  { %6348 = vst [vmem:[#allocation24_spill] sm:$0xff] %v4718_v43  ;;  %v151_v12 = vld [vmem:[#allocation2 + $0x208] sm:$0xff]  ;;  %v661_v63 = vmul.f32 %v4536_v35, %v245_v23  ;;  %v815_v7 = vadd.f32 %v687_v53, %v495_v11  ;;  %v817_v20 = vadd.f32 %v689_v18, %v497_v25  ;;  %v814_v8 = vadd.f32 %v686_v34, %v494_v2  ;;  %v193_v25 = vld [vmem:[#allocation2 + $0x358] sm:$0xff]  ;;  %v4042_v2 = vld [vmem:[#allocation7 + $0x100] sm:$0xff]  }
  0xda   :  { %6349 = vst [vmem:[#allocation25_spill] sm:$0xff] %v4721_v19  ;;  %6350 = vst [vmem:[#allocation26_spill] sm:$0xff] %v4723_v17  ;;  %v816_v3 = vadd.f32 %v688_v6, %v496_v1  ;;  %3830 = vmatpush3.bf16.msra.mxu0 %v4038_v38  ;;  %v519_v55 = vmul.f32 %v4718_v43, %v167_v27  ;;  %v521_v26 = vmul.f32 %v4718_v43, %v169_v58  ;;  %v191_v45 = vld [vmem:[#allocation2 + $0x348] sm:$0xff]  ;;  %v4044_v38 = vld [vmem:[#allocation7 + $0x180] sm:$0xff]  }
  0xdb   :  { %v518_v39 = vmul.f32 %v4718_v43, %v166_v30  ;;  %v520_v15 = vmul.f32 %v4718_v43, %v168_v40  ;;  %3894 = vmatpush3.bf16.msra.mxu1 %v4040_v52  ;;  %v4731_v54 = vpop.permute.xlu1 %400  ;;  %v911_v11 = vpack.c.bf16 %v815_v7, %v4640_v13  ;;  %v913_v1 = vpack.c.bf16 %v817_v20, %v4643_v5  ;;  %v279_v53 = vld [vmem:[#allocation5 + $0x208] sm:$0xff]  ;;  %v190_v13 = vld [vmem:[#allocation2 + $0x340] sm:$0xff]  ;;  %v192_v5 = vld [vmem:[#allocation2 + $0x350] sm:$0xff] }
  0xdc   :  { %v910_v6 = vpack.c.bf16 %v814_v8, %v4648_v24  ;;  %v912_v34 = vpack.c.bf16 %v816_v3, %v4651_v62  ;;  %3831 = vmatprep.subr.bf16.mxu0 %v4041_v41  ;;  %v503_v30 = vmul.f32 %v4731_v54, %v151_v12  ;;  %v505_v23 = vmul.f32 %v4731_v54, %v153_v29  ;;  %v4741_v7 = vpop.permute.xlu0 %425  ;;  %v281_v8 = vld [vmem:[#allocation5 + $0x218] sm:$0xff]  ;;  %v114_v52 = vld [vmem:[#allocation2 + $0xe0] sm:$0xff]  ;;  %v200_v41 = vld [vmem:[#allocation2 + $0x390] sm:$0xff] }
  0xdd   :  { %v502_v27 = vmul.f32 %v4731_v54, %v150_v32  ;;  %v504_v58 = vmul.f32 %v4731_v54, %v152_v42  ;;  %6351 = vst [vmem:[#allocation27_spill] sm:$0xff] %v4741_v7  ;;  %3895 = vmatprep.subr.bf16.mxu1 %v4043_v0  ;;  %1525 = vmatprep.mubr.bf16.mxu0 %v911_v11  ;;  %v106_v32 = vld [vmem:[#allocation2 + $0xa0] sm:$0xff]  ;;  %v287_v20 = vld [vmem:[#allocation5 + $0x248] sm:$0xff]  ;;  %v289_v3 = vld [vmem:[#allocation5 + $0x258] sm:$0xff] }
  0xde   :  { %1622 = vmatprep.mubr.bf16.mxu1 %v913_v1  ;;  %v4744_v24 = vadd.f32 %v4691_v60, %v519_v55  ;;  %v4747_v62 = vadd.f32 %v4694_v50, %v521_v26  ;;  %v4750_v29 = vadd.f32 %v4697_v36, %v518_v39  ;;  %1526 = vmatmul.mubr.bf16.gmra.mxu0 %v910_v6  ;;  %v278_v42 = vld [vmem:[#allocation5 + $0x200] sm:$0xff]  ;;  %v199_v26 = vld [vmem:[#allocation2 + $0x388] sm:$0xff]  ;;  %v201_v36 = vld [vmem:[#allocation2 + $0x398] sm:$0xff] }
  0xdf   :  { %1623 = vmatmul.mubr.bf16.gmra.mxu1 %v912_v34  ;;  %v4753_v0 = vadd.f32 %v4700_v51, %v520_v15  ;;  %v4756_v18 = vmul.f32 %v4741_v7, %v191_v45  ;;  %v4759_v55 = vmul.f32 %v4741_v7, %v193_v25  ;;  %v4762_v60 = vmul.f32 %v4741_v7, %v190_v13  ;;  %v198_v40 = vld [vmem:[#allocation2 + $0x380] sm:$0xff]  ;;  %v329_v19 = vld [vmem:[#allocation5 + $0x398] sm:$0xff]  ;;  %v328_v17 = vld [vmem:[#allocation5 + $0x390] sm:$0xff] }
  0xe0   :  { %v4765_v50 = vmul.f32 %v4741_v7, %v192_v5  ;;  %3832 = vmatpush3.bf16.msra.mxu0 %v4042_v2  ;;  %3896 = vmatpush3.bf16.msra.mxu1 %v4044_v38  ;;  %v4769_v12 = vpop.permute.xlu1 %599  ;;  %v4771_v39 = vpop.permute.xlu0 %430  ;;  %v4774_v15 = vadd.f32 %v653_v61, %v4709_v37  ;;  %v4777_v45 = vadd.f32 %v661_v63, %v4712_v47  ;;  %v234_v38 = vld [vmem:[#allocation5 + $0xa0] sm:$0xff]  ;;  %v108_v61 = vld [vmem:[#allocation2 + $0xb0] sm:$0xff]  ;;  %v327_v63 = vld [vmem:[#allocation5 + $0x388] sm:$0xff] }
  0xe1   :  { %6352 = vst [vmem:[#allocation28_spill] sm:$0xff] %v4769_v12  ;;  %6353 = vst [vmem:[#allocation29_spill] sm:$0xff] %v4771_v39  ;;  %v4780_v11 = vmul.f32 %v4502_v49, %v106_v32  ;;  %v4783_v1 = vmul.f32 %v4509_v57, %v114_v52  ;;  %v695_v6 = vmul.f32 %v4769_v12, %v279_v53  ;;  %v242_v37 = vld [vmem:[#allocation5 + $0xe0] sm:$0xff]  ;;  %v288_v47 = vld [vmem:[#allocation5 + $0x250] sm:$0xff] }
  0xe2   :  { %v697_v34 = vmul.f32 %v4769_v12, %v281_v8  ;;  %v694_v25 = vmul.f32 %v4769_v12, %v278_v42  ;;  %v696_v2 = vmul.f32 %v4769_v12, %v280_v31  ;;  %v286_v13 = vld [vmem:[#allocation5 + $0x240] sm:$0xff]  ;;  %v551_v5 = vmul.f32 %v4771_v39, %v199_v26 }
  0xe3   :  { %v553_v32 = vmul.f32 %v4771_v39, %v201_v36  ;;  %v550_v52 = vmul.f32 %v4771_v39, %v198_v40  ;;  %v552_v53 = vmul.f32 %v4771_v39, %v200_v41  ;;  %v823_v51 = vadd.f32 %v695_v6, %v503_v30  ;;  %v326_v31 = vld [vmem:[#allocation5 + $0x380] sm:$0xff]  ;;  %v175_v6 = vld [vmem:[#allocation2 + $0x2c8] sm:$0xff] }
  0xe4   :  { %v825_v8 = vadd.f32 %v697_v34, %v505_v23  ;;  %v822_v7 = vadd.f32 %v694_v25, %v502_v27  ;;  %v824_v42 = vadd.f32 %v696_v2, %v504_v58  ;;  %v4793_v43 = vpop.permute.xlu1 %603  ;;  %v650_v26 = vmul.f32 %v4524_v28, %v234_v38 }
  0xe5   :  { %v658_v36 = vmul.f32 %v4536_v35, %v242_v37  ;;  %v460_v40 = vmul.f32 %v4502_v49, %v108_v61  ;;  %v703_v41 = vmul.f32 %v4793_v43, %v287_v20  ;;  %v705_v30 = vmul.f32 %v4793_v43, %v289_v3  ;;  %v4804_v58 = vpop.permute.xlu0 %623  ;;  %v177_v61 = vld [vmem:[#allocation2 + $0x2d8] sm:$0xff] }
  0xe6   :  { %v702_v23 = vmul.f32 %v4793_v43, %v286_v13  ;;  %v704_v27 = vmul.f32 %v4793_v43, %v288_v47  ;;  %6354 = vst [vmem:[#allocation30_spill] sm:$0xff] %v4804_v58  ;;  %v743_v34 = vmul.f32 %v4804_v58, %v327_v63  ;;  %v745_v25 = vmul.f32 %v4804_v58, %v329_v19  ;;  %v174_v13 = vld [vmem:[#allocation2 + $0x2c0] sm:$0xff]  ;;  %v176_v47 = vld [vmem:[#allocation2 + $0x2d0] sm:$0xff] }
  0xe7   :  { %v742_v2 = vmul.f32 %v4804_v58, %v326_v31  ;;  %v744_v38 = vmul.f32 %v4804_v58, %v328_v17  ;;  %v831_v49 = vadd.f32 %v703_v41, %v4658_v9  ;;  %v833_v20 = vadd.f32 %v705_v30, %v4661_v10  ;;  %v116_v17 = vld [vmem:[#allocation2 + $0xf0] sm:$0xff] }
  0xe8   :  { %v830_v3 = vadd.f32 %v702_v23, %v4664_v33  ;;  %v832_v37 = vadd.f32 %v704_v27, %v4667_v56  ;;  %v4814_v12 = vadd.f32 %v743_v34, %v551_v5  ;;  %v4816_v63 = vadd.f32 %v745_v25, %v553_v32  ;;  %v236_v30 = vld [vmem:[#allocation5 + $0xb0] sm:$0xff]  ;;  %v123_v23 = vld [vmem:[#allocation2 + $0x128] sm:$0xff] }
  0xe9   :  { %v4818_v19 = vadd.f32 %v742_v2, %v550_v52  ;;  %v4820_v31 = vadd.f32 %v744_v38, %v552_v53  ;;  %v4822_v58 = vpop.permute.xlu1 %415  ;;  %v919_v9 = vpack.c.bf16 %v831_v49, %v823_v51  ;;  %v921_v10 = vpack.c.bf16 %v833_v20, %v825_v8  ;;  %v244_v56 = vld [vmem:[#allocation5 + $0xf0] sm:$0xff]  ;;  %v131_v53 = vld [vmem:[#allocation2 + $0x168] sm:$0xff]  ;;  %v133_v2 = vld [vmem:[#allocation2 + $0x178] sm:$0xff] }
  0xea   :  { %v918_v41 = vpack.c.bf16 %v830_v3, %v822_v7  ;;  %v920_v33 = vpack.c.bf16 %v832_v37, %v824_v42  ;;  %v527_v27 = vmul.f32 %v4822_v58, %v175_v6  ;;  %v529_v5 = vmul.f32 %v4822_v58, %v177_v61  ;;  %v251_v34 = vld [vmem:[#allocation5 + $0x128] sm:$0xff]  ;;  %v125_v6 = vld [vmem:[#allocation2 + $0x138] sm:$0xff]  ;;  %v302_v49 = vld [vmem:[#allocation5 + $0x2c0] sm:$0xff] }
  0xeb   :  { %v526_v32 = vmul.f32 %v4822_v58, %v174_v13  ;;  %v528_v52 = vmul.f32 %v4822_v58, %v176_v47  ;;  %v259_v25 = vld [vmem:[#allocation5 + $0x168] sm:$0xff]  ;;  %1533 = vmatprep.mubr.bf16.mxu0 %v919_v9  ;;  %1630 = vmatprep.mubr.bf16.mxu1 %v921_v10  ;;  %v4829_v7 = vadd.f32 %v650_v26, %v4780_v11  ;;  %v305_v38 = vld [vmem:[#allocation5 + $0x2d8] sm:$0xff]  ;;  %v304_v20 = vld [vmem:[#allocation5 + $0x2d0] sm:$0xff] }
  0xec   :  { %v303_v51 = vld [vmem:[#allocation5 + $0x2c8] sm:$0xff]  ;;  %v4832_v8 = vadd.f32 %v658_v36, %v4783_v1  ;;  %v468_v42 = vmul.f32 %v4509_v57, %v116_v17  ;;  %1534 = vmatmul.mubr.bf16.gmra.mxu0 %v918_v41  ;;  %1631 = vmatmul.mubr.bf16.gmra.mxu1 %v920_v33  ;;  %v652_v3 = vmul.f32 %v4524_v28, %v236_v30  ;;  %v253_v36 = vld [vmem:[#allocation5 + $0x138] sm:$0xff] }
  0xed   :  { %v660_v37 = vmul.f32 %v4536_v35, %v244_v56  ;;  %v475_v61 = vmul.f32 %v4560_v14, %v123_v23  ;;  %v483_v1 = vmul.f32 %v4573_v44, %v131_v53  ;;  %v667_v57 = vmul.f32 %v4594_v59, %v251_v34  ;;  %v261_v30 = vld [vmem:[#allocation5 + $0x178] sm:$0xff]  ;;  %v122_v56 = vld [vmem:[#allocation2 + $0x120] sm:$0xff]  ;;  %v183_v23 = vld [vmem:[#allocation2 + $0x308] sm:$0xff] }
  0xee   :  { %v675_v26 = vmul.f32 %v4629_v46, %v259_v25  ;;  %v4843_v13 = vpop.permute.xlu1 %611  ;;  %v4845_v47 = vadd.f32 %v652_v3, %v460_v40  ;;  %v477_v28 = vmul.f32 %v4560_v14, %v125_v6  ;;  %v485_v35 = vmul.f32 %v4573_v44, %v133_v2  ;;  %v184_v3 = vld [vmem:[#allocation2 + $0x310] sm:$0xff]  ;;  %v269_v40 = vld [vmem:[#allocation5 + $0x1b8] sm:$0xff] }
  0xef   :  { %v4847_v17 = vadd.f32 %v660_v37, %v468_v42  ;;  %v719_v9 = vmul.f32 %v4843_v13, %v303_v51  ;;  %v721_v10 = vmul.f32 %v4843_v13, %v305_v38  ;;  %v718_v41 = vmul.f32 %v4843_v13, %v302_v49  ;;  %v185_v38 = vld [vmem:[#allocation2 + $0x318] sm:$0xff]  ;;  %v182_v49 = vld [vmem:[#allocation2 + $0x300] sm:$0xff] }
  0xf0   :  { %v720_v33 = vmul.f32 %v4843_v13, %v304_v20  ;;  %v4857_v53 = vadd.f32 %v667_v57, %v475_v61  ;;  %v4859_v34 = vadd.f32 %v675_v26, %v483_v1  ;;  %v669_v25 = vmul.f32 %v4594_v59, %v253_v36  ;;  %v130_v61 = vld [vmem:[#allocation2 + $0x160] sm:$0xff] }
  0xf1   :  { %v847_v42 = vadd.f32 %v719_v9, %v527_v27  ;;  %v849_v51 = vadd.f32 %v721_v10, %v529_v5  ;;  %v846_v6 = vadd.f32 %v718_v41, %v526_v32  ;;  %v677_v37 = vmul.f32 %v4629_v46, %v261_v30  ;;  %v250_v57 = vld [vmem:[#allocation5 + $0x120] sm:$0xff]  ;;  %v124_v9 = vld [vmem:[#allocation2 + $0x130] sm:$0xff]  ;;  %v311_v41 = vld [vmem:[#allocation5 + $0x308] sm:$0xff] }
  0xf2   :  { %v848_v2 = vadd.f32 %v720_v33, %v528_v52  ;;  %v4865_v11 = vadd.f32 %v669_v25, %v477_v28  ;;  %v474_v1 = vmul.f32 %v4560_v14, %v122_v56  ;;  %v258_v36 = vld [vmem:[#allocation5 + $0x160] sm:$0xff]  ;;  %v132_v10 = vld [vmem:[#allocation2 + $0x170] sm:$0xff] }
  0xf3   :  { %v4868_v26 = vpop.permute.xlu1 %420  ;;  %v927_v27 = vpack.c.bf16 %v847_v42, %v4744_v24  ;;  %v929_v5 = vpack.c.bf16 %v849_v51, %v4747_v62  ;;  %v926_v32 = vpack.c.bf16 %v846_v6, %v4750_v29  ;;  %v252_v25 = vld [vmem:[#allocation5 + $0x130] sm:$0xff]  ;;  %v4878_v62 = vadd.f32 %v677_v37, %v485_v35  ;;  %v139_v42 = vld [vmem:[#allocation2 + $0x1a8] sm:$0xff] }
  0xf4   :  { %6355 = vst [vmem:[#allocation31_spill] sm:$0xff] %v4865_v11  ;;  %v928_v52 = vpack.c.bf16 %v848_v2, %v4753_v0  ;;  %v535_v28 = vmul.f32 %v4868_v26, %v183_v23  ;;  %v537_v33 = vmul.f32 %v4868_v26, %v185_v38  ;;  %v534_v30 = vmul.f32 %v4868_v26, %v182_v49  ;;  %v260_v24 = vld [vmem:[#allocation5 + $0x170] sm:$0xff]  ;;  %v147_v51 = vld [vmem:[#allocation2 + $0x1e8] sm:$0xff]  ;;  %v313_v23 = vld [vmem:[#allocation5 + $0x318] sm:$0xff] }
  0xf5   :  { %v536_v56 = vmul.f32 %v4868_v26, %v184_v3  ;;  %1541 = vmatprep.mubr.bf16.mxu0 %v927_v27  ;;  %1638 = vmatprep.mubr.bf16.mxu1 %v929_v5  ;;  %6356 = vst [vmem:[#allocation32_spill] sm:$0xff] %v4878_v62  ;;  %v482_v29 = vmul.f32 %v4573_v44, %v130_v61  ;;  %v267_v6 = vld [vmem:[#allocation5 + $0x1a8] sm:$0xff]  ;;  %v310_v2 = vld [vmem:[#allocation5 + $0x300] sm:$0xff]  ;;  %v312_v38 = vld [vmem:[#allocation5 + $0x310] sm:$0xff] }
  0xf6   :  { %v666_v0 = vmul.f32 %v4594_v59, %v250_v57  ;;  %1542 = vmatmul.mubr.bf16.gmra.mxu0 %v926_v32  ;;  %1639 = vmatmul.mubr.bf16.gmra.mxu1 %v928_v52  ;;  %v674_v49 = vmul.f32 %v4629_v46, %v258_v36  ;;  %v476_v3 = vmul.f32 %v4560_v14, %v124_v9  ;;  %v275_v5 = vld [vmem:[#allocation5 + $0x1e8] sm:$0xff] }
  0xf7   :  { %v484_v27 = vmul.f32 %v4573_v44, %v132_v10  ;;  %v668_v61 = vmul.f32 %v4594_v59, %v252_v25  ;;  %v676_v57 = vmul.f32 %v4629_v46, %v260_v24  ;;  %v491_v36 = vmul.f32 %v4608_v21, %v139_v42  ;;  %v319_v9 = vld [vmem:[#allocation5 + $0x348] sm:$0xff]  ;;  %v141_v25 = vld [vmem:[#allocation2 + $0x1b8] sm:$0xff] }
  0xf8   :  { %v4887_v37 = vadd.f32 %v666_v0, %v474_v1  ;;  %v4891_v32 = vpop.permute.xlu1 %615  ;;  %v4893_v52 = vadd.f32 %v674_v49, %v482_v29  ;;  %v499_v14 = vmul.f32 %v4669_v48, %v147_v51  ;;  %v683_v44 = vmul.f32 %v4546_v4, %v267_v6  ;;  %v321_v24 = vld [vmem:[#allocation5 + $0x358] sm:$0xff]  ;;  %v318_v0 = vld [vmem:[#allocation5 + $0x340] sm:$0xff]  ;;  %v320_v29 = vld [vmem:[#allocation5 + $0x350] sm:$0xff] }
  0xf9   :  { %v727_v10 = vmul.f32 %v4891_v32, %v311_v41  ;;  %v729_v1 = vmul.f32 %v4891_v32, %v313_v23  ;;  %v726_v59 = vmul.f32 %v4891_v32, %v310_v2  ;;  %v728_v46 = vmul.f32 %v4891_v32, %v312_v38  ;;  %v149_v2 = vld [vmem:[#allocation2 + $0x1f8] sm:$0xff]  ;;  %v335_v11 = vld [vmem:[#allocation5 + $0x3c8] sm:$0xff] }
  0xfa   :  { %v4904_v49 = vadd.f32 %v668_v61, %v476_v3  ;;  %v4906_v51 = vadd.f32 %v676_v57, %v484_v27  ;;  %v691_v6 = vmul.f32 %v4705_v22, %v275_v5  ;;  %v277_v38 = vld [vmem:[#allocation5 + $0x1f8] sm:$0xff]  ;;  %v4913_v62 = vadd.f32 %v683_v44, %v491_v36  ;;  %v146_v57 = vld [vmem:[#allocation2 + $0x1e0] sm:$0xff]  ;;  %v207_v5 = vld [vmem:[#allocation2 + $0x3c8] sm:$0xff] }
  0xfb   :  { %v855_v41 = vadd.f32 %v727_v10, %v535_v28  ;;  %v857_v35 = vadd.f32 %v729_v1, %v537_v33  ;;  %v854_v23 = vadd.f32 %v726_v59, %v534_v30  ;;  %v856_v20 = vadd.f32 %v728_v46, %v536_v56  ;;  %v138_v56 = vld [vmem:[#allocation2 + $0x1a0] sm:$0xff]  ;;  %v6357_v42 = vld [vmem:[#allocation28_spill] sm:$0xff] }
  0xfc   :  { %v4909_v39 = vpop.permute.xlu1 %619  ;;  %v4915_v3 = vadd.f32 %v691_v6, %v499_v14  ;;  %v493_v27 = vmul.f32 %v4608_v21, %v141_v25  ;;  %v501_v36 = vmul.f32 %v4669_v48, %v149_v2  ;;  %v685_v14 = vmul.f32 %v4546_v4, %v269_v40  ;;  %v209_v25 = vld [vmem:[#allocation2 + $0x3d8] sm:$0xff]  ;;  %v266_v2 = vld [vmem:[#allocation5 + $0x1a0] sm:$0xff] }
  0xfd   :  { %v735_v61 = vmul.f32 %v4909_v39, %v319_v9  ;;  %v737_v28 = vmul.f32 %v4909_v39, %v321_v24  ;;  %v734_v33 = vmul.f32 %v4909_v39, %v318_v0  ;;  %v736_v30 = vmul.f32 %v4909_v39, %v320_v29  ;;  %v206_v24 = vld [vmem:[#allocation2 + $0x3c0] sm:$0xff]  ;;  %v208_v0 = vld [vmem:[#allocation2 + $0x3d0] sm:$0xff] }
  0xfe   :  { %v693_v44 = vmul.f32 %v4705_v22, %v277_v38  ;;  %v4931_v29 = vadd.f32 %v685_v14, %v493_v27  ;;  %v274_v10 = vld [vmem:[#allocation5 + $0x1e0] sm:$0xff]  ;;  %v490_v40 = vmul.f32 %v4608_v21, %v138_v56  ;;  %v498_v38 = vmul.f32 %v4669_v48, %v146_v57  ;;  %v155_v57 = vld [vmem:[#allocation2 + $0x228] sm:$0xff] }
  0xff   :  { %v863_v9 = vadd.f32 %v735_v61, %v4756_v18  ;;  %v865_v1 = vadd.f32 %v737_v28, %v4759_v55  ;;  %v862_v59 = vadd.f32 %v734_v33, %v4762_v60  ;;  %v864_v46 = vadd.f32 %v736_v30, %v4765_v50  ;;  %v140_v50 = vld [vmem:[#allocation2 + $0x1b0] sm:$0xff] }
 0x100   :  { %v4933_v6 = vadd.f32 %v693_v44, %v501_v36  ;;  %v148_v33 = vld [vmem:[#allocation2 + $0x1f0] sm:$0xff] }
 0x101   :  { %v4937_v18 = vpop.permute.xlu1 %435  ;;  %v935_v55 = vpack.c.bf16 %v863_v9, %v855_v41  ;;  %v937_v61 = vpack.c.bf16 %v865_v1, %v857_v35  ;;  %v934_v60 = vpack.c.bf16 %v862_v59, %v854_v23  ;;  %v936_v28 = vpack.c.bf16 %v864_v46, %v856_v20  ;;  %v268_v30 = vld [vmem:[#allocation5 + $0x1b0] sm:$0xff]  ;;  %v163_v23 = vld [vmem:[#allocation2 + $0x268] sm:$0xff]  ;;  %v337_v1 = vld [vmem:[#allocation5 + $0x3d8] sm:$0xff] }
 0x102   :  { %v559_v27 = vmul.f32 %v4937_v18, %v207_v5  ;;  %v561_v36 = vmul.f32 %v4937_v18, %v209_v25  ;;  %v558_v14 = vmul.f32 %v4937_v18, %v206_v24  ;;  %v560_v56 = vmul.f32 %v4937_v18, %v208_v0  ;;  %v276_v44 = vld [vmem:[#allocation5 + $0x1f0] sm:$0xff]  ;;  %v283_v9 = vld [vmem:[#allocation5 + $0x228] sm:$0xff]  ;;  %v334_v59 = vld [vmem:[#allocation5 + $0x3c0] sm:$0xff] }
 0x103   :  { %1549 = vmatprep.mubr.bf16.mxu0 %v935_v55  ;;  %1646 = vmatprep.mubr.bf16.mxu1 %v937_v61  ;;  %v682_v20 = vmul.f32 %v4546_v4, %v266_v2  ;;  %v690_v41 = vmul.f32 %v4705_v22, %v274_v10  ;;  %v291_v5 = vld [vmem:[#allocation5 + $0x268] sm:$0xff]  ;;  %v336_v46 = vld [vmem:[#allocation5 + $0x3d0] sm:$0xff]  ;;  %v492_v25 = vmul.f32 %v4608_v21, %v140_v50  ;;  %v157_v50 = vld [vmem:[#allocation2 + $0x238] sm:$0xff] }
 0x104   :  { %1550 = vmatmul.mubr.bf16.gmra.mxu0 %v934_v60  ;;  %1647 = vmatmul.mubr.bf16.gmra.mxu1 %v936_v28  ;;  %v500_v24 = vmul.f32 %v4669_v48, %v148_v33  ;;  %v684_v0 = vmul.f32 %v4546_v4, %v268_v30  ;;  %v692_v10 = vmul.f32 %v4705_v22, %v276_v44  ;;  %v165_v33 = vld [vmem:[#allocation2 + $0x278] sm:$0xff] }
 0x105   :  { %v4950_v55 = vadd.f32 %v682_v20, %v490_v40  ;;  %v4952_v61 = vadd.f32 %v690_v41, %v498_v38  ;;  %v507_v2 = vmul.f32 %v4731_v54, %v155_v57  ;;  %v515_v28 = vmul.f32 %v4645_v16, %v163_v23  ;;  %v285_v41 = vld [vmem:[#allocation5 + $0x238] sm:$0xff] }
 0x106   :  { %v4956_v35 = vpop.permute.xlu1 %627  ;;  %v4958_v60 = vadd.f32 %v684_v0, %v492_v25  ;;  %v699_v21 = vmul.f32 %v6357_v42, %v283_v9  ;;  %v707_v48 = vmul.f32 %v4793_v43, %v291_v5  ;;  %v4969_v44 = vadd.f32 %v692_v10, %v500_v24  ;;  %v162_v25 = vld [vmem:[#allocation2 + $0x260] sm:$0xff]  ;;  %v6366_v0 = vld [vmem:[#allocation20_spill] sm:$0xff] }
 0x107   :  { %v751_v4 = vmul.f32 %v4956_v35, %v335_v11  ;;  %v753_v40 = vmul.f32 %v4956_v35, %v337_v1  ;;  %v750_v38 = vmul.f32 %v4956_v35, %v334_v59  ;;  %v752_v22 = vmul.f32 %v4956_v35, %v336_v46  ;;  %v293_v1 = vld [vmem:[#allocation5 + $0x278] sm:$0xff]  ;;  %v154_v59 = vld [vmem:[#allocation2 + $0x220] sm:$0xff] }
 0x108   :  { %v4971_v57 = vadd.f32 %v699_v21, %v507_v2  ;;  %v4973_v20 = vadd.f32 %v707_v48, %v515_v28  ;;  %v509_v24 = vmul.f32 %v4731_v54, %v157_v50  ;;  %v517_v10 = vmul.f32 %v4645_v16, %v165_v33  ;;  %v282_v2 = vld [vmem:[#allocation5 + $0x220] sm:$0xff]  ;;  %v156_v21 = vld [vmem:[#allocation2 + $0x230] sm:$0xff] }
 0x109   :  { %v879_v23 = vadd.f32 %v751_v4, %v559_v27  ;;  %v881_v11 = vadd.f32 %v753_v40, %v561_v36  ;;  %v878_v9 = vadd.f32 %v750_v38, %v558_v14  ;;  %v880_v5 = vadd.f32 %v752_v22, %v560_v56  ;;  %v290_v28 = vld [vmem:[#allocation5 + $0x260] sm:$0xff]  ;;  %v164_v48 = vld [vmem:[#allocation2 + $0x270] sm:$0xff] }
 0x10a   :  { %v701_v4 = vmul.f32 %v6357_v42, %v285_v41  ;;  %v709_v40 = vmul.f32 %v4793_v43, %v293_v1  ;;  %v506_v38 = vmul.f32 %v4731_v54, %v154_v59  ;;  %v514_v22 = vmul.f32 %v4645_v16, %v162_v25  ;;  %v284_v50 = vld [vmem:[#allocation5 + $0x230] sm:$0xff]  ;;  %v307_v1 = vld [vmem:[#allocation5 + $0x2e8] sm:$0xff]  ;;  %v6359_v25 = vld [vmem:[#allocation15_spill] sm:$0xff] }
 0x10b   :  { %v943_v27 = vpack.c.bf16 %v879_v23, %v4814_v12  ;;  %v945_v36 = vpack.c.bf16 %v881_v11, %v4816_v63  ;;  %v942_v14 = vpack.c.bf16 %v878_v9, %v4818_v19  ;;  %v944_v56 = vpack.c.bf16 %v880_v5, %v4820_v31  ;;  %v292_v33 = vld [vmem:[#allocation5 + $0x270] sm:$0xff]  ;;  %v171_v31 = vld [vmem:[#allocation2 + $0x2a8] sm:$0xff] }
 0x10c   :  { %v698_v12 = vmul.f32 %v6357_v42, %v282_v2  ;;  %v706_v63 = vmul.f32 %v4793_v43, %v290_v28  ;;  %v508_v19 = vmul.f32 %v4731_v54, %v156_v21  ;;  %v179_v23 = vld [vmem:[#allocation2 + $0x2e8] sm:$0xff]  ;;  %v4992_v41 = vadd.f32 %v701_v4, %v509_v24  ;;  %v6361_v28 = vld [vmem:[#allocation18_spill] sm:$0xff] }
 0x10d   :  { %1557 = vmatprep.mubr.bf16.mxu0 %v943_v27  ;;  %1654 = vmatprep.mubr.bf16.mxu1 %v945_v36  ;;  %v4994_v11 = vadd.f32 %v709_v40, %v517_v10  ;;  %v516_v9 = vmul.f32 %v4645_v16, %v164_v48  ;;  %v299_v5 = vld [vmem:[#allocation5 + $0x2a8] sm:$0xff]  ;;  %v6362_v27 = vld [vmem:[#allocation17_spill] sm:$0xff]  ;;  %v700_v24 = vmul.f32 %v6357_v42, %v284_v50  ;;  %v173_v10 = vld [vmem:[#allocation2 + $0x2b8] sm:$0xff] }
 0x10e   :  { %1558 = vmatmul.mubr.bf16.gmra.mxu0 %v942_v14  ;;  %1655 = vmatmul.mubr.bf16.gmra.mxu1 %v944_v56  ;;  %v6358_v59 = vld [vmem:[#allocation16_spill] sm:$0xff]  ;;  %v6363_v36 = vpack.c.bf16 %v6361_v28, %v6362_v27  ;;  %v5003_v54 = vadd.f32 %v698_v12, %v506_v38  ;;  %v5005_v21 = vadd.f32 %v706_v63, %v514_v22  ;;  %v181_v14 = vld [vmem:[#allocation2 + $0x2f8] sm:$0xff]  ;;  %v6365_v42 = vld [vmem:[#allocation21_spill] sm:$0xff] }
 0x10f   :  { %v6360_v2 = vpack.c.bf16 %v6358_v59, %v6359_v25  ;;  %v301_v56 = vld [vmem:[#allocation5 + $0x2b8] sm:$0xff]  ;;  %v708_v48 = vmul.f32 %v4793_v43, %v292_v33  ;;  %v6364_v4 = vld [vmem:[#allocation24_spill] sm:$0xff]  ;;  %v531_v59 = vmul.f32 %v4822_v58, %v179_v23  ;;  %v5015_v22 = vadd.f32 %v700_v24, %v508_v19  ;;  %v178_v63 = vld [vmem:[#allocation2 + $0x2e0] sm:$0xff] }
 0x110   :  { %1792 = vmatprep.mubr.bf16.mxu1 %v6363_v36  ;;  %v523_v40 = vmul.f32 %v6364_v4, %v171_v31  ;;  %v309_v25 = vld [vmem:[#allocation5 + $0x2f8] sm:$0xff]  ;;  %v715_v50 = vmul.f32 %v6365_v42, %v299_v5  ;;  %v723_v12 = vmul.f32 %v4843_v13, %v307_v1  ;;  %v298_v28 = vld [vmem:[#allocation5 + $0x2a0] sm:$0xff]  ;;  %v525_v43 = vmul.f32 %v6364_v4, %v173_v10  ;;  %v172_v36 = vld [vmem:[#allocation2 + $0x2b0] sm:$0xff] }
 0x111   :  { %1695 = vmatprep.mubr.bf16.mxu0 %v6360_v2  ;;  %v170_v2 = vld [vmem:[#allocation2 + $0x2a0] sm:$0xff]  ;;  %v5019_v27 = vadd.f32 %v708_v48, %v516_v9  ;;  %v533_v33 = vmul.f32 %v4822_v58, %v181_v14  ;;  %v717_v31 = vmul.f32 %v6365_v42, %v301_v56  ;;  %v725_v5 = vmul.f32 %v4843_v13, %v309_v25  ;;  %v180_v24 = vld [vmem:[#allocation2 + $0x2f0] sm:$0xff] }
 0x112   :  { %v306_v23 = vld [vmem:[#allocation5 + $0x2e0] sm:$0xff]  ;;  %v5024_v16 = vadd.f32 %v715_v50, %v523_v40  ;;  %v5026_v19 = vadd.f32 %v723_v12, %v531_v59  ;;  %v522_v1 = vmul.f32 %v6364_v4, %v170_v2  ;;  %v300_v38 = vld [vmem:[#allocation5 + $0x2b0] sm:$0xff]  ;;  %v530_v14 = vmul.f32 %v4822_v58, %v178_v63  ;;  %v187_v50 = vld [vmem:[#allocation2 + $0x328] sm:$0xff] }
 0x113   :  { %v5032_v10 = vadd.f32 %v717_v31, %v525_v43  ;;  %v714_v56 = vmul.f32 %v6365_v42, %v298_v28  ;;  %v308_v48 = vld [vmem:[#allocation5 + $0x2f0] sm:$0xff]  ;;  %v5038_v59 = vadd.f32 %v725_v5, %v533_v33  ;;  %v722_v25 = vmul.f32 %v4843_v13, %v306_v23  ;;  %v315_v12 = vld [vmem:[#allocation5 + $0x328] sm:$0xff]  ;;  %v6367_v9 = vld [vmem:[#allocation19_spill] sm:$0xff] }
 0x114   :  { %v524_v2 = vmul.f32 %v6364_v4, %v172_v36  ;;  %v6368_v43 = vpack.c.bf16 %v6366_v0, %v6367_v9  ;;  %v6369_v31 = vld [vmem:[#allocation23_spill] sm:$0xff]  ;;  %v6370_v63 = vld [vmem:[#allocation22_spill] sm:$0xff]  ;;  %v532_v40 = vmul.f32 %v4822_v58, %v180_v24  ;;  %v716_v33 = vmul.f32 %v6365_v42, %v300_v38  ;;  %v6373_v23 = vld [vmem:[#allocation25_spill] sm:$0xff] }
 0x115   :  { %v6371_v46 = vpack.c.bf16 %v6369_v31, %v6370_v63  ;;  %v5048_v28 = vadd.f32 %v714_v56, %v522_v1  ;;  %v6372_v5 = vld [vmem:[#allocation26_spill] sm:$0xff]  ;;  %v6375_v4 = vpack.c.bf16 %v4777_v45, %v4774_v15  ;;  %v933_v0 = vpack.c.bf16 %v5038_v59, %v5032_v10  ;;  %v194_v24 = vld [vmem:[#allocation2 + $0x360] sm:$0xff]  ;;  %v188_v59 = vld [vmem:[#allocation2 + $0x330] sm:$0xff] }
 0x116   :  { %1696 = vmatmul.mubr.bf16.vlgmr.msra.gmra.mxu0 %v6368_v43  ;;  %v6374_v30 = vpack.c.bf16 %v6372_v5, %v6373_v23  ;;  %v5060_v36 = vadd.f32 %v722_v25, %v530_v14  ;;  %v189_v1 = vld [vmem:[#allocation2 + $0x338] sm:$0xff]  ;;  %v5063_v58 = vadd.f32 %v716_v33, %v524_v2  ;;  %v539_v38 = vmul.f32 %v4868_v26, %v187_v50  ;;  %v314_v10 = vld [vmem:[#allocation5 + $0x320] sm:$0xff]  ;;  %v316_v25 = vld [vmem:[#allocation5 + $0x330] sm:$0xff] }
 0x117   :  { %1793 = vmatmul.mubr.bf16.vlgmr.msra.gmra.mxu1 %v6371_v46  ;;  %v724_v46 = vmul.f32 %v4843_v13, %v308_v48  ;;  %v317_v9 = vld [vmem:[#allocation5 + $0x338] sm:$0xff]  ;;  %v731_v42 = vmul.f32 %v4891_v32, %v315_v12  ;;  %v322_v14 = vld [vmem:[#allocation5 + $0x360] sm:$0xff]  ;;  %v541_v13 = vmul.f32 %v4868_v26, %v189_v1  ;;  %v730_v31 = vmul.f32 %v4891_v32, %v314_v10  ;;  %v196_v33 = vld [vmem:[#allocation2 + $0x370] sm:$0xff] }
 0x118   :  { %1703 = vmatprep.mubr.bf16.mxu0 %v6374_v30  ;;  %1800 = vmatprep.mubr.bf16.mxu1 %v6375_v4  ;;  %v186_v30 = vld [vmem:[#allocation2 + $0x320] sm:$0xff]  ;;  %v930_v15 = vpack.c.bf16 %v5060_v36, %v5048_v28  ;;  %v733_v48 = vmul.f32 %v4891_v32, %v317_v9  ;;  %v738_v63 = vmul.f32 %v4909_v39, %v322_v14  ;;  %v324_v5 = vld [vmem:[#allocation5 + $0x370] sm:$0xff] }
 0x119   :  { %v5069_v45 = vadd.f32 %v724_v46, %v532_v40  ;;  %v5071_v56 = vadd.f32 %v731_v42, %v539_v38  ;;  %v538_v50 = vmul.f32 %v4868_v26, %v186_v30  ;;  %v6376_v43 = vld [vmem:[#allocation27_spill] sm:$0xff]  ;;  %v540_v23 = vmul.f32 %v4868_v26, %v188_v59  ;;  %v6380_v42 = vld [vmem:[#allocation32_spill] sm:$0xff] }
 0x11a   :  { %v861_v12 = vadd.f32 %v733_v48, %v541_v13  ;;  %v546_v40 = vmul.f32 %v6376_v43, %v194_v24  ;;  %v732_v4 = vmul.f32 %v4891_v32, %v316_v25  ;;  %v6377_v46 = vpack.c.bf16 %v4832_v8, %v4829_v7  ;;  %v6381_v26 = vld [vmem:[#allocation31_spill] sm:$0xff]  ;;  %v341_v13 = vld [vmem:[#allocation5 + $0x3f8] sm:$0xff]  ;;  %v203_v48 = vld [vmem:[#allocation2 + $0x3a8] sm:$0xff] }
 0x11b   :  { %v932_v2 = vpack.c.bf16 %v5069_v45, %v5063_v58  ;;  %v6378_v1 = vpack.c.bf16 %v4847_v17, %v4845_v47  ;;  %v5089_v9 = vadd.f32 %v730_v31, %v538_v50  ;;  %v6379_v38 = vpack.c.bf16 %v4859_v34, %v4857_v53  ;;  %v333_v25 = vld [vmem:[#allocation5 + $0x3b8] sm:$0xff]  ;;  %v6394_v50 = vld [vmem:[#allocation29_spill] sm:$0xff]  ;;  %v330_v28 = vld [vmem:[#allocation5 + $0x3a0] sm:$0xff] }
 0x11c   :  { %v5091_v58 = vadd.f32 %v738_v63, %v546_v40  ;;  %v6382_v30 = vpack.c.bf16 %v6380_v42, %v6381_v26  ;;  %v548_v32 = vmul.f32 %v6376_v43, %v196_v33  ;;  %v740_v7 = vmul.f32 %v4909_v39, %v324_v5  ;;  %v6395_v31 = vld [vmem:[#allocation30_spill] sm:$0xff] }
 0x11d   :  { %v5101_v8 = vadd.f32 %v732_v4, %v540_v23  ;;  %v6383_v53 = vpack.c.bf16 %v4893_v52, %v4887_v37  ;;  %v6384_v34 = vpack.c.bf16 %v4906_v51, %v4904_v49  ;;  %v6385_v24 = vpack.c.bf16 %v4915_v3, %v4913_v62  ;;  %v323_v49 = vld [vmem:[#allocation5 + $0x368] sm:$0xff]  ;;  %v325_v51 = vld [vmem:[#allocation5 + $0x378] sm:$0xff]  ;;  %v202_v23 = vld [vmem:[#allocation2 + $0x3a0] sm:$0xff] }
 0x11e   :  { %1704 = vmatmul.mubr.bf16.gmra.mxu0 %v6377_v46  ;;  %v938_v47 = vpack.c.bf16 %v5091_v58, %v5089_v9  ;;  %v5105_v17 = vadd.f32 %v740_v7, %v548_v32  ;;  %v6386_v10 = vpack.c.bf16 %v4933_v6, %v4931_v29  ;;  %v6387_v14 = vpack.c.bf16 %v4952_v61, %v4950_v55  ;;  %v195_v3 = vld [vmem:[#allocation2 + $0x368] sm:$0xff]  ;;  %v197_v29 = vld [vmem:[#allocation2 + $0x378] sm:$0xff]  ;;  %v210_v4 = vld [vmem:[#allocation2 + $0x3e0] sm:$0xff] }
 0x11f   :  { %1801 = vmatmul.mubr.bf16.gmra.mxu1 %v6378_v1  ;;  %1711 = vmatprep.mubr.bf16.mxu0 %v6379_v38  ;;  %v6388_v37 = vpack.c.bf16 %v4969_v44, %v4958_v60  ;;  %v6389_v52 = vpack.c.bf16 %v4973_v20, %v4971_v57  ;;  %v6390_v62 = vpack.c.bf16 %v4994_v11, %v4992_v41  ;;  %v340_v46 = vld [vmem:[#allocation5 + $0x3f0] sm:$0xff] }
 0x120   :  { %1808 = vmatprep.mubr.bf16.mxu1 %v6382_v30  ;;  %v940_v45 = vpack.c.bf16 %v5105_v17, %v5101_v8  ;;  %v739_v6 = vmul.f32 %v4909_v39, %v323_v49  ;;  %v741_v55 = vmul.f32 %v4909_v39, %v325_v51  ;;  %v6391_v61 = vpack.c.bf16 %v5005_v21, %v5003_v54  ;;  %v339_v39 = vld [vmem:[#allocation5 + $0x3e8] sm:$0xff]  ;;  %v212_v38 = vld [vmem:[#allocation2 + $0x3f0] sm:$0xff]  ;;  %v2089_v8 = vld [vmem:[#allocation8 + $0x180] sm:$0xff] }
 0x121   :  { %v6392_v60 = vpack.c.bf16 %v5019_v27, %v5015_v22  ;;  %v6393_v44 = vpack.c.bf16 %v5026_v19, %v5024_v16  ;;  %v547_v57 = vmul.f32 %v6376_v43, %v195_v3  ;;  %v549_v20 = vmul.f32 %v6376_v43, %v197_v29  ;;  %v211_v54 = vld [vmem:[#allocation2 + $0x3e8] sm:$0xff]  ;;  %v205_v22 = vld [vmem:[#allocation2 + $0x3b8] sm:$0xff]  ;;  %v332_v7 = vld [vmem:[#allocation5 + $0x3b0] sm:$0xff] }
 0x122   :  { %v331_v21 = vld [vmem:[#allocation5 + $0x3a8] sm:$0xff]  ;;  %v755_v59 = vmul.f32 %v4956_v35, %v339_v39  ;;  %v213_v27 = vld [vmem:[#allocation2 + $0x3f8] sm:$0xff]  ;;  %v555_v43 = vmul.f32 %v6394_v50, %v203_v48  ;;  %v563_v40 = vmul.f32 %v4937_v18, %v211_v54  ;;  %v557_v33 = vmul.f32 %v6394_v50, %v205_v22  ;;  %v2085_v48 = vld [vmem:[#allocation8 + $0x160] sm:$0xff] }
 0x123   :  { %v867_v41 = vadd.f32 %v739_v6, %v547_v57  ;;  %v869_v11 = vadd.f32 %v741_v55, %v549_v20  ;;  %v747_v63 = vmul.f32 %v6395_v31, %v331_v21  ;;  %v554_v26 = vmul.f32 %v6394_v50, %v202_v23  ;;  %v2102_v29 = vld [vmem:[#allocation8 + $0x1e8] sm:$0xff] }
 0x124   :  { %v883_v5 = vadd.f32 %v755_v59, %v563_v40  ;;  %v562_v30 = vmul.f32 %v4937_v18, %v210_v4  ;;  %v746_v32 = vmul.f32 %v6395_v31, %v330_v28  ;;  %v564_v49 = vmul.f32 %v4937_v18, %v212_v38  ;;  %v2090_v17 = vld [vmem:[#allocation8 + $0x188] sm:$0xff] }
 0x125   :  { %v939_v16 = vpack.c.bf16 %v867_v41, %v5071_v56  ;;  %v941_v19 = vpack.c.bf16 %v869_v11, %v861_v12  ;;  %v565_v56 = vmul.f32 %v4937_v18, %v213_v27  ;;  %v749_v12 = vmul.f32 %v6395_v31, %v333_v25  ;;  %v2094_v41 = vld [vmem:[#allocation8 + $0x1a8] sm:$0xff] }
 0x126   :  { %1712 = vmatmul.mubr.bf16.gmra.mxu0 %v6383_v53  ;;  %v875_v1 = vadd.f32 %v747_v63, %v555_v43  ;;  %v748_v6 = vmul.f32 %v6395_v31, %v332_v7  ;;  %v874_v18 = vadd.f32 %v746_v32, %v554_v26  ;;  %v3675_v11 = vcombine.low %v2090_v17, %v2094_v41  ;;  %v2082_v54 = vld [vmem:[#allocation8 + $0x148] sm:$0xff] }
 0x127   :  { %1809 = vmatmul.mubr.bf16.gmra.mxu1 %v6384_v34  ;;  %1719 = vmatprep.mubr.bf16.mxu0 %v6385_v24  ;;  %v877_v42 = vadd.f32 %v749_v12, %v557_v33  ;;  %v3676_v39 = vcombine.high %v2090_v17, %v2094_v41  ;;  %v2086_v22 = vld [vmem:[#allocation8 + $0x168] sm:$0xff]  ;;  %v2073_v12 = vld [vmem:[#allocation8 + $0x100] sm:$0xff] }
 0x128   :  { %1816 = vmatprep.mubr.bf16.mxu1 %v6386_v10  ;;  %v947_v53 = vpack.c.bf16 %v883_v5, %v875_v1  ;;  %v756_v10 = vmul.f32 %v4956_v35, %v340_v46  ;;  %v3667_v27 = vcombine.low %v2082_v54, %v2086_v22  ;;  %v3668_v25 = vcombine.high %v2082_v54, %v2086_v22  ;;  %v2077_v5 = vld [vmem:[#allocation8 + $0x120] sm:$0xff]  ;;  %v2074_v23 = vld [vmem:[#allocation8 + $0x108] sm:$0xff] }
 0x129   :  { %v3657_v4 = vcombine.low %v2073_v12, %v2077_v5  ;;  %v3658_v28 = vcombine.high %v2073_v12, %v2077_v5  ;;  %v2065_v46 = vld [vmem:[#allocation8 + $0xc0] sm:$0xff]  ;;  %v2066_v38 = vld [vmem:[#allocation8 + $0xc8] sm:$0xff]  ;;  %v5201_v5 = vld [vmem:[#allocation8 + $0x1d0] sm:$0xff] }
 0x12a   :  { %v2069_v1 = vld [vmem:[#allocation8 + $0xe0] sm:$0xff]  ;;  %v2070_v7 = vld [vmem:[#allocation8 + $0xe8] sm:$0xff] }
 0x12b   :  { %v3650_v32 = vcombine.high %v2065_v46, %v2069_v1  ;;  %v2042_v54 = vld [vmem:[#allocation8 + $0x8] sm:$0xff] }
 0x12c   :  { %v2046_v22 = vld [vmem:[#allocation8 + $0x28] sm:$0xff] }
 0x12e   :  { %1720 = vmatmul.mubr.bf16.gmra.mxu0 %v6387_v14  ;;  %v2097_v14 = vld [vmem:[#allocation8 + $0x1c0] sm:$0xff] }
 0x12f   :  { %1817 = vmatmul.mubr.bf16.gmra.mxu1 %v6388_v37  ;;  %1727 = vmatprep.mubr.bf16.mxu0 %v6389_v52  ;;  %v2101_v37 = vld [vmem:[#allocation8 + $0x1e0] sm:$0xff]  ;;  %v2098_v52 = vld [vmem:[#allocation8 + $0x1c8] sm:$0xff] }
 0x130   :  { %1824 = vmatprep.mubr.bf16.mxu1 %v6390_v62  ;;  %v3681_v51 = vcombine.low %v2097_v14, %v2101_v37  ;;  %v3682_v3 = vcombine.high %v2097_v14, %v2101_v37  ;;  %v3684_v55 = vcombine.high %v2098_v52, %v2102_v29  ;;  %v2058_v14 = vld [vmem:[#allocation8 + $0x88] sm:$0xff] }
 0x132   :  { %2467 = vmatprep.subr.bf16.mxu0 %v3682_v3  ;;  %2580 = vmatprep.subr.bf16.mxu1 %v3684_v55  ;;  %v2053_v55 = vld [vmem:[#allocation8 + $0x60] sm:$0xff] }
 0x133   :  { %2468 = vmatpush1.bf16.msra.mxu0 %v3681_v51  ;;  %v3651_v51 = vcombine.low %v2066_v38, %v2070_v7 }
 0x136   :  { %1728 = vmatmul.mubr.bf16.gmra.mxu0 %v6391_v61 }
 0x137   :  { %1825 = vmatmul.mubr.bf16.gmra.mxu1 %v6392_v60  ;;  %1735 = vmatprep.mubr.bf16.mxu0 %v6393_v44  ;;  %v884_v60 = vadd.f32 %v756_v10, %v564_v49  ;;  %v2061_v10 = vld [vmem:[#allocation8 + $0xa0] sm:$0xff]  ;;  %v2062_v49 = vld [vmem:[#allocation8 + $0xa8] sm:$0xff] }
 0x138   :  { %1832 = vmatprep.mubr.bf16.mxu1 %v933_v0  ;;  %v757_v0 = vmul.f32 %v4956_v35, %v341_v13  ;;  %v2081_v13 = vld [vmem:[#allocation8 + $0x140] sm:$0xff] }
 0x139   :  { %v3665_v21 = vcombine.low %v2081_v13, %v2085_v48  ;;  %v3666_v59 = vcombine.high %v2081_v13, %v2085_v48  ;;  %v2041_v13 = vld [vmem:[#allocation8] sm:$0xff] }
 0x13a   :  { %v885_v36 = vadd.f32 %v757_v0, %v565_v56  ;;  %v5177_v0 = vld [vmem:[%s6279_s5] ss:$0 sm:$0xff] }
 0x13b   :  { %v2045_v48 = vld [vmem:[#allocation8 + $0x20] sm:$0xff] }
 0x13c   :  { %v949_v62 = vpack.c.bf16 %v885_v36, %v877_v42  ;;  %v2078_v36 = vld [vmem:[#allocation8 + $0x128] sm:$0xff] }
 0x13e   :  { %1736 = vmatmul.mubr.bf16.gmra.mxu0 %v930_v15  ;;  %v338_v15 = vld [vmem:[#allocation5 + $0x3e0] sm:$0xff] }
 0x13f   :  { %1833 = vmatmul.mubr.bf16.gmra.mxu1 %v932_v2  ;;  %1743 = vmatprep.mubr.bf16.mxu0 %v939_v16  ;;  %v204_v2 = vld [vmem:[#allocation2 + $0x3b0] sm:$0xff]  ;;  %v754_v34 = vmul.f32 %v4956_v35, %v338_v15  ;;  %v3683_v35 = vcombine.low %v2098_v52, %v2102_v29 }
 0x140   :  { %1840 = vmatprep.mubr.bf16.mxu1 %v941_v19  ;;  %v556_v24 = vmul.f32 %v6394_v50, %v204_v2  ;;  %v3659_v2 = vcombine.low %v2074_v23, %v2078_v36 }
 0x141   :  { %v882_v61 = vadd.f32 %v754_v34, %v562_v30  ;;  %2581 = vmatpush1.bf16.msra.mxu1 %v3683_v35  ;;  %v3660_v30 = vcombine.high %v2074_v23, %v2078_v36  ;;  %v3652_v34 = vcombine.high %v2066_v38, %v2070_v7  ;;  %v2049_v35 = vld [vmem:[#allocation8 + $0x40] sm:$0xff]  ;;  %v5203_v23 = vld [vmem:[#allocation8 + $0x1f0] sm:$0xff] }
 0x142   :  { %v876_v44 = vadd.f32 %v748_v6, %v556_v24  ;;  %2582 = vmatprep.subr.bf16.mxu1 %v3676_v39  ;;  %v2057_v24 = vld [vmem:[#allocation8 + $0x80] sm:$0xff]  ;;  %v3644_v6 = vcombine.high %v2058_v14, %v2062_v49 }
 0x143   :  { %v946_v9 = vpack.c.bf16 %v882_v61, %v874_v18  ;;  %v3641_v18 = vcombine.low %v2057_v24, %v2061_v10 }
 0x144   :  { %v948_v58 = vpack.c.bf16 %v884_v60, %v876_v44  ;;  %v2050_v44 = vld [vmem:[#allocation8 + $0x48] sm:$0xff] }
 0x145   :  { %2583 = vmatpush1.bf16.msra.mxu1 %v3675_v11 }
 0x146   :  { %1744 = vmatmul.mubr.bf16.gmra.mxu0 %v938_v47  ;;  %v2093_v47 = vld [vmem:[#allocation8 + $0x1a0] sm:$0xff]  ;;  %2584 = vmatprep.subr.bf16.mxu1 %v3668_v25 }
 0x147   :  { %1841 = vmatmul.mubr.bf16.gmra.mxu1 %v940_v45  ;;  %1751 = vmatprep.mubr.bf16.mxu0 %v947_v53  ;;  %v6396_v45 = vmov 0   ;;  %v3673_v57 = vcombine.low %v2089_v8, %v2093_v47  ;;  %v3674_v20 = vcombine.high %v2089_v8, %v2093_v47  ;;  %v3649_v53 = vcombine.low %v2065_v46, %v2069_v1  ;;  %v5215_v1 = vld [vmem:[#allocation8 + $0x1f8] sm:$0xff] }
 0x148   :  { %1848 = vmatprep.mubr.bf16.mxu1 %v949_v62  ;;  %v3642_v62 = vcombine.high %v2057_v24, %v2061_v10  ;;  %v3643_v47 = vcombine.low %v2058_v14, %v2062_v49  ;;  %v3686_v46 = vcombine.high %v5201_v5, %v5203_v23 }
 0x149   :  { %2469 = vmatprep.subr.bf16.mxu0 %v3674_v20  ;;  %2585 = vmatpush1.bf16.msra.mxu1 %v3667_v27  ;;  %v3633_v20 = vcombine.low %v2049_v35, %v2053_v55 }
 0x14a   :  { %2470 = vmatpush1.bf16.msra.mxu0 %v3673_v57  ;;  %2586 = vmatprep.subr.bf16.mxu1 %v3660_v30  ;;  %v5414_v30 = vld [vmem:[#allocation8 + $0x130] sm:$0xff] }
 0x14b   :  { %2471 = vmatprep.subr.bf16.mxu0 %v3666_v59  ;;  %v3626_v59 = vcombine.high %v2041_v13, %v2045_v48  ;;  %6400 = vst [vmem:[#allocation18_spill] sm:$0xff] %v5414_v30 }
 0x14d   :  { %2587 = vmatpush1.bf16.msra.mxu1 %v3659_v2  ;;  %v5453_v2 = vld [vmem:[#allocation8 + $0xf8] sm:$0xff] }
 0x14e   :  { %1752 = vmatmul.mubr.bf16.gmra.mxu0 %v946_v9  ;;  %2588 = vmatprep.subr.bf16.mxu1 %v3652_v34  ;;  %v2054_v9 = vld [vmem:[#allocation8 + $0x68] sm:$0xff] }
 0x14f   :  { %1849 = vmatmul.mubr.bf16.gmra.mxu1 %v948_v58  ;;  %2499 = vmatprep.mubr.bf16.mxu0 %v6396_v45  ;;  %v3634_v58 = vcombine.high %v2049_v35, %v2053_v55  ;;  %v3636_v17 = vcombine.high %v2050_v44, %v2054_v9  ;;  %v3635_v39 = vcombine.low %v2050_v44, %v2054_v9 }
 0x150   :  { %2612 = vmatprep.mubr.bf16.mxu1 %v6396_v45  ;;  %2472 = vmatpush1.bf16.msra.mxu0 %v3665_v21  ;;  %v3625_v21 = vcombine.low %v2041_v13, %v2045_v48 }
 0x151   :  { %2473 = vmatprep.subr.bf16.mxu0 %v3658_v28  ;;  %2589 = vmatpush1.bf16.msra.mxu1 %v3651_v51 }
 0x152   :  { %2590 = vmatprep.subr.bf16.mxu1 %v3644_v6 }
 0x154   :  { %2474 = vmatpush1.bf16.msra.mxu0 %v3657_v4  ;;  %v5205_v4 = vld [vmem:[#allocation8 + $0x1d8] sm:$0xff] }
 0x155   :  { %2475 = vmatprep.subr.bf16.mxu0 %v3650_v32  ;;  %2591 = vmatpush1.bf16.msra.mxu1 %v3643_v47  ;;  %v3688_v32 = vcombine.high %v5205_v4, %v5215_v1 }
 0x156   :  { %2592 = vmatprep.subr.bf16.mxu1 %v3636_v17 }
 0x158   :  { %2476 = vmatpush1.bf16.msra.mxu0 %v3649_v53 }
 0x159   :  { %2477 = vmatprep.subr.bf16.mxu0 %v3642_v62  ;;  %2593 = vmatpush1.bf16.msra.mxu1 %v3635_v39 }
 0x15c   :  { %2478 = vmatpush1.bf16.msra.mxu0 %v3641_v18 }
 0x15d   :  { %2479 = vmatprep.subr.bf16.mxu0 %v3634_v58 }
 0x160   :  { %2480 = vmatpush1.bf16.msra.mxu0 %v3633_v20 }
 0x161   :  { %2481 = vmatprep.subr.bf16.mxu0 %v3626_v59 }
 0x164   :  { %2482 = vmatpush1.bf16.msra.mxu0 %v3625_v21 }
 0x165   :  { %2693 = vmatprep.subr.bf16.mxu0 %v3686_v46 }
 0x17c   :  { %v3705_v16 = vpop.f32.mrf.mxu0  ;;  %v3769_v19 = vpop.f32.mrf.mxu1 }
 0x17e   :  { %v3706_v50 = vpop.f32.mrf.mxu0  ;;  %v3770_v43 = vpop.f32.mrf.mxu1 }
 0x17f   :  { %v3707_v40 = vadd.f32 %v3706_v50, %v3705_v16  ;;  %v3771_v31 = vadd.f32 %v3770_v43, %v3769_v19  ;;  %v3628_v16 = vcombine.high %v2042_v54, %v2046_v22  ;;  %v3627_v19 = vcombine.low %v2042_v54, %v2046_v22 }
 0x180   :  { %v5179_v63 = vpop.f32.mrf.mxu0  ;;  %v5181_v33 = vpop.f32.mrf.mxu1 }
 0x181   :  { %v1504_v56 = vadd.f32 %v3707_v40, %v5177_v0  ;;  %2594 = vmatprep.subr.bf16.mxu1 %v3628_v16 }
 0x182   :  { %v5186_v42 = vpop.f32.mrf.mxu0  ;;  %v5188_v26 = vpop.f32.mrf.mxu1  ;;  %2595 = vmatpush1.bf16.msra.mxu1 %v3627_v19 }
 0x183   :  { %v5184_v15 = vadd.f32 %v3771_v31, %v1504_v56  ;;  %2806 = vmatprep.subr.bf16.mxu1 %v3688_v32 }
 0x186   :  { %v3711_v37 = vpop.f32.mrf.mxu0  ;;  %v3775_v52 = vpop.f32.mrf.mxu1 }
 0x188   :  { %v3712_v3 = vpop.f32.mrf.mxu0  ;;  %v3776_v29 = vpop.f32.mrf.mxu1 }
 0x189   :  { %v3713_v61 = vadd.f32 %v3712_v3, %v3711_v37  ;;  %v3777_v60 = vadd.f32 %v3776_v29, %v3775_v52 }
 0x18a   :  { %v5193_v41 = vpop.f32.mrf.mxu0  ;;  %v5195_v11 = vpop.f32.mrf.mxu1 }
 0x18b   :  { %v1512_v8 = vadd.f32 %v3713_v61, %v5177_v0 }
 0x18c   :  { %v5197_v27 = vpop.f32.mrf.mxu0  ;;  %v5199_v25 = vpop.f32.mrf.mxu1 }
 0x18d   :  { %v5191_v57 = vadd.f32 %v3777_v60, %v1512_v8 }
 0x194   :  { %v3717_v50 = vpop.f32.mrf.mxu0 }
 0x195   :  { %v3781_v43 = vpop.f32.mrf.mxu1 }
 0x196   :  { %v3718_v40 = vpop.f32.mrf.mxu0 }
 0x197   :  { %v3782_v31 = vpop.f32.mrf.mxu1  ;;  %v3719_v56 = vadd.f32 %v3718_v40, %v3717_v50 }
 0x198   :  { %v3783_v12 = vadd.f32 %v3782_v31, %v3781_v43  ;;  %v5207_v28 = vpop.f32.mrf.mxu0 }
 0x199   :  { %v5209_v36 = vpop.f32.mrf.mxu1  ;;  %v1520_v38 = vadd.f32 %v3719_v56, %v5177_v0 }
 0x19a   :  { %v5224_v53 = vpop.f32.mrf.mxu0 }
 0x19b   :  { %v5222_v7 = vadd.f32 %v3783_v12, %v1520_v38  ;;  %v5226_v34 = vpop.f32.mrf.mxu1 }
 0x19e   :  { %v3723_v24 = vpop.f32.mrf.mxu0 }
 0x19f   :  { %v3787_v10 = vpop.f32.mrf.mxu1 }
 0x1a0   :  { %v3724_v14 = vpop.f32.mrf.mxu0 }
 0x1a1   :  { %v3788_v37 = vpop.f32.mrf.mxu1  ;;  %v3725_v52 = vadd.f32 %v3724_v14, %v3723_v24 }
 0x1a2   :  { %v3789_v62 = vadd.f32 %v3788_v37, %v3787_v10  ;;  %v5231_v3 = vpop.f32.mrf.mxu0  ;;  %v4340_v37 = vmov 2  }
 0x1a3   :  { %v1528_v49 = vadd.f32 %v3725_v52, %v5177_v0  ;;  %v5233_v29 = vpop.f32.mrf.mxu1  ;;  %3979 = vset.pattern.permute.xlu1 %v4340_v37  ;;  %3980 = vset.pattern.permute.xlu0 %v4340_v37  ;;  %v4083_v37 = vld [vmem:[%s6276_s2 + $0x28] sm:$0xff] }
 0x1a4   :  { %v5235_v6 = vpop.f32.mrf.mxu0 }
 0x1a5   :  { %v5229_v51 = vadd.f32 %v3789_v62, %v1528_v49  ;;  %v5237_v35 = vpop.f32.mrf.mxu1  ;;  %v4077_v62 = vld [vmem:[%s6276_s2] sm:$0xff]  ;;  %v4078_v49 = vld [vmem:[%s6276_s2 + $0x8] sm:$0xff] }
 0x1a6   :  { %3048 = vperm.xlu1 %3979, %v4077_v62   ;;  %3052 = vperm.xlu0 %3980, %v4078_v49  }
 0x1ac   :  { %v3729_v55 = vpop.f32.mrf.mxu0  ;;  %v3793_v61 = vpop.f32.mrf.mxu1 }
 0x1ae   :  { %v3730_v60 = vpop.f32.mrf.mxu0  ;;  %v3794_v18 = vpop.f32.mrf.mxu1 }
 0x1af   :  { %v3731_v44 = vadd.f32 %v3730_v60, %v3729_v55  ;;  %v3795_v9 = vadd.f32 %v3794_v18, %v3793_v61  ;;  %v4079_v18 = vld [vmem:[%s6276_s2 + $0x10] sm:$0xff] }
 0x1b0   :  { %v5239_v58 = vpop.f32.mrf.mxu0  ;;  %v5241_v8 = vpop.f32.mrf.mxu1  ;;  %3056 = vperm.xlu1 %3979, %v4079_v18  }
 0x1b1   :  { %v1536_v47 = vadd.f32 %v3731_v44, %v5177_v0  ;;  %v4080_v44 = vld [vmem:[%s6276_s2 + $0x20] sm:$0xff] }
 0x1b2   :  { %v5246_v20 = vpop.f32.mrf.mxu0  ;;  %v5248_v39 = vpop.f32.mrf.mxu1  ;;  %3064 = vperm.xlu0 %3980, %v4080_v44  }
 0x1b3   :  { %v5244_v17 = vadd.f32 %v3795_v9, %v1536_v47 }
 0x1b6   :  { %v3735_v13 = vpop.f32.mrf.mxu0  ;;  %v3799_v48 = vpop.f32.mrf.mxu1 }
 0x1b8   :  { %v3736_v54 = vpop.f32.mrf.mxu0  ;;  %v3800_v21 = vpop.f32.mrf.mxu1 }
 0x1b9   :  { %v3737_v59 = vadd.f32 %v3736_v54, %v3735_v13  ;;  %v3801_v22 = vadd.f32 %v3800_v21, %v3799_v48 }
 0x1ba   :  { %v5253_v50 = vpop.f32.mrf.mxu0  ;;  %v5255_v43 = vpop.f32.mrf.mxu1 }
 0x1bb   :  { %v1544_v16 = vadd.f32 %v3737_v59, %v5177_v0  ;;  %v4081_v59 = vld [vmem:[%s6276_s2 + $0x18] sm:$0xff] }
 0x1bc   :  { %v5257_v40 = vpop.f32.mrf.mxu0  ;;  %v5259_v31 = vpop.f32.mrf.mxu1  ;;  %3060 = vperm.xlu1 %3979, %v4081_v59  }
 0x1bd   :  { %v5251_v19 = vadd.f32 %v3801_v22, %v1544_v16  ;;  %v4082_v22 = vld [vmem:[%s6276_s2 + $0x30] sm:$0xff] }
 0x1be   :  { %3072 = vperm.xlu0 %3980, %v4082_v22   ;;  %v3716_v22 = vadd.f32 %v5197_v27, %v5193_v41 }
 0x1c0   :  { %3068 = vperm.xlu1 %3979, %v4083_v37  }
 0x1c4   :  { %v3741_v56 = vpop.f32.mrf.mxu0  ;;  %v3805_v12 = vpop.f32.mrf.mxu1 }
 0x1c6   :  { %v3742_v46 = vpop.f32.mrf.mxu0  ;;  %v3806_v38 = vpop.f32.mrf.mxu1 }
 0x1c7   :  { %v3743_v32 = vadd.f32 %v3742_v46, %v3741_v56  ;;  %v3807_v24 = vadd.f32 %v3806_v38, %v3805_v12 }
 0x1c8   :  { %v5261_v10 = vpop.f32.mrf.mxu0  ;;  %v5263_v14 = vpop.f32.mrf.mxu1 }
 0x1c9   :  { %v1552_v52 = vadd.f32 %v3743_v32, %v5177_v0  ;;  %v3710_v32 = vadd.f32 %v5186_v42, %v5179_v63  ;;  %v4085_v63 = vld [vmem:[%s6276_s2 + $0x38] sm:$0xff]  ;;  %v4086_v42 = vld [vmem:[%s6276_s2 + $0x50] sm:$0xff] }
 0x1ca   :  { %v5274_v61 = vpop.f32.mrf.mxu0  ;;  %v5276_v60 = vpop.f32.mrf.mxu1  ;;  %3076 = vperm.xlu1 %3979, %v4085_v63   ;;  %v4087_v63 = vld [vmem:[%s6276_s2 + $0x48] sm:$0xff] }
 0x1cb   :  { %v5272_v55 = vadd.f32 %v3807_v24, %v1552_v52  ;;  %v4084_v52 = vld [vmem:[%s6276_s2 + $0x40] sm:$0xff] }
 0x1cc   :  { %3080 = vperm.xlu0 %3980, %v4084_v52  }
 0x1ce   :  { %v3747_v9 = vpop.f32.mrf.mxu0  ;;  %v3811_v47 = vpop.f32.mrf.mxu1  ;;  %3084 = vperm.xlu1 %3979, %v4087_v63   ;;  %v5353_v63 = vld [vmem:[#allocation8 + $0x190] sm:$0xff] }
 0x1d0   :  { %v3748_v13 = vpop.f32.mrf.mxu0  ;;  %v3812_v48 = vpop.f32.mrf.mxu1  ;;  %3088 = vperm.xlu0 %3980, %v4086_v42  }
 0x1d1   :  { %v3749_v54 = vadd.f32 %v3748_v13, %v3747_v9  ;;  %v3813_v21 = vadd.f32 %v3812_v48, %v3811_v47  ;;  %v1507_v9 = vadd.f32 %v3710_v32, %v5177_v0 }
 0x1d2   :  { %v5290_v16 = vpop.f32.mrf.mxu0  ;;  %v5292_v56 = vpop.f32.mrf.mxu1 }
 0x1d3   :  { %v1560_v12 = vadd.f32 %v3749_v54, %v5177_v0  ;;  %v3774_v54 = vadd.f32 %v5188_v26, %v5181_v33  ;;  %v4088_v33 = vld [vmem:[%s6276_s2 + $0x60] sm:$0xff] }
 0x1d4   :  { %v5295_v46 = vpop.f32.mrf.mxu0  ;;  %v5297_v38 = vpop.f32.mrf.mxu1  ;;  %3096 = vperm.xlu0 %3980, %v4088_v33   ;;  %v5355_v33 = vld [vmem:[#allocation8 + $0x1b0] sm:$0xff] }
 0x1d5   :  { %6397 = vst [vmem:[#allocation28_spill] sm:$0xff] %v5297_v38  ;;  %v5301_v24 = vadd.f32 %v3813_v21, %v1560_v12  ;;  %v1857_v12 = vld [vmem:[%s6277_s3] sm:$0xff]  ;;  %v1604_v52 = vadd.f32 %v3774_v54, %v1507_v9  ;;  %v1515_v9 = vadd.f32 %v3716_v22, %v5177_v0  ;;  %v3734_v38 = vadd.f32 %v5246_v20, %v5239_v58  ;;  %v1863_v20 = vld [vmem:[%s6277_s3 + $0x30] sm:$0xff] }
 0x1d6   :  { %v3833_v62 = vpop.f32.mrf.mxu0 }
 0x1d7   :  { %6398 = vst [vmem:[#allocation16_spill] sm:$0xff] %v5301_v24  ;;  %v3897_v49 = vpop.f32.mrf.mxu1  ;;  %v5438_v24 = vld [vmem:[#allocation8 + $0xf0] sm:$0xff] }
 0x1d8   :  { %v3834_v18 = vpop.f32.mrf.mxu0  ;;  %6404 = vst [vmem:[#allocation20_spill] sm:$0xff] %v5438_v24 }
 0x1d9   :  { %v3898_v44 = vpop.f32.mrf.mxu1  ;;  %v3835_v47 = vadd.f32 %v3834_v18, %v3833_v62 }
 0x1da   :  { %v3836_v13 = vpop.f32.mrf.mxu0  ;;  %v3899_v59 = vadd.f32 %v3898_v44, %v3897_v49 }
 0x1db   :  { %v3900_v48 = vpop.f32.mrf.mxu1  ;;  %v1698_v21 = vadd.f32 %v3835_v47, %v5184_v15  ;;  %v3722_v15 = vadd.f32 %v5224_v53, %v5207_v28  ;;  %v1858_v47 = vld [vmem:[%s6277_s3 + $0x8] sm:$0xff]  ;;  %v4089_v28 = vld [vmem:[%s6276_s2 + $0x58] sm:$0xff]  ;;  %v3780_v53 = vadd.f32 %v5199_v25, %v5195_v11  ;;  %v3786_v25 = vadd.f32 %v5226_v34, %v5209_v36 }
 0x1dc   :  { %v3837_v32 = vpop.f32.mrf.mxu0  ;;  %3092 = vperm.xlu1 %3979, %v4089_v28   ;;  %v4091_v36 = vld [vmem:[%s6276_s2 + $0x68] sm:$0xff] }
 0x1dd   :  { %v3901_v37 = vpop.f32.mrf.mxu1  ;;  %v1795_v62 = vadd.f32 %v3899_v59, %v1698_v21  ;;  %v3838_v18 = vadd.f32 %v3837_v32, %v3836_v13  ;;  %v4090_v32 = vld [vmem:[%s6276_s2 + $0x70] sm:$0xff]  ;;  %v1612_v11 = vadd.f32 %v3780_v53, %v1515_v9  ;;  %v5368_v9 = vld [vmem:[#allocation8 + $0x1b8] sm:$0xff] }
 0x1de   :  { %v3839_v26 = vpop.f32.mrf.mxu0  ;;  %v3902_v44 = vadd.f32 %v3901_v37, %v3900_v48  ;;  %v1523_v48 = vadd.f32 %v3722_v15, %v5177_v0  ;;  %3104 = vperm.xlu0 %3980, %v4090_v32   ;;  %v3728_v15 = vadd.f32 %v5235_v6, %v5231_v3  ;;  %v5379_v32 = vld [vmem:[#allocation8 + $0x150] sm:$0xff] }
 0x1df   :  { %v3903_v41 = vpop.f32.mrf.mxu1  ;;  %v5332_v27 = vadd.f32 %v1857_v12, %v1795_v62  ;;  %v1701_v49 = vadd.f32 %v3838_v18, %v1604_v52 }
 0x1e0   :  { %v3840_v42 = vpop.f32.mrf.mxu0  ;;  %3100 = vperm.xlu1 %3979, %v4091_v36   ;;  %v1620_v34 = vadd.f32 %v3786_v25, %v1523_v48  ;;  %v1860_v48 = vld [vmem:[%s6277_s3 + $0x18] sm:$0xff]  ;;  %v3792_v36 = vadd.f32 %v5237_v35, %v5233_v29 }
 0x1e1   :  { %v3904_v13 = vpop.f32.mrf.mxu1  ;;  %v1889_v54 = vmul.f32 %v5332_v27, %v5332_v27  ;;  %v1798_v21 = vadd.f32 %v3902_v44, %v1701_v49  ;;  %v3841_v59 = vadd.f32 %v3840_v42, %v3839_v26  ;;  %v1859_v26 = vld [vmem:[%s6277_s3 + $0x10] sm:$0xff] }
 0x1e2   :  { %v3842_v22 = vpop.f32.mrf.mxu0  ;;  %v3905_v18 = vadd.f32 %v3904_v13, %v3903_v41  ;;  %v5366_v13 = vld [vmem:[#allocation8 + $0x198] sm:$0xff] }
 0x1e3   :  { %v3906_v12 = vpop.f32.mrf.mxu1  ;;  %v1905_v37 = vmul.f32 %v1889_v54, %v5332_v27  ;;  %v5350_v52 = vadd.f32 %v1858_v47, %v1798_v21  ;;  %v1706_v62 = vadd.f32 %v3841_v59, %v5191_v57 }
 0x1e4   :  { %v3843_v49 = vpop.f32.mrf.mxu0 }
 0x1e5   :  { %v3907_v44 = vpop.f32.mrf.mxu1  ;;  %v1921_v47 = vmul.f32 0.044715, %v1905_v37  ;;  %v1890_v57 = vmul.f32 %v5350_v52, %v5350_v52  ;;  %v1803_v41 = vadd.f32 %v3905_v18, %v1706_v62  ;;  %v3844_v42 = vadd.f32 %v3843_v49, %v3842_v22  ;;  %v5381_v37 = vld [vmem:[#allocation8 + $0x170] sm:$0xff] }
 0x1e6   :  { %v3908_v3 = vadd.f32 %v3907_v44, %v3906_v12  ;;  %v3845_v6 = vpop.f32.mrf.mxu0  ;;  %v1531_v62 = vadd.f32 %v3728_v15, %v5177_v0 }
 0x1e7   :  { %v3909_v54 = vpop.f32.mrf.mxu1  ;;  %v1937_v59 = vadd.f32 %v1921_v47, %v5332_v27  ;;  %v1906_v28 = vmul.f32 %v1890_v57, %v5350_v52  ;;  %v5377_v53 = vadd.f32 %v1859_v26, %v1803_v41  ;;  %v1709_v22 = vadd.f32 %v3844_v42, %v1612_v11  ;;  %v5395_v57 = vld [vmem:[#allocation8 + $0x158] sm:$0xff] }
 0x1e8   :  { %v3846_v12 = vpop.f32.mrf.mxu0  ;;  %v5397_v41 = vld [vmem:[#allocation8 + $0x178] sm:$0xff]  ;;  %v5416_v29 = vadd.f32 %v3792_v36, %v1531_v62 }
 0x1e9   :  { %v3910_v18 = vpop.f32.mrf.mxu1  ;;  %v1953_v49 = vmul.f32 0.7978846, %v1937_v59  ;;  %v1922_v44 = vmul.f32 0.044715, %v1906_v28  ;;  %v1891_v15 = vmul.f32 %v5377_v53, %v5377_v53  ;;  %v1806_v47 = vadd.f32 %v3908_v3, %v1709_v22  ;;  %v4092_v42 = vld [vmem:[%s6276_s2 + $0x78] sm:$0xff] }
 0x1ea   :  { %3108 = vperm.xlu1 %3979, %v4092_v42   ;;  %v3847_v26 = vadd.f32 %v3846_v12, %v3845_v6  ;;  %v3848_v21 = vpop.f32.mrf.mxu0  ;;  %v5412_v42 = vld [vmem:[#allocation8 + $0x110] sm:$0xff]  ;;  %v3911_v6 = vadd.f32 %v3910_v18, %v3909_v54  ;;  %v1861_v12 = vld [vmem:[%s6277_s3 + $0x20] sm:$0xff]  ;;  %v5426_v62 = vld [vmem:[#allocation8 + $0x118] sm:$0xff] }
 0x1eb   :  { %v3912_v59 = vpop.f32.mrf.mxu1  ;;  %4045 = vtanh.f32 %v1953_v49  ;;  %v1938_v22 = vadd.f32 %v1922_v44, %v5350_v52  ;;  %v1907_v11 = vmul.f32 %v1891_v15, %v5377_v53  ;;  %v5410_v25 = vadd.f32 %v1860_v48, %v1806_v47  ;;  %6399 = vst [vmem:[#allocation15_spill] sm:$0xff] %v5412_v42  ;;  %6401 = vst [vmem:[#allocation17_spill] sm:$0xff] %v5426_v62  ;;  %v5428_v36 = vld [vmem:[#allocation8 + $0x138] sm:$0xff] }
 0x1ec   :  { %v1714_v35 = vadd.f32 %v3847_v26, %v5222_v7  ;;  %v3849_v49 = vpop.f32.mrf.mxu0  ;;  %6402 = vst [vmem:[#allocation24_spill] sm:$0xff] %v5428_v36  ;;  %v1539_v36 = vadd.f32 %v3734_v38, %v5177_v0  ;;  %v3740_v38 = vadd.f32 %v5257_v40, %v5253_v50  ;;  %v3804_v50 = vadd.f32 %v5259_v31, %v5255_v43  ;;  %v1865_v31 = vld [vmem:[%s6277_s3 + $0x40] sm:$0xff] }
 0x1ed   :  { %v3913_v28 = vpop.f32.mrf.mxu1  ;;  %v1954_v48 = vmul.f32 0.7978846, %v1938_v22  ;;  %v1923_v15 = vmul.f32 0.044715, %v1907_v11  ;;  %v1892_v47 = vmul.f32 %v5410_v25, %v5410_v25  ;;  %v3850_v3 = vadd.f32 %v3849_v49, %v3848_v21  ;;  %v5436_v49 = vld [vmem:[#allocation8 + $0xd0] sm:$0xff] }
 0x1ee   :  { %v1811_v7 = vadd.f32 %v3911_v6, %v1714_v35  ;;  %v3914_v54 = vadd.f32 %v3913_v28, %v3912_v59  ;;  %v3851_v18 = vpop.f32.mrf.mxu0  ;;  %6403 = vst [vmem:[#allocation21_spill] sm:$0xff] %v5436_v49  ;;  %v1862_v59 = vld [vmem:[%s6277_s3 + $0x28] sm:$0xff] }
 0x1ef   :  { %v3915_v26 = vpop.f32.mrf.mxu1  ;;  %4047 = vtanh.f32 %v1954_v48  ;;  %v1939_v11 = vadd.f32 %v1923_v15, %v5377_v53  ;;  %v1908_v22 = vmul.f32 %v1892_v47, %v5410_v25  ;;  %v1717_v21 = vadd.f32 %v3850_v3, %v1620_v34  ;;  %v5483_v34 = vld [vmem:[#allocation8 + $0xb8] sm:$0xff] }
 0x1f0   :  { %v5440_v35 = vadd.f32 %v1861_v12, %v1811_v7  ;;  %v3852_v28 = vpop.f32.mrf.mxu0  ;;  %v5451_v7 = vld [vmem:[#allocation8 + $0xd8] sm:$0xff] }
 0x1f1   :  { %v3916_v6 = vpop.f32.mrf.mxu1  ;;  %v1955_v3 = vmul.f32 0.7978846, %v1939_v11  ;;  %v1924_v47 = vmul.f32 0.044715, %v1908_v22  ;;  %v1814_v44 = vadd.f32 %v3914_v54, %v1717_v21  ;;  %v3853_v12 = vadd.f32 %v3852_v28, %v3851_v18  ;;  %v5465_v22 = vld [vmem:[#allocation8 + $0x90] sm:$0xff] }
 0x1f2   :  { %v1893_v48 = vmul.f32 %v5440_v35, %v5440_v35  ;;  %v3917_v30 = vadd.f32 %v3916_v6, %v3915_v26  ;;  %v3854_v42 = vpop.f32.mrf.mxu0  ;;  %6405 = vst [vmem:[#allocation19_spill] sm:$0xff] %v5465_v22  ;;  %v5467_v21 = vld [vmem:[#allocation8 + $0xb0] sm:$0xff] }
 0x1f3   :  { %v3918_v15 = vpop.f32.mrf.mxu1  ;;  %4049 = vtanh.f32 %v1955_v3  ;;  %v1940_v54 = vadd.f32 %v1924_v47, %v5410_v25  ;;  %v5462_v18 = vadd.f32 %v1862_v59, %v1814_v44  ;;  %v1722_v11 = vadd.f32 %v3853_v12, %v5229_v51  ;;  %v5481_v12 = vld [vmem:[#allocation8 + $0x98] sm:$0xff] }
 0x1f4   :  { %v1909_v58 = vmul.f32 %v1893_v48, %v5440_v35  ;;  %v3855_v26 = vpop.f32.mrf.mxu0  ;;  %v3746_v44 = vadd.f32 %v5274_v61, %v5261_v10 }
 0x1f5   :  { %v3919_v28 = vpop.f32.mrf.mxu1  ;;  %v1956_v59 = vmul.f32 0.7978846, %v1940_v54  ;;  %v1894_v3 = vmul.f32 %v5462_v18, %v5462_v18  ;;  %v1819_v48 = vadd.f32 %v3917_v30, %v1722_v11  ;;  %v3856_v47 = vadd.f32 %v3855_v26, %v3854_v42 }
 0x1f6   :  { %v1925_v62 = vmul.f32 0.044715, %v1909_v58  ;;  %v3920_v6 = vadd.f32 %v3919_v28, %v3918_v15  ;;  %v3857_v24 = vpop.f32.mrf.mxu0  ;;  %v3798_v11 = vadd.f32 %v5248_v39, %v5241_v8  ;;  %v1864_v58 = vld [vmem:[%s6277_s3 + $0x38] sm:$0xff] }
 0x1f7   :  { %v3921_v49 = vpop.f32.mrf.mxu1  ;;  %4051 = vtanh.f32 %v1956_v59  ;;  %v1910_v54 = vmul.f32 %v1894_v3, %v5462_v18  ;;  %v5489_v51 = vadd.f32 %v1863_v20, %v1819_v48  ;;  %v1725_v30 = vadd.f32 %v3856_v47, %v5416_v29 }
 0x1f8   :  { %v4046_v42 = vpop.eup %4045  ;;  %v1941_v15 = vadd.f32 %v1925_v62, %v5440_v35  ;;  %v3858_v26 = vpop.f32.mrf.mxu0  ;;  %v1636_v39 = vadd.f32 %v3798_v11, %v1539_v36 }
 0x1f9   :  { %v3922_v28 = vpop.f32.mrf.mxu1  ;;  %v1985_v59 = vadd.f32 1.0, %v4046_v42  ;;  %v1926_v29 = vmul.f32 0.044715, %v1910_v54  ;;  %v1895_v3 = vmul.f32 %v5489_v51, %v5489_v51  ;;  %v1822_v8 = vadd.f32 %v3920_v6, %v1725_v30 }
 0x1fa   :  { %v1957_v40 = vmul.f32 0.7978846, %v1941_v15  ;;  %v3859_v62 = vadd.f32 %v3858_v26, %v3857_v24  ;;  %v3860_v48 = vpop.f32.mrf.mxu0  ;;  %v1547_v6 = vadd.f32 %v3740_v38, %v5177_v0  ;;  %v3923_v43 = vadd.f32 %v3922_v28, %v3921_v49 }
 0x1fb   :  { %v3924_v47 = vpop.f32.mrf.mxu1  ;;  %v1942_v22 = vadd.f32 %v1926_v29, %v5462_v18  ;;  %v1911_v42 = vmul.f32 %v1895_v3, %v5489_v51  ;;  %v5510_v54 = vadd.f32 %v1864_v58, %v1822_v8  ;;  %v2001_v10 = vmul.f32 0.5, %v1985_v59 }
 0x1fc   :  { %v4048_v20 = vpop.eup %4047  ;;  %4053 = vtanh.f32 %v1957_v40  ;;  %v1730_v36 = vadd.f32 %v3859_v62, %v5244_v17  ;;  %v3861_v24 = vpop.f32.mrf.mxu0  ;;  %v3810_v58 = vadd.f32 %v5276_v60, %v5263_v14  ;;  %v1555_v28 = vadd.f32 %v3746_v44, %v5177_v0  ;;  %v1866_v44 = vld [vmem:[%s6277_s3 + $0x48] sm:$0xff] }
 0x1fd   :  { %v3925_v30 = vpop.f32.mrf.mxu1  ;;  %v1986_v61 = vadd.f32 1.0, %v4048_v20  ;;  %v1958_v11 = vmul.f32 0.7978846, %v1942_v22  ;;  %v1927_v15 = vmul.f32 0.044715, %v1911_v42  ;;  %v1896_v38 = vmul.f32 %v5510_v54, %v5510_v54 }
 0x1fe   :  { %v1827_v26 = vadd.f32 %v3923_v43, %v1730_v36  ;;  %v3862_v29 = vadd.f32 %v3861_v24, %v3860_v48  ;;  %v3863_v17 = vpop.f32.mrf.mxu0  ;;  %v3926_v14 = vadd.f32 %v3925_v30, %v3924_v47  ;;  %v2017_v42 = vmul.f32 %v2001_v10, %v5332_v27 }
 0x1ff   :  { %v3927_v49 = vpop.f32.mrf.mxu1  ;;  %v2002_v3 = vmul.f32 0.5, %v1986_v61  ;;  %4055 = vtanh.f32 %v1958_v11  ;;  %v1943_v8 = vadd.f32 %v1927_v15, %v5489_v51  ;;  %v1912_v22 = vmul.f32 %v1896_v38, %v5510_v54 }
 0x200   :  { %v4050_v59 = vpop.eup %4049  ;;  %v5524_v20 = vadd.f32 %v1865_v31, %v1827_v26  ;;  %v1733_v40 = vadd.f32 %v3862_v29, %v1636_v39  ;;  %v3864_v60 = vpop.f32.mrf.mxu0  ;;  %v1867_v29 = vld [vmem:[%s6277_s3 + $0x50] sm:$0xff] }
 0x201   :  { %v3928_v62 = vpop.f32.mrf.mxu1  ;;  %v2018_v48 = vmul.f32 %v2002_v3, %v5350_v52  ;;  %v1959_v36 = vmul.f32 0.7978846, %v1943_v8  ;;  %v3865_v43 = vadd.f32 %v3864_v60, %v3863_v17  ;;  %v1928_v24 = vmul.f32 0.044715, %v1912_v22 }
 0x202   :  { %v1897_v61 = vmul.f32 %v5524_v20, %v5524_v20  ;;  %v1830_v31 = vadd.f32 %v3926_v14, %v1733_v40  ;;  %v3866_v11 = vpop.f32.mrf.mxu0  ;;  %v1987_v47 = vadd.f32 1.0, %v4050_v59  ;;  %v3929_v27 = vadd.f32 %v3928_v62, %v3927_v49 }
 0x203   :  { %v3930_v39 = vpop.f32.mrf.mxu1  ;;  %4057 = vtanh.f32 %v1959_v36  ;;  %v1738_v30 = vadd.f32 %v3865_v43, %v5251_v19  ;;  %v5534_v10 = vpack.c.bf16 %v2018_v48, %v2017_v42  ;;  %v1944_v15 = vadd.f32 %v1928_v24, %v5510_v54 }
 0x204   :  { %v4052_v52 = vpop.eup %4051  ;;  %v1913_v38 = vmul.f32 %v1897_v61, %v5524_v20  ;;  %v5538_v26 = vadd.f32 %v1866_v44, %v1830_v31  ;;  %v3867_v17 = vpop.f32.mrf.mxu0  ;;  %v2003_v8 = vmul.f32 0.5, %v1987_v47  ;;  %v1644_v59 = vadd.f32 %v3804_v50, %v1547_v6 }
 0x205   :  { %v3931_v3 = vpop.f32.mrf.mxu1  ;;  %v1835_v22 = vadd.f32 %v3929_v27, %v1738_v30  ;;  %v3868_v19 = vadd.f32 %v3867_v17, %v3866_v11  ;;  %2500 = vmatmul.mubr.bf16.vlgmr.msra.gmra.mxu0 %v5534_v10  ;;  %2613 = vmatmul.mubr.bf16.vlgmr.msra.gmra.mxu1 %v5534_v10  ;;  %v1988_v49 = vadd.f32 1.0, %v4052_v52  ;;  %v5545_v40 = vadd.f32 %v3810_v58, %v1555_v28 }
 0x206   :  { %v1960_v14 = vmul.f32 0.7978846, %v1944_v15  ;;  %v1929_v60 = vmul.f32 0.044715, %v1913_v38  ;;  %v1898_v62 = vmul.f32 %v5538_v26, %v5538_v26  ;;  %v6406_v42 = vcombine.low %v5201_v5, %v5203_v23  ;;  %v3869_v6 = vpop.f32.mrf.mxu0  ;;  %2509 = vmatprep.mubr.bf16.mxu0 %v6396_v45  ;;  %2622 = vmatprep.mubr.bf16.mxu1 %v6396_v45  ;;  %v1868_v23 = vld [vmem:[%s6277_s3 + $0x58] sm:$0xff] }
 0x207   :  { %v6407_v50 = vcombine.low %v5205_v4, %v5215_v1  ;;  %v3933_v48 = vpop.f32.mrf.mxu1  ;;  %v5555_v36 = vadd.f32 %v1867_v29, %v1835_v22  ;;  %v1741_v44 = vadd.f32 %v3868_v19, %v1644_v59  ;;  %v3932_v58 = vadd.f32 %v3931_v3, %v3930_v39 }
 0x208   :  { %2694 = vmatpush1.bf16.msra.mxu0 %v6406_v42  ;;  %v2004_v28 = vmul.f32 0.5, %v1988_v49  ;;  %4059 = vtanh.f32 %v1960_v14  ;;  %v1945_v43 = vadd.f32 %v1929_v60, %v5524_v20  ;;  %v1914_v5 = vmul.f32 %v1898_v62, %v5538_v26  ;;  %v3870_v4 = vpop.f32.mrf.mxu0 }
 0x209   :  { %2807 = vmatpush1.bf16.msra.mxu1 %v6407_v50  ;;  %v3934_v1 = vpop.f32.mrf.mxu1  ;;  %v6408_v24 = vcombine.high %v5353_v63, %v5355_v33  ;;  %v6409_v61 = vcombine.high %v5366_v13, %v5368_v9  ;;  %v2019_v31 = vmul.f32 %v2003_v8, %v5377_v53  ;;  %v4054_v11 = vpop.eup %4053  ;;  %v1899_v39 = vmul.f32 %v5555_v36, %v5555_v36 }
 0x20a   :  { %v1838_v47 = vadd.f32 %v3932_v58, %v1741_v44  ;;  %v3871_v30 = vadd.f32 %v3870_v4, %v3869_v6  ;;  %v3935_v27 = vadd.f32 %v3934_v1, %v3933_v48  ;;  %v1961_v52 = vmul.f32 0.7978846, %v1945_v43  ;;  %v3872_v38 = vpop.f32.mrf.mxu0 }
 0x20b   :  { %2695 = vmatprep.subr.bf16.mxu0 %v6408_v24  ;;  %2808 = vmatprep.subr.bf16.mxu1 %v6409_v61  ;;  %v1930_v15 = vmul.f32 0.044715, %v1914_v5  ;;  %v3936_v29 = vpop.f32.mrf.mxu1  ;;  %v2020_v17 = vmul.f32 %v2004_v28, %v5410_v25  ;;  %v6410_v3 = vcombine.low %v5353_v63, %v5355_v33  ;;  %v6411_v53 = vcombine.low %v5366_v13, %v5368_v9  ;;  %v1869_v9 = vld [vmem:[%s6277_s3 + $0x60] sm:$0xff]  ;;  %v6414_v61 = vld [vmem:[#allocation28_spill] sm:$0xff] }
 0x20c   :  { %v1989_v8 = vadd.f32 1.0, %v4054_v11  ;;  %v1915_v59 = vmul.f32 %v1899_v39, %v5555_v36  ;;  %v5581_v22 = vadd.f32 %v1868_v23, %v1838_v47  ;;  %v1746_v19 = vadd.f32 %v3871_v30, %v5272_v55  ;;  %v4056_v63 = vpop.eup %4055  ;;  %v3873_v55 = vpop.f32.mrf.mxu0  ;;  %v1870_v11 = vld [vmem:[%s6277_s3 + $0x68] sm:$0xff] }
 0x20d   :  { %2696 = vmatpush1.bf16.msra.mxu0 %v6410_v3  ;;  %2809 = vmatpush1.bf16.msra.mxu1 %v6411_v53  ;;  %v6412_v49 = vcombine.high %v5379_v32, %v5381_v37  ;;  %v6413_v25 = vcombine.high %v5395_v57, %v5397_v41  ;;  %v3752_v33 = vadd.f32 %v5295_v46, %v5290_v16  ;;  %4061 = vtanh.f32 %v1961_v52  ;;  %v3937_v14 = vpop.f32.mrf.mxu1 }
 0x20e   :  { %v1946_v13 = vadd.f32 %v1930_v15, %v5538_v26  ;;  %v5596_v60 = vpack.c.bf16 %v2020_v17, %v2019_v31  ;;  %v1931_v62 = vmul.f32 0.044715, %v1915_v59  ;;  %v1900_v42 = vmul.f32 %v5581_v22, %v5581_v22  ;;  %v3875_v16 = vpop.f32.mrf.mxu0  ;;  %v6420_v59 = vld [vmem:[#allocation17_spill] sm:$0xff] }
 0x20f   :  { %2697 = vmatprep.subr.bf16.mxu0 %v6412_v49  ;;  %2810 = vmatprep.subr.bf16.mxu1 %v6413_v25  ;;  %v1843_v50 = vadd.f32 %v3935_v27, %v1746_v19  ;;  %v3874_v6 = vadd.f32 %v3873_v55, %v3872_v38  ;;  %v3938_v44 = vadd.f32 %v3937_v14, %v3936_v29  ;;  %v3939_v46 = vpop.f32.mrf.mxu1  ;;  %v1990_v58 = vadd.f32 1.0, %v4056_v63  ;;  %v6417_v38 = vld [vmem:[#allocation15_spill] sm:$0xff]  ;;  %v6418_v29 = vld [vmem:[#allocation18_spill] sm:$0xff]  ;;  %v6421_v19 = vld [vmem:[#allocation24_spill] sm:$0xff] }
 0x210   :  { %v1962_v48 = vmul.f32 0.7978846, %v1946_v13  ;;  %2510 = vmatmul.mubr.bf16.gmra.mxu0 %v5596_v60  ;;  %2623 = vmatmul.mubr.bf16.gmra.mxu1 %v5596_v60  ;;  %v2005_v28 = vmul.f32 0.5, %v1989_v8  ;;  %v1947_v43 = vadd.f32 %v1931_v62, %v5555_v36  ;;  %v1916_v5 = vmul.f32 %v1900_v42, %v5581_v22  ;;  %v4058_v1 = vpop.eup %4057  ;;  %v3876_v39 = vpop.f32.mrf.mxu0  ;;  %v6423_v13 = vld [vmem:[#allocation16_spill] sm:$0xff] }
 0x211   :  { %v5604_v23 = vadd.f32 %v1869_v9, %v1843_v50  ;;  %v1749_v4 = vadd.f32 %v3874_v6, %v5545_v40  ;;  %2519 = vmatprep.mubr.bf16.mxu0 %v6396_v45  ;;  %v1563_v24 = vadd.f32 %v3752_v33, %v5177_v0  ;;  %v3816_v31 = vadd.f32 %v6414_v61, %v5292_v56  ;;  %v3940_v47 = vpop.f32.mrf.mxu1  ;;  %v2051_v61 = vld [vmem:[#allocation8 + $0x50] sm:$0xff] }
 0x212   :  { %4063 = vtanh.f32 %v1962_v48  ;;  %2632 = vmatprep.mubr.bf16.mxu1 %v6396_v45  ;;  %v2006_v30 = vmul.f32 0.5, %v1990_v58  ;;  %v6415_v40 = vcombine.low %v5379_v32, %v5381_v37  ;;  %v1963_v27 = vmul.f32 0.7978846, %v1947_v43  ;;  %v3878_v53 = vpop.f32.mrf.mxu0  ;;  %v6426_v58 = vld [vmem:[#allocation21_spill] sm:$0xff] }
 0x213   :  { %v1932_v52 = vmul.f32 0.044715, %v1916_v5  ;;  %v1901_v0 = vmul.f32 %v5604_v23, %v5604_v23  ;;  %v1846_v56 = vadd.f32 %v3938_v44, %v1749_v4  ;;  %v6416_v15 = vcombine.low %v5395_v57, %v5397_v41  ;;  %v3942_v8 = vpop.f32.mrf.mxu1  ;;  %v1871_v44 = vld [vmem:[%s6277_s3 + $0x70] sm:$0xff] }
 0x214   :  { %2698 = vmatpush1.bf16.msra.mxu0 %v6415_v40  ;;  %v6419_v17 = vcombine.high %v6417_v38, %v6418_v29  ;;  %v3877_v3 = vadd.f32 %v3876_v39, %v3875_v16  ;;  %v2021_v32 = vmul.f32 %v2005_v28, %v5440_v35  ;;  %v2022_v37 = vmul.f32 %v2006_v30, %v5462_v18  ;;  %v3879_v14 = vpop.f32.mrf.mxu0  ;;  %v6427_v28 = vld [vmem:[#allocation20_spill] sm:$0xff]  ;;  %v1872_v40 = vld [vmem:[%s6277_s3 + $0x78] sm:$0xff] }
 0x215   :  { %2811 = vmatpush1.bf16.msra.mxu1 %v6416_v15  ;;  %v6422_v49 = vcombine.high %v6420_v59, %v6421_v19  ;;  %v1991_v25 = vadd.f32 1.0, %v4058_v1  ;;  %4065 = vtanh.f32 %v1963_v27  ;;  %v1948_v57 = vadd.f32 %v1932_v52, %v5581_v22  ;;  %v3943_v35 = vpop.f32.mrf.mxu1  ;;  %v4060_v42 = vpop.eup %4059 }
 0x216   :  { %2699 = vmatprep.subr.bf16.mxu0 %v6419_v17  ;;  %v1917_v41 = vmul.f32 %v1901_v0, %v5604_v23  ;;  %v5633_v63 = vadd.f32 %v1870_v11, %v1846_v56  ;;  %v1660_v33 = vadd.f32 %v3816_v31, %v1563_v24  ;;  %v1754_v9 = vadd.f32 %v3877_v3, %v6423_v13  ;;  %v2055_v31 = vld [vmem:[#allocation8 + $0x70] sm:$0xff]  ;;  %v6431_v56 = vld [vmem:[#allocation19_spill] sm:$0xff] }
 0x217   :  { %2812 = vmatprep.subr.bf16.mxu1 %v6422_v49  ;;  %v3941_v55 = vadd.f32 %v3940_v47, %v3939_v46  ;;  %v5636_v62 = vpack.c.bf16 %v2022_v37, %v2021_v32  ;;  %v6424_v18 = vcombine.low %v6417_v38, %v6418_v29  ;;  %v1964_v50 = vmul.f32 0.7978846, %v1948_v57 }
 0x218   :  { %v1933_v6 = vmul.f32 0.044715, %v1917_v41  ;;  %v1902_v48 = vmul.f32 %v5633_v63, %v5633_v63  ;;  %v3880_v16 = vadd.f32 %v3879_v14, %v3878_v53  ;;  %v6425_v46 = vcombine.low %v6420_v59, %v6421_v19  ;;  %v2052_v59 = vld [vmem:[#allocation8 + $0x58] sm:$0xff] }
 0x219   :  { %2700 = vmatpush1.bf16.msra.mxu0 %v6424_v18  ;;  %v6428_v43 = vcombine.high %v6426_v58, %v6427_v28  ;;  %v1851_v5 = vadd.f32 %v3941_v55, %v1754_v9  ;;  %v3944_v4 = vadd.f32 %v3943_v35, %v3942_v8  ;;  %2633 = vmatmul.mubr.bf16.gmra.mxu1 %v5636_v62  ;;  %v1992_v1 = vadd.f32 1.0, %v4060_v42  ;;  %v2056_v19 = vld [vmem:[#allocation8 + $0x78] sm:$0xff] }
 0x21a   :  { %2813 = vmatpush1.bf16.msra.mxu1 %v6425_v46  ;;  %2520 = vmatmul.mubr.bf16.gmra.mxu0 %v5636_v62  ;;  %v2007_v24 = vmul.f32 0.5, %v1991_v25  ;;  %4067 = vtanh.f32 %v1964_v50  ;;  %v1949_v11 = vadd.f32 %v1933_v6, %v5604_v23  ;;  %v1918_v39 = vmul.f32 %v1902_v48, %v5633_v63  ;;  %v4062_v29 = vpop.eup %4061  ;;  %v2044_v9 = vld [vmem:[#allocation8 + $0x18] sm:$0xff] }
 0x21b   :  { %2701 = vmatprep.subr.bf16.mxu0 %v6428_v43  ;;  %v1757_v47 = vadd.f32 %v3880_v16, %v1660_v33  ;;  %2529 = vmatprep.mubr.bf16.mxu0 %v6396_v45  ;;  %v5658_v30 = vadd.f32 %v1871_v44, %v1851_v5  ;;  %v2008_v27 = vmul.f32 0.5, %v1992_v1  ;;  %v6429_v52 = vcombine.high %v5451_v7, %v5453_v2  ;;  %v2048_v55 = vld [vmem:[#allocation8 + $0x38] sm:$0xff] }
 0x21c   :  { %2642 = vmatprep.mubr.bf16.mxu1 %v6396_v45  ;;  %v6430_v0 = vcombine.low %v6426_v58, %v6427_v28  ;;  %v3645_v15 = vcombine.low %v6431_v56, %v5467_v21  ;;  %v3647_v38 = vcombine.low %v5481_v12, %v5483_v34  ;;  %v1965_v17 = vmul.f32 0.7978846, %v1949_v11 }
 0x21d   :  { %2814 = vmatprep.subr.bf16.mxu1 %v6429_v52  ;;  %v1934_v3 = vmul.f32 0.044715, %v1918_v39  ;;  %v1854_v53 = vadd.f32 %v3944_v4, %v1757_v47  ;;  %v6432_v8 = vcombine.low %v5451_v7, %v5453_v2  ;;  %v6433_v32 = vcombine.high %v6431_v56, %v5467_v21  ;;  %v2043_v2 = vld [vmem:[#allocation8 + $0x10] sm:$0xff] }
 0x21e   :  { %2702 = vmatpush1.bf16.msra.mxu0 %v6430_v0  ;;  %v3638_v37 = vcombine.high %v2051_v61, %v2055_v31  ;;  %v1903_v49 = vmul.f32 %v5658_v30, %v5658_v30  ;;  %v2023_v25 = vmul.f32 %v2007_v24, %v5489_v51  ;;  %v2024_v57 = vmul.f32 %v2008_v27, %v5510_v54  ;;  %v2047_v7 = vld [vmem:[#allocation8 + $0x30] sm:$0xff] }
 0x21f   :  { %2815 = vmatpush1.bf16.msra.mxu1 %v6432_v8  ;;  %2703 = vmatprep.subr.bf16.mxu0 %v6433_v32  ;;  %v1993_v41 = vadd.f32 1.0, %v4062_v29  ;;  %v6434_v33 = vcombine.high %v5481_v12, %v5483_v34  ;;  %4069 = vtanh.f32 %v1965_v17  ;;  %v1950_v21 = vadd.f32 %v1934_v3, %v5633_v63  ;;  %v4064_v18 = vpop.eup %4063 }
 0x220   :  { %v5687_v13 = vadd.f32 %v1872_v40, %v1854_v53  ;;  %v1919_v14 = vmul.f32 %v1903_v49, %v5658_v30  ;;  %v5690_v35 = vpack.c.bf16 %v2024_v57, %v2023_v25  ;;  %v3637_v51 = vcombine.low %v2051_v61, %v2055_v31 }
 0x221   :  { %2816 = vmatprep.subr.bf16.mxu1 %v6434_v33  ;;  %v3640_v54 = vcombine.high %v2052_v59, %v2056_v19  ;;  %v1966_v42 = vmul.f32 0.7978846, %v1950_v21  ;;  %v3639_v12 = vcombine.low %v2052_v59, %v2056_v19  ;;  %v3630_v50 = vcombine.high %v2043_v2, %v2047_v7 }
 0x222   :  { %2704 = vmatpush1.bf16.msra.mxu0 %v3645_v15  ;;  %v1904_v34 = vmul.f32 %v5687_v13, %v5687_v13  ;;  %v1935_v6 = vmul.f32 0.044715, %v1919_v14  ;;  %2643 = vmatmul.mubr.bf16.gmra.mxu1 %v5690_v35  ;;  %v1994_v48 = vadd.f32 1.0, %v4064_v18  ;;  %v2009_v44 = vmul.f32 0.5, %v1993_v41  ;;  %v4066_v58 = vpop.eup %4065 }
 0x223   :  { %2817 = vmatpush1.bf16.msra.mxu1 %v3647_v38  ;;  %2705 = vmatprep.subr.bf16.mxu0 %v3638_v37  ;;  %v3632_v16 = vcombine.high %v2044_v9, %v2048_v55  ;;  %4071 = vtanh.f32 %v1966_v42  ;;  %v3629_v5 = vcombine.low %v2043_v2, %v2047_v7  ;;  %v1995_v1 = vadd.f32 1.0, %v4066_v58 }
 0x224   :  { %2530 = vmatmul.mubr.bf16.gmra.mxu0 %v5690_v35  ;;  %v1920_v46 = vmul.f32 %v1904_v34, %v5687_v13  ;;  %2652 = vmatprep.mubr.bf16.mxu1 %v6396_v45  ;;  %v1951_v28 = vadd.f32 %v1935_v6, %v5658_v30  ;;  %v2010_v43 = vmul.f32 0.5, %v1994_v48  ;;  %v3631_v24 = vcombine.low %v2044_v9, %v2048_v55  ;;  %v4094_v48 = vld [vmem:[#allocation5 + $0x10] sm:$0xff] }
 0x225   :  { %2539 = vmatprep.mubr.bf16.mxu0 %v6396_v45  ;;  %2818 = vmatprep.subr.bf16.mxu1 %v3640_v54  ;;  %v2025_v31 = vmul.f32 %v2009_v44, %v5524_v20  ;;  %v2011_v0 = vmul.f32 0.5, %v1995_v1  ;;  %v5752_v54 = vpop.permute.xlu1 %3048 }
 0x226   :  { %2706 = vmatpush1.bf16.msra.mxu0 %v3637_v51  ;;  %v1936_v4 = vmul.f32 0.044715, %v1920_v46  ;;  %v1967_v61 = vmul.f32 0.7978846, %v1951_v28  ;;  %v2026_v11 = vmul.f32 %v2010_v43, %v5538_v26 }
 0x227   :  { %2819 = vmatpush1.bf16.msra.mxu1 %v3639_v12  ;;  %2707 = vmatprep.subr.bf16.mxu0 %v3630_v50  ;;  %v4068_v47 = vpop.eup %4067  ;;  %v2027_v56 = vmul.f32 %v2011_v0, %v5555_v36  ;;  %v4093_v50 = vld [vmem:[#allocation5] sm:$0xff] }
 0x228   :  { %2820 = vmatprep.subr.bf16.mxu1 %v3632_v16  ;;  %v1952_v39 = vadd.f32 %v1936_v4, %v5687_v13  ;;  %4073 = vtanh.f32 %v1967_v61  ;;  %v2037_v40 = vpack.c.bf16 %v2026_v11, %v2025_v31  ;;  %v1996_v52 = vadd.f32 1.0, %v4068_v47  ;;  %v4095_v4 = vld [vmem:[#allocation5 + $0x8] sm:$0xff] }
 0x22a   :  { %2708 = vmatpush1.bf16.msra.mxu0 %v3629_v5  ;;  %v1968_v27 = vmul.f32 0.7978846, %v1952_v39  ;;  %2653 = vmatmul.mubr.bf16.gmra.mxu1 %v2037_v40  ;;  %v2012_v20 = vmul.f32 0.5, %v1996_v52 }
 0x22b   :  { %2821 = vmatpush1.bf16.msra.mxu1 %v3631_v24  ;;  %2662 = vmatprep.mubr.bf16.mxu1 %v6396_v45  ;;  %v4096_v24 = vld [vmem:[#allocation5 + $0x18] sm:$0xff] }
 0x22c   :  { %2540 = vmatmul.mubr.bf16.gmra.mxu0 %v2037_v40  ;;  %4075 = vtanh.f32 %v1968_v27  ;;  %v4070_v26 = vpop.eup %4069  ;;  %v2028_v15 = vmul.f32 %v2012_v20, %v5581_v22  ;;  %v5762_v20 = vpop.permute.xlu0 %3052 }
 0x22d   :  { %2549 = vmatprep.mubr.bf16.mxu0 %v6396_v45  ;;  %v1997_v38 = vadd.f32 1.0, %v4070_v26 }
 0x22e   :  { %v2038_v29 = vpack.c.bf16 %v2028_v15, %v2027_v56  ;;  %v4097_v15 = vld [vmem:[#allocation5 + $0x40] sm:$0xff] }
 0x22f   :  { %v2013_v53 = vmul.f32 0.5, %v1997_v38 }
 0x230   :  { %v4072_v17 = vpop.eup %4071 }
 0x231   :  { %v1998_v3 = vadd.f32 1.0, %v4072_v17  ;;  %v2029_v37 = vmul.f32 %v2013_v53, %v5604_v23 }
 0x232   :  { %2663 = vmatmul.mubr.bf16.gmra.mxu1 %v2038_v29 }
 0x233   :  { %2672 = vmatprep.mubr.bf16.mxu1 %v6396_v45  ;;  %v2014_v8 = vmul.f32 0.5, %v1998_v3 }
 0x234   :  { %2550 = vmatmul.mubr.bf16.gmra.mxu0 %v2038_v29 }
 0x235   :  { %2559 = vmatprep.mubr.bf16.mxu0 %v6396_v45  ;;  %v4074_v32 = vpop.eup %4073  ;;  %v2030_v59 = vmul.f32 %v2014_v8, %v5633_v63 }
 0x236   :  { %v1999_v36 = vadd.f32 1.0, %v4074_v32 }
 0x237   :  { %v2039_v19 = vpack.c.bf16 %v2030_v59, %v2029_v37 }
 0x238   :  { %v2015_v25 = vmul.f32 0.5, %v1999_v36 }
 0x239   :  { %v4076_v22 = vpop.eup %4075 }
 0x23a   :  { %v2000_v49 = vadd.f32 1.0, %v4076_v22  ;;  %2673 = vmatmul.mubr.bf16.gmra.mxu1 %v2039_v19  ;;  %v2031_v41 = vmul.f32 %v2015_v25, %v5658_v30  ;;  %v4099_v22 = vld [vmem:[#allocation5 + $0x48] sm:$0xff]  ;;  %v4100_v25 = vld [vmem:[#allocation5 + $0x58] sm:$0xff] }
 0x23b   :  { %2682 = vmatprep.mubr.bf16.mxu1 %v6396_v45 }
 0x23c   :  { %2560 = vmatmul.mubr.bf16.gmra.mxu0 %v2039_v19  ;;  %v2016_v57 = vmul.f32 0.5, %v2000_v49 }
 0x23d   :  { %2569 = vmatprep.mubr.bf16.mxu0 %v6396_v45 }
 0x23e   :  { %v2032_v33 = vmul.f32 %v2016_v57, %v5687_v13 }
 0x240   :  { %v2040_v2 = vpack.c.bf16 %v2032_v33, %v2031_v41 }
 0x242   :  { %2683 = vmatmul.mubr.bf16.gmra.mxu1 %v2040_v2 }
 0x243   :  { %2838 = vmatprep.mubr.bf16.mxu1 %v6396_v45 }
 0x244   :  { %2570 = vmatmul.mubr.bf16.gmra.mxu0 %v2040_v2 }
 0x245   :  { %2725 = vmatprep.mubr.bf16.mxu0 %v6396_v45 }
 0x24a   :  { %2839 = vmatmul.mubr.bf16.vlgmr.msra.gmra.mxu1 %v5534_v10 }
 0x24b   :  { %2848 = vmatprep.mubr.bf16.mxu1 %v6396_v45 }
 0x24c   :  { %2726 = vmatmul.mubr.bf16.vlgmr.msra.gmra.mxu0 %v5534_v10  ;;  %v2107_v10 = vlaneseq }
 0x24d   :  { %2735 = vmatprep.mubr.bf16.mxu0 %v6396_v45 }
 0x252   :  { %2849 = vmatmul.mubr.bf16.gmra.mxu1 %v5596_v60 }
 0x253   :  { %2858 = vmatprep.mubr.bf16.mxu1 %v6396_v45 }
 0x254   :  { %2736 = vmatmul.mubr.bf16.gmra.mxu0 %v5596_v60  ;;  %v2108_v60 = vshrl.u32 %v2107_v10, 7 }
 0x255   :  { %2745 = vmatprep.mubr.bf16.mxu0 %v6396_v45 }
 0x256   :  { %v2109_v23 = vsub.s32 0, %v2108_v60  ;;  %v2117_v63 = vsub.s32 2, %v2108_v60  ;;  %v2113_v30 = vsub.s32 1, %v2108_v60  ;;  %v2121_v7 = vsub.s32 3, %v2108_v60 }
 0x257   :  { %v2125_v34 = vsub.s32 4, %v2108_v60  ;;  %v2133_v12 = vsub.s32 6, %v2108_v60  ;;  %v2129_v43 = vsub.s32 5, %v2108_v60  ;;  %v2137_v5 = vsub.s32 7, %v2108_v60 }
 0x25a   :  { %2859 = vmatmul.mubr.bf16.gmra.mxu1 %v5636_v62 }
 0x25b   :  { %2868 = vmatprep.mubr.bf16.mxu1 %v6396_v45 }
 0x25c   :  { %2746 = vmatmul.mubr.bf16.gmra.mxu0 %v5636_v62  ;;  %v2105_v62 = vld [vmem:[%s6281_s7] sm:$0xff]  ;;  %s4341_s7 = smov [#allocation10]  }
 0x25d   :  { %2755 = vmatprep.mubr.bf16.mxu0 %v6396_v45  ;;  %v5742_v21 = vrot.slane %v2105_v62, %v2109_v23  ;;  %v5744_v13 = vrot.slane %v2105_v62, %v2117_v63  ;;  %v5746_v9 = vrot.slane %v2105_v62, %v2113_v30  ;;  %v5748_v55 = vrot.slane %v2105_v62, %v2121_v7  ;;  %s3549_s21 = sshll.u32 %s4341_s7, 4  ;;  %s3550_s21 = int_to_ptr.vmem [resolvable:$true] %s3549_s21 }
 0x25e   :  { %v5764_v26 = vrot.slane %v2105_v62, %v2125_v34  ;;  %v5766_v56 = vrot.slane %v2105_v62, %v2133_v12  ;;  %v5770_v36 = vrot.slane %v2105_v62, %v2129_v43  ;;  %s4301_s1 = scalar_lea.vmem %s3550_s21, 1024  ;;  %p4306_p7 = scmp.lt.s32.totalorder %s3550_s21, %s3550_s21 }
 0x25f   :  { %p4302_p6 = scmp.ne.s32.totalorder %s3550_s21, %s4301_s1  ;;  %p4307_p8 = scmp.lt.s32.totalorder %s4301_s1, %s4301_s1 }
 0x261   :  { %p4308_p9 = por %p4307_p8, %p4306_p7 }
 0x262   :  { %2869 = vmatmul.mubr.bf16.gmra.mxu1 %v5690_v35 }
 0x263   :  { %2878 = vmatprep.mubr.bf16.mxu1 %v6396_v45  ;;  %p4309_p10 = pnand %p4308_p9, %p4302_p6 }
 0x264   :  { %2756 = vmatmul.mubr.bf16.gmra.mxu0 %v5690_v35 }
 0x265   :  { %2765 = vmatprep.mubr.bf16.mxu0 %v6396_v45 }
 0x26a   :  { %2879 = vmatmul.mubr.bf16.gmra.mxu1 %v2037_v40 }
 0x26b   :  { %2888 = vmatprep.mubr.bf16.mxu1 %v6396_v45 }
 0x26c   :  { %2766 = vmatmul.mubr.bf16.gmra.mxu0 %v2037_v40 }
 0x26d   :  { %2775 = vmatprep.mubr.bf16.mxu0 %v6396_v45 }
 0x272   :  { %2889 = vmatmul.mubr.bf16.gmra.mxu1 %v2038_v29 }
 0x273   :  { %2898 = vmatprep.mubr.bf16.mxu1 %v6396_v45 }
 0x274   :  { %2776 = vmatmul.mubr.bf16.gmra.mxu0 %v2038_v29  ;;  %v4098_v29 = vld [vmem:[#allocation5 + $0x50] sm:$0xff] }
 0x275   :  { %2785 = vmatprep.mubr.bf16.mxu0 %v6396_v45 }
 0x27a   :  { %2899 = vmatmul.mubr.bf16.gmra.mxu1 %v2039_v19 }
 0x27b   :  { %2908 = vmatprep.mubr.bf16.mxu1 %v6396_v45 }
 0x27c   :  { %2786 = vmatmul.mubr.bf16.gmra.mxu0 %v2039_v19  ;;  %v5772_v19 = vrot.slane %v2105_v62, %v2137_v5  ;;  %v4104_v5 = vld [vmem:[#allocation5 + $0x98] sm:$0xff] }
 0x27d   :  { %2795 = vmatprep.mubr.bf16.mxu0 %v6396_v45 }
 0x282   :  { %2909 = vmatmul.mubr.bf16.gmra.mxu1 %v2040_v2 }
 0x284   :  { %2796 = vmatmul.mubr.bf16.gmra.mxu0 %v2040_v2  ;;  %v5776_v2 = vpop.permute.xlu1 %3056 }
 0x2c5   :  { %v2501_v45 = vpop.f32.mrf.mxu0  ;;  %v2614_v14 = vpop.f32.mrf.mxu1 }
 0x2c6   :  { %v2502_v35 = vadd.f32 %v2501_v45, %v5742_v21  ;;  %v2615_v51 = vadd.f32 %v2614_v14, %v5744_v13 }
 0x2c7   :  { %v2503_v18 = vpop.f32.mrf.mxu0  ;;  %v2616_v42 = vpop.f32.mrf.mxu1 }
 0x2c8   :  { %v2919_v6 = vsub.f32 %v4093_v50, %v2502_v35  ;;  %v2921_v44 = vsub.f32 %v4094_v48, %v2615_v51  ;;  %v2504_v16 = vadd.f32 %v2503_v18, %v5746_v9  ;;  %v2617_v46 = vadd.f32 %v2616_v42, %v5748_v55  ;;  %v4101_v51 = vld [vmem:[#allocation5 + $0x80] sm:$0xff]  ;;  %v4102_v42 = vld [vmem:[#allocation5 + $0x90] sm:$0xff] }
 0x2c9   :  { %v2505_v58 = vpop.f32.mrf.mxu0  ;;  %v2618_v28 = vpop.f32.mrf.mxu1 }
 0x2ca   :  { %v2920_v1 = vsub.f32 %v4095_v4, %v2504_v16  ;;  %v2922_v61 = vsub.f32 %v4096_v24, %v2617_v46  ;;  %v3111_v31 = vmul.f32 %v5752_v54, %v2919_v6  ;;  %v3113_v11 = vmul.f32 %v5752_v54, %v2921_v44 }
 0x2cb   :  { %v2506_v39 = vadd.f32 %v2505_v58, %v5742_v21  ;;  %v2619_v47 = vadd.f32 %v2618_v28, %v5744_v13  ;;  %v2507_v40 = vpop.f32.mrf.mxu0  ;;  %v2620_v27 = vpop.f32.mrf.mxu1  ;;  %v4103_v28 = vld [vmem:[#allocation5 + $0x88] sm:$0xff] }
 0x2cc   :  { %v3112_v52 = vmul.f32 %v5752_v54, %v2920_v1  ;;  %v3114_v0 = vmul.f32 %v5752_v54, %v2922_v61  ;;  %v2508_v3 = vadd.f32 %v2507_v40, %v5746_v9  ;;  %v2621_v53 = vadd.f32 %v2620_v27, %v5748_v55  ;;  %v5788_v27 = vpop.permute.xlu1 %3060 }
 0x2cd   :  { %v2927_v38 = vsub.f32 %v4097_v15, %v2506_v39  ;;  %v2929_v17 = vsub.f32 %v4098_v29, %v2619_v47  ;;  %v3239_v8 = vmul.f32 %v3111_v31, %v3111_v31  ;;  %v3241_v32 = vmul.f32 %v3113_v11, %v3113_v11 }
 0x2ce   :  { %v2928_v49 = vsub.f32 %v4099_v22, %v2508_v3  ;;  %v2930_v57 = vsub.f32 %v4100_v25, %v2621_v53  ;;  %v3240_v10 = vmul.f32 %v3112_v52, %v3112_v52  ;;  %v3242_v60 = vmul.f32 %v3114_v0, %v3114_v0  ;;  %v4105_v3 = vld [vmem:[#allocation5 + $0xc0] sm:$0xff] }
 0x2cf   :  { %v3119_v41 = vmul.f32 %v5762_v20, %v2927_v38  ;;  %v3121_v33 = vmul.f32 %v5762_v20, %v2929_v17 }
 0x2d0   :  { %v2511_v37 = vpop.f32.mrf.mxu0  ;;  %v2624_v59 = vpop.f32.mrf.mxu1  ;;  %v3120_v62 = vmul.f32 %v5762_v20, %v2928_v49  ;;  %v3122_v45 = vmul.f32 %v5762_v20, %v2930_v57 }
 0x2d1   :  { %v2512_v23 = vadd.f32 %v2511_v37, %v5742_v21  ;;  %v2625_v63 = vadd.f32 %v2624_v59, %v5744_v13  ;;  %v3247_v14 = vmul.f32 %v3119_v41, %v3119_v41  ;;  %v3249_v35 = vmul.f32 %v3121_v33, %v3121_v33 }
 0x2d2   :  { %v2513_v30 = vpop.f32.mrf.mxu0  ;;  %v2626_v7 = vpop.f32.mrf.mxu1  ;;  %v3248_v44 = vmul.f32 %v3120_v62, %v3120_v62  ;;  %v3250_v16 = vmul.f32 %v3122_v45, %v3122_v45 }
 0x2d3   :  { %v2935_v18 = vsub.f32 %v4101_v51, %v2512_v23  ;;  %v2937_v34 = vsub.f32 %v4102_v42, %v2625_v63  ;;  %v2514_v12 = vadd.f32 %v2513_v30, %v5746_v9  ;;  %v2627_v50 = vadd.f32 %v2626_v7, %v5748_v55  ;;  %v4108_v23 = vld [vmem:[#allocation5 + $0xd8] sm:$0xff] }
 0x2d4   :  { %v2515_v6 = vpop.f32.mrf.mxu0  ;;  %v2628_v48 = vpop.f32.mrf.mxu1  ;;  %v3367_v46 = vadd.f32 %v3247_v14, %v3239_v8  ;;  %v3409_v58 = vadd.f32 %v3249_v35, %v3241_v32  ;;  %v3388_v11 = vadd.f32 %v3248_v44, %v3240_v10  ;;  %v3430_v39 = vadd.f32 %v3250_v16, %v3242_v60  ;;  %v4106_v8 = vld [vmem:[#allocation5 + $0xd0] sm:$0xff]  ;;  %v4107_v10 = vld [vmem:[#allocation5 + $0xc8] sm:$0xff] }
 0x2d5   :  { %v2936_v43 = vsub.f32 %v4103_v28, %v2514_v12  ;;  %v2938_v4 = vsub.f32 %v4104_v5, %v2627_v50  ;;  %v3127_v1 = vmul.f32 %v5776_v2, %v2935_v18  ;;  %v3129_v24 = vmul.f32 %v5776_v2, %v2937_v34  ;;  %v4110_v16 = vld [vmem:[#allocation5 + $0x110] sm:$0xff] }
 0x2d6   :  { %v2517_v61 = vpop.f32.mrf.mxu0  ;;  %v2630_v31 = vpop.f32.mrf.mxu1  ;;  %v2516_v47 = vadd.f32 %v2515_v6, %v5742_v21  ;;  %v2629_v40 = vadd.f32 %v2628_v48, %v5744_v13  ;;  %v4109_v48 = vld [vmem:[#allocation5 + $0x100] sm:$0xff] }
 0x2d7   :  { %v3128_v52 = vmul.f32 %v5776_v2, %v2936_v43  ;;  %v3130_v0 = vmul.f32 %v5776_v2, %v2938_v4  ;;  %v3255_v15 = vmul.f32 %v3127_v1, %v3127_v1  ;;  %v3257_v38 = vmul.f32 %v3129_v24, %v3129_v24  ;;  %v5800_v6 = vpop.permute.xlu0 %3064 }
 0x2d8   :  { %v2943_v53 = vsub.f32 %v4105_v3, %v2516_v47  ;;  %v2945_v32 = vsub.f32 %v4106_v8, %v2629_v40  ;;  %v2518_v37 = vadd.f32 %v2517_v61, %v5746_v9  ;;  %v2631_v59 = vadd.f32 %v2630_v31, %v5748_v55  ;;  %v4111_v31 = vld [vmem:[#allocation5 + $0x108] sm:$0xff] }
 0x2d9   :  { %v2634_v17 = vpop.f32.mrf.mxu1  ;;  %v3256_v22 = vmul.f32 %v3128_v52, %v3128_v52  ;;  %v3258_v49 = vmul.f32 %v3130_v0, %v3130_v0  ;;  %v3368_v25 = vadd.f32 %v3367_v46, %v3255_v15  ;;  %v3410_v57 = vadd.f32 %v3409_v58, %v3257_v38 }
 0x2da   :  { %v2521_v29 = vpop.f32.mrf.mxu0  ;;  %v2944_v60 = vsub.f32 %v4107_v10, %v2518_v37  ;;  %v2946_v63 = vsub.f32 %v4108_v23, %v2631_v59  ;;  %v3135_v30 = vmul.f32 %v5788_v27, %v2943_v53  ;;  %v3137_v7 = vmul.f32 %v5788_v27, %v2945_v32  ;;  %v5808_v53 = vpop.permute.xlu1 %3068 }
 0x2db   :  { %v2636_v33 = vpop.f32.mrf.mxu1  ;;  %v3389_v62 = vadd.f32 %v3388_v11, %v3256_v22  ;;  %v3431_v45 = vadd.f32 %v3430_v39, %v3258_v49  ;;  %v2522_v14 = vadd.f32 %v2521_v29, %v5742_v21  ;;  %v2635_v35 = vadd.f32 %v2634_v17, %v5744_v13  ;;  %v4112_v39 = vld [vmem:[#allocation5 + $0x118] sm:$0xff] }
 0x2dc   :  { %v2523_v41 = vpop.f32.mrf.mxu0  ;;  %v3136_v42 = vmul.f32 %v5788_v27, %v2944_v60  ;;  %v3138_v34 = vmul.f32 %v5788_v27, %v2946_v63  ;;  %v3263_v12 = vmul.f32 %v3135_v30, %v3135_v30  ;;  %v3265_v50 = vmul.f32 %v3137_v7, %v3137_v7 }
 0x2dd   :  { %v2638_v18 = vpop.f32.mrf.mxu1  ;;  %v2951_v44 = vsub.f32 %v4109_v48, %v2522_v14  ;;  %v2953_v46 = vsub.f32 %v4110_v16, %v2635_v35  ;;  %v2524_v58 = vadd.f32 %v2523_v41, %v5746_v9  ;;  %v2637_v28 = vadd.f32 %v2636_v33, %v5748_v55  ;;  %v4114_v41 = vld [vmem:[#allocation5 + $0x150] sm:$0xff]  ;;  %v4115_v14 = vld [vmem:[#allocation5 + $0x148] sm:$0xff] }
 0x2de   :  { %v2525_v51 = vpop.f32.mrf.mxu0  ;;  %v3264_v4 = vmul.f32 %v3136_v42, %v3136_v42  ;;  %v3266_v1 = vmul.f32 %v3138_v34, %v3138_v34  ;;  %v3369_v24 = vadd.f32 %v3368_v25, %v3263_v12  ;;  %v3411_v61 = vadd.f32 %v3410_v57, %v3265_v50  ;;  %v4113_v25 = vld [vmem:[#allocation5 + $0x140] sm:$0xff] }
 0x2df   :  { %v2640_v5 = vpop.f32.mrf.mxu1  ;;  %v2952_v11 = vsub.f32 %v4111_v31, %v2524_v58  ;;  %v2954_v47 = vsub.f32 %v4112_v39, %v2637_v28  ;;  %v3143_v40 = vmul.f32 %v5800_v6, %v2951_v44  ;;  %v3145_v52 = vmul.f32 %v5800_v6, %v2953_v46 }
 0x2e0   :  { %v2527_v43 = vpop.f32.mrf.mxu0  ;;  %v3390_v38 = vadd.f32 %v3389_v62, %v3264_v4  ;;  %v3432_v29 = vadd.f32 %v3431_v45, %v3266_v1  ;;  %v2526_v17 = vadd.f32 %v2525_v51, %v5742_v21  ;;  %v2639_v3 = vadd.f32 %v2638_v18, %v5744_v13  ;;  %v4116_v51 = vld [vmem:[#allocation5 + $0x158] sm:$0xff]  ;;  %v5820_v4 = vpop.permute.xlu0 %3072  ;;  %v4117_v1 = vld [vmem:[#allocation5 + $0x180] sm:$0xff] }
 0x2e1   :  { %v3144_v8 = vmul.f32 %v5800_v6, %v2952_v11  ;;  %v3146_v32 = vmul.f32 %v5800_v6, %v2954_v47  ;;  %v3271_v37 = vmul.f32 %v3143_v40, %v3143_v40  ;;  %v3273_v59 = vmul.f32 %v3145_v52, %v3145_v52 }
 0x2e2   :  { %v2644_v15 = vpop.f32.mrf.mxu1  ;;  %v2959_v57 = vsub.f32 %v4113_v25, %v2526_v17  ;;  %v2961_v33 = vsub.f32 %v4114_v41, %v2639_v3  ;;  %v2528_v10 = vadd.f32 %v2527_v43, %v5746_v9  ;;  %v2641_v60 = vadd.f32 %v2640_v5, %v5748_v55  ;;  %v4120_v3 = vld [vmem:[#allocation5 + $0x198] sm:$0xff] }
 0x2e3   :  { %v3272_v23 = vmul.f32 %v3144_v8, %v3144_v8  ;;  %v3274_v63 = vmul.f32 %v3146_v32, %v3146_v32  ;;  %v3370_v30 = vadd.f32 %v3369_v24, %v3271_v37  ;;  %v3412_v7 = vadd.f32 %v3411_v61, %v3273_v59  ;;  %v4118_v61 = vld [vmem:[#allocation5 + $0x190] sm:$0xff] }
 0x2e4   :  { %v2531_v0 = vpop.f32.mrf.mxu0  ;;  %v2646_v49 = vpop.f32.mrf.mxu1  ;;  %v2960_v35 = vsub.f32 %v4115_v14, %v2528_v10  ;;  %v2962_v18 = vsub.f32 %v4116_v51, %v2641_v60  ;;  %v3151_v42 = vmul.f32 %v5808_v53, %v2959_v57  ;;  %v3153_v34 = vmul.f32 %v5808_v53, %v2961_v33  ;;  %v4121_v14 = vld [vmem:[#allocation5 + $0x1c0] sm:$0xff]  ;;  %v4122_v51 = vld [vmem:[#allocation5 + $0x1d0] sm:$0xff] }
 0x2e5   :  { %v3391_v12 = vadd.f32 %v3390_v38, %v3272_v23  ;;  %v3433_v50 = vadd.f32 %v3432_v29, %v3274_v63  ;;  %v2532_v48 = vadd.f32 %v2531_v0, %v5742_v21  ;;  %v2645_v44 = vadd.f32 %v2644_v15, %v5744_v13  ;;  %v4119_v29 = vld [vmem:[#allocation5 + $0x188] sm:$0xff]  ;;  %v5828_v33 = vpop.permute.xlu1 %3076 }
 0x2e6   :  { %v2533_v22 = vpop.f32.mrf.mxu0  ;;  %v2648_v45 = vpop.f32.mrf.mxu1  ;;  %v3152_v58 = vmul.f32 %v5808_v53, %v2960_v35  ;;  %v3154_v28 = vmul.f32 %v5808_v53, %v2962_v18  ;;  %v3279_v43 = vmul.f32 %v3151_v42, %v3151_v42  ;;  %v3281_v5 = vmul.f32 %v3153_v34, %v3153_v34 }
 0x2e7   :  { %v2967_v24 = vsub.f32 %v4117_v1, %v2532_v48  ;;  %v2969_v31 = vsub.f32 %v4118_v61, %v2645_v44  ;;  %v2534_v11 = vadd.f32 %v2533_v22, %v5746_v9  ;;  %v2647_v39 = vadd.f32 %v2646_v49, %v5748_v55 }
 0x2e8   :  { %v2535_v62 = vpop.f32.mrf.mxu0  ;;  %v2650_v46 = vpop.f32.mrf.mxu1  ;;  %v3280_v52 = vmul.f32 %v3152_v58, %v3152_v58  ;;  %v3282_v0 = vmul.f32 %v3154_v28, %v3154_v28  ;;  %v3371_v15 = vadd.f32 %v3370_v30, %v3279_v43  ;;  %v3413_v38 = vadd.f32 %v3412_v7, %v3281_v5  ;;  %v4123_v58 = vld [vmem:[#allocation5 + $0x1c8] sm:$0xff]  ;;  %v4124_v43 = vld [vmem:[#allocation5 + $0x1d8] sm:$0xff] }
 0x2e9   :  { %v2968_v17 = vsub.f32 %v4119_v29, %v2534_v11  ;;  %v2970_v8 = vsub.f32 %v4120_v3, %v2647_v39  ;;  %v3159_v32 = vmul.f32 %v5820_v4, %v2967_v24  ;;  %v3161_v37 = vmul.f32 %v5820_v4, %v2969_v31  ;;  %v5840_v29 = vpop.permute.xlu0 %3080 }
 0x2ea   :  { %v2537_v16 = vpop.f32.mrf.mxu0  ;;  %v2654_v40 = vpop.f32.mrf.mxu1  ;;  %v3392_v57 = vadd.f32 %v3391_v12, %v3280_v52  ;;  %v3434_v22 = vadd.f32 %v3433_v50, %v3282_v0  ;;  %v2536_v49 = vadd.f32 %v2535_v62, %v5742_v21  ;;  %v2649_v41 = vadd.f32 %v2648_v45, %v5744_v13  ;;  %6435 = vst [vmem:[#allocation23_spill] sm:$0xff] %v5840_v29 }
 0x2eb   :  { %v3160_v10 = vmul.f32 %v5820_v4, %v2968_v17  ;;  %v3162_v60 = vmul.f32 %v5820_v4, %v2970_v8  ;;  %v3287_v23 = vmul.f32 %v3159_v32, %v3159_v32  ;;  %v3289_v63 = vmul.f32 %v3161_v37, %v3161_v37  ;;  %v4125_v17 = vld [vmem:[#allocation5 + $0x200] sm:$0xff]  ;;  %v4126_v8 = vld [vmem:[#allocation5 + $0x210] sm:$0xff] }
 0x2ec   :  { %v2541_v47 = vpop.f32.mrf.mxu0  ;;  %v2656_v25 = vpop.f32.mrf.mxu1  ;;  %v2975_v35 = vsub.f32 %v4121_v14, %v2536_v49  ;;  %v2977_v18 = vsub.f32 %v4122_v51, %v2649_v41  ;;  %v2538_v42 = vadd.f32 %v2537_v16, %v5746_v9  ;;  %v2651_v62 = vadd.f32 %v2650_v46, %v5748_v55 }
 0x2ed   :  { %v3288_v34 = vmul.f32 %v3160_v10, %v3160_v10  ;;  %v3290_v45 = vmul.f32 %v3162_v60, %v3162_v60  ;;  %v3372_v12 = vadd.f32 %v3371_v15, %v3287_v23  ;;  %v3414_v50 = vadd.f32 %v3413_v38, %v3289_v63  ;;  %v4127_v60 = vld [vmem:[#allocation5 + $0x208] sm:$0xff]  ;;  %v4128_v63 = vld [vmem:[#allocation5 + $0x218] sm:$0xff] }
 0x2ee   :  { %v2543_v59 = vpop.f32.mrf.mxu0  ;;  %v2658_v7 = vpop.f32.mrf.mxu1  ;;  %v2976_v28 = vsub.f32 %v4123_v58, %v2538_v42  ;;  %v2978_v5 = vsub.f32 %v4124_v43, %v2651_v62  ;;  %v3167_v1 = vmul.f32 %v5828_v33, %v2975_v35  ;;  %v3169_v24 = vmul.f32 %v5828_v33, %v2977_v18 }
 0x2ef   :  { %v3393_v61 = vadd.f32 %v3392_v57, %v3288_v34  ;;  %v3435_v31 = vadd.f32 %v3434_v22, %v3290_v45  ;;  %v2542_v16 = vadd.f32 %v2541_v47, %v5742_v21  ;;  %v2655_v46 = vadd.f32 %v2654_v40, %v5744_v13  ;;  %v5852_v45 = vpop.permute.xlu1 %3084 }
 0x2f0   :  { %v2545_v30 = vpop.f32.mrf.mxu0  ;;  %v2660_v44 = vpop.f32.mrf.mxu1  ;;  %v3168_v52 = vmul.f32 %v5828_v33, %v2976_v28  ;;  %v3170_v0 = vmul.f32 %v5828_v33, %v2978_v5  ;;  %v3295_v15 = vmul.f32 %v3167_v1, %v3167_v1  ;;  %v3297_v38 = vmul.f32 %v3169_v24, %v3169_v24  ;;  %6436 = vst [vmem:[#allocation22_spill] sm:$0xff] %v5852_v45  ;;  %v4129_v1 = vld [vmem:[#allocation5 + $0x240] sm:$0xff] }
 0x2f1   :  { %v2983_v3 = vsub.f32 %v4125_v17, %v2542_v16  ;;  %v2985_v32 = vsub.f32 %v4126_v8, %v2655_v46  ;;  %v2544_v37 = vadd.f32 %v2543_v59, %v5746_v9  ;;  %v2657_v47 = vadd.f32 %v2656_v25, %v5748_v55  ;;  %v4131_v17 = vld [vmem:[#allocation5 + $0x248] sm:$0xff]  ;;  %v4132_v8 = vld [vmem:[#allocation5 + $0x258] sm:$0xff] }
 0x2f2   :  { %v2547_v48 = vpop.f32.mrf.mxu0  ;;  %v2664_v39 = vpop.f32.mrf.mxu1  ;;  %v3296_v22 = vmul.f32 %v3168_v52, %v3168_v52  ;;  %v3298_v49 = vmul.f32 %v3170_v0, %v3170_v0  ;;  %v3373_v41 = vadd.f32 %v3372_v12, %v3295_v15  ;;  %v3415_v10 = vadd.f32 %v3414_v50, %v3297_v38 }
 0x2f3   :  { %v2984_v23 = vsub.f32 %v4127_v60, %v2544_v37  ;;  %v2986_v14 = vsub.f32 %v4128_v63, %v2657_v47  ;;  %v3175_v35 = vmul.f32 %v5840_v29, %v2983_v3  ;;  %v3177_v51 = vmul.f32 %v5840_v29, %v2985_v32 }
 0x2f4   :  { %v2551_v11 = vpop.f32.mrf.mxu0  ;;  %v2666_v40 = vpop.f32.mrf.mxu1  ;;  %v3394_v59 = vadd.f32 %v3393_v61, %v3296_v22  ;;  %v3436_v25 = vadd.f32 %v3435_v31, %v3298_v49  ;;  %v2546_v62 = vadd.f32 %v2545_v30, %v5742_v21  ;;  %v2659_v34 = vadd.f32 %v2658_v7, %v5744_v13  ;;  %v4130_v61 = vld [vmem:[#allocation5 + $0x250] sm:$0xff] }
 0x2f5   :  { %v3176_v12 = vmul.f32 %v5840_v29, %v2984_v23  ;;  %v3178_v50 = vmul.f32 %v5840_v29, %v2986_v14  ;;  %v3303_v58 = vmul.f32 %v3175_v35, %v3175_v35  ;;  %v3305_v28 = vmul.f32 %v3177_v51, %v3177_v51  ;;  %v5876_v35 = vpop.permute.xlu0 %3088  ;;  %v4133_v51 = vld [vmem:[#allocation5 + $0x280] sm:$0xff] }
 0x2f6   :  { %v2553_v57 = vpop.f32.mrf.mxu0  ;;  %v5848_v42 = vpop.f32.mrf.mxu1  ;;  %v2991_v24 = vsub.f32 %v4129_v1, %v2546_v62  ;;  %v2993_v31 = vsub.f32 %v4130_v61, %v2659_v34  ;;  %v2548_v30 = vadd.f32 %v2547_v48, %v5746_v9  ;;  %v2661_v7 = vadd.f32 %v2660_v44, %v5748_v55  ;;  %6437 = vst [vmem:[#allocation26_spill] sm:$0xff] %v5876_v35 }
 0x2f7   :  { %v3304_v16 = vmul.f32 %v3176_v12, %v3176_v12  ;;  %v3306_v46 = vmul.f32 %v3178_v50, %v3178_v50  ;;  %v3374_v52 = vadd.f32 %v3373_v41, %v3303_v58  ;;  %v3416_v0 = vadd.f32 %v3415_v10, %v3305_v28 }
 0x2f8   :  { %v5846_v18 = vpop.f32.mrf.mxu0  ;;  %v5858_v5 = vpop.f32.mrf.mxu1  ;;  %v2992_v3 = vsub.f32 %v4131_v17, %v2548_v30  ;;  %v2994_v32 = vsub.f32 %v4132_v8, %v2661_v7  ;;  %v3183_v37 = vmul.f32 %v5852_v45, %v2991_v24  ;;  %v3185_v47 = vmul.f32 %v5852_v45, %v2993_v31  ;;  %v4135_v24 = vld [vmem:[#allocation5 + $0x288] sm:$0xff]  ;;  %v4136_v31 = vld [vmem:[#allocation5 + $0x298] sm:$0xff] }
 0x2f9   :  { %v3395_v22 = vadd.f32 %v3394_v59, %v3304_v16  ;;  %v3437_v48 = vadd.f32 %v3436_v25, %v3306_v46  ;;  %v2552_v44 = vadd.f32 %v2551_v11, %v5742_v21  ;;  %v2665_v49 = vadd.f32 %v2664_v39, %v5744_v13  ;;  %v4134_v59 = vld [vmem:[#allocation5 + $0x290] sm:$0xff] }
 0x2fa   :  { %v5856_v43 = vpop.f32.mrf.mxu0  ;;  %v5864_v38 = vpop.f32.mrf.mxu1  ;;  %v3184_v60 = vmul.f32 %v5852_v45, %v2992_v3  ;;  %v3186_v23 = vmul.f32 %v5852_v45, %v2994_v32  ;;  %v3311_v63 = vmul.f32 %v3183_v37, %v3183_v37  ;;  %v3313_v14 = vmul.f32 %v3185_v47, %v3185_v47 }
 0x2fb   :  { %v2999_v62 = vsub.f32 %v4133_v51, %v2552_v44  ;;  %v3001_v25 = vsub.f32 %v4134_v59, %v2665_v49  ;;  %v2554_v11 = vadd.f32 %v2553_v57, %v5746_v9  ;;  %v2667_v39 = vadd.f32 %v2666_v40, %v5748_v55 }
 0x2fc   :  { %v5862_v15 = vpop.f32.mrf.mxu0  ;;  %v5872_v10 = vpop.f32.mrf.mxu1  ;;  %v3312_v50 = vmul.f32 %v3184_v60, %v3184_v60  ;;  %v3314_v58 = vmul.f32 %v3186_v23, %v3186_v23  ;;  %v3375_v28 = vadd.f32 %v3374_v52, %v3311_v63  ;;  %v3417_v1 = vadd.f32 %v3416_v0, %v3313_v14  ;;  %v4138_v60 = vld [vmem:[#allocation5 + $0x2d0] sm:$0xff] }
 0x2fd   :  { %v3000_v61 = vsub.f32 %v4135_v24, %v2554_v11  ;;  %v3002_v30 = vsub.f32 %v4136_v31, %v2667_v39  ;;  %v3191_v7 = vmul.f32 %v5876_v35, %v2999_v62  ;;  %v3193_v16 = vmul.f32 %v5876_v35, %v3001_v25  ;;  %v5894_v0 = vpop.permute.xlu1 %3092  ;;  %v4139_v11 = vld [vmem:[#allocation5 + $0x2c8] sm:$0xff] }
 0x2fe   :  { %v5870_v41 = vpop.f32.mrf.mxu0  ;;  %v5882_v12 = vpop.f32.mrf.mxu1  ;;  %v3396_v40 = vadd.f32 %v3395_v22, %v3312_v50  ;;  %v3438_v17 = vadd.f32 %v3437_v48, %v3314_v58  ;;  %v2556_v3 = vadd.f32 %v5846_v18, %v5742_v21  ;;  %v2669_v52 = vadd.f32 %v5848_v42, %v5744_v13  ;;  %6438 = vst [vmem:[#allocation25_spill] sm:$0xff] %v5894_v0  ;;  %v4137_v22 = vld [vmem:[#allocation5 + $0x2c0] sm:$0xff]  ;;  %v4140_v50 = vld [vmem:[#allocation5 + $0x2d8] sm:$0xff] }
 0x2ff   :  { %v3192_v8 = vmul.f32 %v5876_v35, %v3000_v61  ;;  %v3194_v32 = vmul.f32 %v5876_v35, %v3002_v30  ;;  %v3319_v37 = vmul.f32 %v3191_v7, %v3191_v7  ;;  %v3321_v47 = vmul.f32 %v3193_v16, %v3193_v16 }
 0x300   :  { %v5880_v34 = vpop.f32.mrf.mxu0  ;;  %v5888_v57 = vpop.f32.mrf.mxu1  ;;  %v3007_v48 = vsub.f32 %v4137_v22, %v2556_v3  ;;  %v3009_v23 = vsub.f32 %v4138_v60, %v2669_v52  ;;  %v2558_v18 = vadd.f32 %v5856_v43, %v5746_v9  ;;  %v2671_v42 = vadd.f32 %v5858_v5, %v5748_v55 }
 0x301   :  { %v3320_v63 = vmul.f32 %v3192_v8, %v3192_v8  ;;  %v3322_v14 = vmul.f32 %v3194_v32, %v3194_v32  ;;  %v3376_v51 = vadd.f32 %v3375_v28, %v3319_v37  ;;  %v3418_v62 = vadd.f32 %v3417_v1, %v3321_v47  ;;  %v5922_v8 = vpop.permute.xlu0 %3096  ;;  %v4142_v32 = vld [vmem:[#allocation5 + $0x310] sm:$0xff] }
 0x302   :  { %v5886_v46 = vpop.f32.mrf.mxu0  ;;  %v5900_v49 = vpop.f32.mrf.mxu1  ;;  %v3008_v39 = vsub.f32 %v4139_v11, %v2558_v18  ;;  %v3010_v58 = vsub.f32 %v4140_v50, %v2671_v42  ;;  %v3199_v24 = vmul.f32 %v5894_v0, %v3007_v48  ;;  %v3201_v61 = vmul.f32 %v5894_v0, %v3009_v23  ;;  %6439 = vst [vmem:[#allocation27_spill] sm:$0xff] %v5922_v8  ;;  %v4143_v42 = vld [vmem:[#allocation5 + $0x308] sm:$0xff] }
 0x303   :  { %v3397_v43 = vadd.f32 %v3396_v40, %v3320_v63  ;;  %v3439_v31 = vadd.f32 %v3438_v17, %v3322_v14  ;;  %v2562_v5 = vadd.f32 %v5862_v15, %v5742_v21  ;;  %v2675_v28 = vadd.f32 %v5864_v38, %v5744_v13  ;;  %v4141_v40 = vld [vmem:[#allocation5 + $0x300] sm:$0xff]  ;;  %v4144_v14 = vld [vmem:[#allocation5 + $0x318] sm:$0xff] }
 0x304   :  { %v5898_v44 = vpop.f32.mrf.mxu0  ;;  %v5908_v25 = vpop.f32.mrf.mxu1  ;;  %v3200_v7 = vmul.f32 %v5894_v0, %v3008_v39  ;;  %v3202_v16 = vmul.f32 %v5894_v0, %v3010_v58  ;;  %v3327_v3 = vmul.f32 %v3199_v24, %v3199_v24  ;;  %v3329_v52 = vmul.f32 %v3201_v61, %v3201_v61 }
 0x305   :  { %v3015_v17 = vsub.f32 %v4141_v40, %v2562_v5  ;;  %v3017_v37 = vsub.f32 %v4142_v32, %v2675_v28  ;;  %v2564_v15 = vadd.f32 %v5870_v41, %v5746_v9  ;;  %v2677_v38 = vadd.f32 %v5872_v10, %v5748_v55  ;;  %v4146_v40 = vld [vmem:[#allocation5 + $0x350] sm:$0xff] }
 0x306   :  { %v5906_v59 = vpop.f32.mrf.mxu0  ;;  %v5918_v30 = vpop.f32.mrf.mxu1  ;;  %v3328_v48 = vmul.f32 %v3200_v7, %v3200_v7  ;;  %v3330_v60 = vmul.f32 %v3202_v16, %v3202_v16  ;;  %v3377_v23 = vadd.f32 %v3376_v51, %v3327_v3  ;;  %v5932_v18 = vadd.f32 %v3418_v62, %v3329_v52 }
 0x307   :  { %v3016_v63 = vsub.f32 %v4143_v42, %v2564_v15  ;;  %v3018_v11 = vsub.f32 %v4144_v14, %v2677_v38  ;;  %v3207_v39 = vmul.f32 %v5922_v8, %v3015_v17  ;;  %v3209_v41 = vmul.f32 %v5922_v8, %v3017_v37  ;;  %v5944_v62 = vpop.permute.xlu1 %3100  ;;  %v4147_v42 = vld [vmem:[#allocation5 + $0x348] sm:$0xff]  ;;  %v4148_v14 = vld [vmem:[#allocation5 + $0x358] sm:$0xff] }
 0x308   :  { %v5916_v1 = vpop.f32.mrf.mxu0  ;;  %v5930_v22 = vpop.f32.mrf.mxu1  ;;  %v3398_v58 = vadd.f32 %v3397_v43, %v3328_v48  ;;  %v3440_v24 = vadd.f32 %v3439_v31, %v3330_v60  ;;  %v2566_v61 = vadd.f32 %v5880_v34, %v5742_v21  ;;  %v2679_v51 = vadd.f32 %v5882_v12, %v5744_v13  ;;  %6440 = vst [vmem:[#allocation32_spill] sm:$0xff] %v5944_v62  ;;  %v4145_v43 = vld [vmem:[#allocation5 + $0x340] sm:$0xff] }
 0x309   :  { %v3208_v5 = vmul.f32 %v5922_v8, %v3016_v63  ;;  %v3210_v28 = vmul.f32 %v5922_v8, %v3018_v11  ;;  %v3335_v7 = vmul.f32 %v3207_v39, %v3207_v39  ;;  %v3337_v16 = vmul.f32 %v3209_v41, %v3209_v41  ;;  %v5966_v39 = vpop.permute.xlu0 %3104  ;;  %v4149_v41 = vld [vmem:[#allocation5 + $0x380] sm:$0xff] }
 0x30a   :  { %v5928_v47 = vpop.f32.mrf.mxu0  ;;  %v5938_v10 = vpop.f32.mrf.mxu1  ;;  %v3023_v31 = vsub.f32 %v4145_v43, %v2566_v61  ;;  %v3025_v17 = vsub.f32 %v4146_v40, %v2679_v51  ;;  %v2568_v34 = vadd.f32 %v5886_v46, %v5746_v9  ;;  %v2681_v12 = vadd.f32 %v5888_v57, %v5748_v55  ;;  %6441 = vst [vmem:[#allocation31_spill] sm:$0xff] %v5966_v39 }
 0x30b   :  { %v3336_v32 = vmul.f32 %v3208_v5, %v3208_v5  ;;  %v3338_v37 = vmul.f32 %v3210_v28, %v3210_v28  ;;  %v2572_v15 = vadd.f32 %v5898_v44, %v5742_v21  ;;  %v2685_v38 = vadd.f32 %v5900_v49, %v5744_v13  ;;  %v4150_v44 = vld [vmem:[#allocation5 + $0x390] sm:$0xff] }
 0x30c   :  { %v5936_v50 = vpop.f32.mrf.mxu0  ;;  %v5950_v52 = vpop.f32.mrf.mxu1  ;;  %v3024_v63 = vsub.f32 %v4147_v42, %v2568_v34  ;;  %v3026_v11 = vsub.f32 %v4148_v14, %v2681_v12  ;;  %v3215_v46 = vmul.f32 %v5944_v62, %v3023_v31  ;;  %v3217_v57 = vmul.f32 %v5944_v62, %v3025_v17  ;;  %v4151_v12 = vld [vmem:[#allocation5 + $0x388] sm:$0xff]  ;;  %v4152_v42 = vld [vmem:[#allocation5 + $0x398] sm:$0xff] }
 0x30d   :  { %v3031_v61 = vsub.f32 %v4149_v41, %v2572_v15  ;;  %v3033_v51 = vsub.f32 %v4150_v44, %v2685_v38  ;;  %v2574_v49 = vadd.f32 %v5906_v59, %v5746_v9  ;;  %v2687_v5 = vadd.f32 %v5908_v25, %v5748_v55 }
 0x30e   :  { %v5948_v3 = vpop.f32.mrf.mxu0  ;;  %v5962_v60 = vpop.f32.mrf.mxu1  ;;  %v3216_v31 = vmul.f32 %v5944_v62, %v3024_v63  ;;  %v3218_v40 = vmul.f32 %v5944_v62, %v3026_v11  ;;  %v3343_v17 = vmul.f32 %v3215_v46, %v3215_v46  ;;  %v3345_v34 = vmul.f32 %v3217_v57, %v3217_v57 }
 0x30f   :  { %v3032_v15 = vsub.f32 %v4151_v12, %v2574_v49  ;;  %v3034_v38 = vsub.f32 %v4152_v42, %v2687_v5  ;;  %v3223_v14 = vmul.f32 %v5966_v39, %v3031_v61  ;;  %v3225_v59 = vmul.f32 %v5966_v39, %v3033_v51 }
 0x310   :  { %v5960_v48 = vpop.f32.mrf.mxu0  ;;  %v5974_v43 = vpop.f32.mrf.mxu1  ;;  %v3344_v44 = vmul.f32 %v3216_v31, %v3216_v31  ;;  %v3346_v8 = vmul.f32 %v3218_v40, %v3218_v40  ;;  %v3378_v0 = vadd.f32 %v3377_v23, %v3335_v7  ;;  %v3399_v63 = vadd.f32 %v3398_v58, %v3336_v32 }
 0x311   :  { %v3224_v11 = vmul.f32 %v5966_v39, %v3032_v15  ;;  %v3226_v46 = vmul.f32 %v5966_v39, %v3034_v38  ;;  %v3351_v57 = vmul.f32 %v3223_v14, %v3223_v14  ;;  %v3353_v49 = vmul.f32 %v3225_v59, %v3225_v59 }
 0x312   :  { %v5972_v28 = vpop.f32.mrf.mxu0  ;;  %v5982_v25 = vpop.f32.mrf.mxu1  ;;  %v3379_v61 = vadd.f32 %v3378_v0, %v3343_v17  ;;  %v3400_v51 = vadd.f32 %v3399_v63, %v3344_v44  ;;  %v3420_v42 = vadd.f32 %v5932_v18, %v3337_v16  ;;  %v3441_v62 = vadd.f32 %v3440_v24, %v3338_v37  ;;  %v4153_v16 = vld [vmem:[#allocation5 + $0x3c0] sm:$0xff]  ;;  %v4154_v17 = vld [vmem:[#allocation5 + $0x3d0] sm:$0xff] }
 0x313   :  { %v3352_v35 = vmul.f32 %v3224_v11, %v3224_v11  ;;  %v3354_v31 = vmul.f32 %v3226_v46, %v3226_v46  ;;  %v2576_v23 = vadd.f32 %v5916_v1, %v5742_v21  ;;  %v2689_v58 = vadd.f32 %v5918_v30, %v5744_v13  ;;  %v6001_v18 = vpop.permute.xlu1 %3108  ;;  %v4157_v46 = vld [vmem:[#allocation5 + $0x20] sm:$0xff] }
 0x314   :  { %v5980_v41 = vpop.f32.mrf.mxu0  ;;  %v5988_v5 = vpop.f32.mrf.mxu1  ;;  %v3380_v40 = vadd.f32 %v3379_v61, %v3351_v57  ;;  %v3421_v15 = vadd.f32 %v3420_v42, %v3345_v34  ;;  %v3442_v38 = vadd.f32 %v3441_v62, %v3346_v8  ;;  %v2578_v0 = vadd.f32 %v5928_v47, %v5746_v9  ;;  %6442 = vst [vmem:[#allocation29_spill] sm:$0xff] %v6001_v18  ;;  %v4155_v8 = vld [vmem:[#allocation5 + $0x3c8] sm:$0xff]  ;;  %v4156_v47 = vld [vmem:[#allocation5 + $0x3d8] sm:$0xff] }
 0x315   :  { %v3401_v24 = vadd.f32 %v3400_v51, %v3352_v35  ;;  %v3039_v37 = vsub.f32 %v4153_v16, %v2576_v23  ;;  %v3041_v21 = vsub.f32 %v4154_v17, %v2689_v58  ;;  %v2691_v13 = vadd.f32 %v5930_v22, %v5748_v55 }
 0x316   :  { %v5986_v12 = vpop.f32.mrf.mxu0  ;;  %v5997_v32 = vpop.f32.mrf.mxu1  ;;  %v3422_v14 = vadd.f32 %v3421_v15, %v3353_v49  ;;  %v3443_v34 = vadd.f32 %v3442_v38, %v3354_v31  ;;  %v3040_v62 = vsub.f32 %v4155_v8, %v2578_v0  ;;  %v2728_v9 = vadd.f32 %v5936_v50, %v5764_v26  ;;  %v4158_v31 = vld [vmem:[#allocation5 + $0x30] sm:$0xff]  ;;  %v4159_v0 = vld [vmem:[#allocation5 + $0x28] sm:$0xff] }
 0x317   :  { %v3042_v35 = vsub.f32 %v4156_v47, %v2691_v13  ;;  %v3231_v59 = vmul.f32 %v6001_v18, %v3039_v37  ;;  %v3233_v44 = vmul.f32 %v6001_v18, %v3041_v21  ;;  %v2841_v55 = vadd.f32 %v5938_v10, %v5766_v56  ;;  %v4160_v37 = vld [vmem:[#allocation5 + $0x38] sm:$0xff] }
 0x318   :  { %v5995_v7 = vpop.f32.mrf.mxu0  ;;  %v6007_v30 = vpop.f32.mrf.mxu1  ;;  %v3232_v11 = vmul.f32 %v6001_v18, %v3040_v62  ;;  %v2923_v57 = vsub.f32 %v4157_v46, %v2728_v9  ;;  %v2730_v50 = vadd.f32 %v5948_v3, %v5770_v36  ;;  %v2843_v49 = vadd.f32 %v5950_v52, %v5772_v19 }
 0x319   :  { %v3234_v61 = vmul.f32 %v6001_v18, %v3042_v35  ;;  %v3359_v51 = vmul.f32 %v3231_v59, %v3231_v59  ;;  %v3361_v42 = vmul.f32 %v3233_v44, %v3233_v44  ;;  %v2925_v10 = vsub.f32 %v4158_v31, %v2841_v55 }
 0x31a   :  { %v6005_v1 = vpop.f32.mrf.mxu0  ;;  %v6017_v63 = vpop.f32.mrf.mxu1  ;;  %v3360_v15 = vmul.f32 %v3232_v11, %v3232_v11  ;;  %v3115_v38 = vmul.f32 %v5752_v54, %v2923_v57  ;;  %v2924_v16 = vsub.f32 %v4159_v0, %v2730_v50  ;;  %v2926_v3 = vsub.f32 %v4160_v37, %v2843_v49 }
 0x31b   :  { %v3362_v17 = vmul.f32 %v3234_v61, %v3234_v61  ;;  %v3381_v21 = vadd.f32 %v3380_v40, %v3359_v51  ;;  %v3423_v52 = vadd.f32 %v3422_v14, %v3361_v42  ;;  %v3117_v13 = vmul.f32 %v5752_v54, %v2925_v10 }
 0x31c   :  { %v6015_v22 = vpop.f32.mrf.mxu0  ;;  %v6027_v58 = vpop.f32.mrf.mxu1  ;;  %v3402_v9 = vadd.f32 %v3401_v24, %v3360_v15  ;;  %v3243_v47 = vmul.f32 %v3115_v38, %v3115_v38  ;;  %v3116_v35 = vmul.f32 %v5752_v54, %v2924_v16  ;;  %v3118_v59 = vmul.f32 %v5752_v54, %v2926_v3  ;;  %v4161_v15 = vld [vmem:[#allocation5 + $0x60] sm:$0xff] }
 0x31d   :  { %v3382_v44 = vrot.slane %v3381_v21, 4  ;;  %v3424_v55 = vrot.slane %v3423_v52, 4  ;;  %v3444_v11 = vadd.f32 %v3443_v34, %v3362_v17  ;;  %v3245_v46 = vmul.f32 %v3117_v13, %v3117_v13  ;;  %v4162_v17 = vld [vmem:[#allocation5 + $0x70] sm:$0xff] }
 0x31e   :  { %v6025_v23 = vpop.f32.mrf.mxu0  ;;  %v6033_v62 = vpop.f32.mrf.mxu1  ;;  %v3403_v14 = vrot.slane %v3402_v9, 4  ;;  %v3244_v50 = vmul.f32 %v3116_v35, %v3116_v35  ;;  %v3246_v49 = vmul.f32 %v3118_v59, %v3118_v59  ;;  %v2732_v61 = vadd.f32 %v5960_v48, %v5764_v26  ;;  %v4163_v35 = vld [vmem:[#allocation5 + $0x68] sm:$0xff] }
 0x31f   :  { %v3383_v24 = vadd.f32 %v3382_v44, %v3381_v21  ;;  %v3425_v51 = vadd.f32 %v3424_v55, %v3423_v52  ;;  %v3445_v42 = vrot.slane %v3444_v11, 4  ;;  %v2845_v54 = vadd.f32 %v5962_v60, %v5766_v56  ;;  %v4164_v44 = vld [vmem:[#allocation5 + $0x78] sm:$0xff] }
 0x320   :  { %v6031_v8 = vpop.f32.mrf.mxu0  ;;  %v6039_v40 = vpop.f32.mrf.mxu1  ;;  %v3404_v10 = vadd.f32 %v3403_v14, %v3402_v9  ;;  %v2931_v38 = vsub.f32 %v4161_v15, %v2732_v61  ;;  %v2734_v0 = vadd.f32 %v5972_v28, %v5770_v36  ;;  %v2847_v16 = vadd.f32 %v5974_v43, %v5772_v19 }
 0x321   :  { %v3384_v48 = vrot.slane %v3383_v24, 2  ;;  %v3426_v37 = vrot.slane %v3425_v51, 2  ;;  %v3446_v3 = vadd.f32 %v3445_v42, %v3444_v11  ;;  %v2933_v21 = vsub.f32 %v4162_v17, %v2845_v54 }
 0x322   :  { %v6037_v57 = vpop.f32.mrf.mxu0  ;;  %v6047_v34 = vpop.f32.mrf.mxu1  ;;  %v3405_v13 = vrot.slane %v3404_v10, 2  ;;  %v3123_v9 = vmul.f32 %v5762_v20, %v2931_v38  ;;  %v2932_v59 = vsub.f32 %v4163_v35, %v2734_v0  ;;  %v2934_v55 = vsub.f32 %v4164_v44, %v2847_v16 }
 0x323   :  { %v3385_v28 = vadd.f32 %v3384_v48, %v3383_v24  ;;  %v3427_v14 = vadd.f32 %v3426_v37, %v3425_v51  ;;  %v3447_v61 = vrot.slane %v3446_v3, 2  ;;  %v3125_v43 = vmul.f32 %v5762_v20, %v2933_v21 }
 0x324   :  { %v6045_v31 = vpop.f32.mrf.mxu0  ;;  %v6055_v60 = vpop.f32.mrf.mxu1  ;;  %v3406_v42 = vadd.f32 %v3405_v13, %v3404_v10  ;;  %v3251_v54 = vmul.f32 %v3123_v9, %v3123_v9  ;;  %v3124_v17 = vmul.f32 %v5762_v20, %v2932_v59  ;;  %v3126_v18 = vmul.f32 %v5762_v20, %v2934_v55 }
 0x325   :  { %v3386_v38 = vrot.slane %v3385_v28, 1  ;;  %v3428_v39 = vrot.slane %v3427_v14, 1  ;;  %v3448_v0 = vadd.f32 %v3447_v61, %v3446_v3  ;;  %v3253_v35 = vmul.f32 %v3125_v43, %v3125_v43  ;;  %v4168_v43 = vld [vmem:[#allocation5 + $0xb8] sm:$0xff] }
 0x326   :  { %v6053_v52 = vpop.f32.mrf.mxu0  ;;  %v6061_v11 = vpop.f32.mrf.mxu1  ;;  %v3407_v51 = vrot.slane %v3406_v42, 1  ;;  %v3451_v48 = vadd.f32 %v3251_v54, %v3243_v47  ;;  %v3252_v37 = vmul.f32 %v3124_v17, %v3124_v17  ;;  %v3254_v21 = vmul.f32 %v3126_v18, %v3126_v18  ;;  %v4169_v17 = vld [vmem:[#allocation5 + $0xe0] sm:$0xff] }
 0x327   :  { %v3387_v44 = vadd.f32 %v3386_v38, %v3385_v28  ;;  %v3429_v45 = vadd.f32 %v3428_v39, %v3427_v14  ;;  %v3449_v10 = vrot.slane %v3448_v0, 1  ;;  %v3493_v13 = vadd.f32 %v3253_v35, %v3245_v46  ;;  %v4165_v46 = vld [vmem:[#allocation5 + $0xa0] sm:$0xff]  ;;  %v4167_v14 = vld [vmem:[#allocation5 + $0xa8] sm:$0xff]  ;;  %v4170_v38 = vld [vmem:[#allocation5 + $0xf0] sm:$0xff] }
 0x328   :  { %v6059_v15 = vpop.f32.mrf.mxu0  ;;  %v6067_v24 = vpop.f32.mrf.mxu1  ;;  %v3408_v9 = vadd.f32 %v3407_v51, %v3406_v42  ;;  %v3472_v59 = vadd.f32 %v3252_v37, %v3244_v50  ;;  %v3514_v29 = vadd.f32 %v3254_v21, %v3246_v49  ;;  %v2738_v20 = vadd.f32 %v5980_v41, %v5764_v26 }
 0x329   :  { %v3450_v61 = vadd.f32 %v3449_v10, %v3448_v0  ;;  %3535 = vst [vmem:[#allocation10] sm:$0xff] %v3387_v44  ;;  %3537 = vst [vmem:[#allocation10 + $0x10] sm:$0xff] %v3429_v45  ;;  %v2851_v18 = vadd.f32 %v5982_v25, %v5766_v56  ;;  %v2740_v39 = vadd.f32 %v5986_v12, %v5770_v36  ;;  %v4166_v25 = vld [vmem:[#allocation5 + $0xb0] sm:$0xff]  ;;  %v4172_v10 = vld [vmem:[#allocation5 + $0xf8] sm:$0xff] }
 0x32a   :  { %v6065_v16 = vpop.f32.mrf.mxu0  ;;  %v6073_v55 = vpop.f32.mrf.mxu1  ;;  %v2853_v47 = vadd.f32 %v5988_v5, %v5772_v19  ;;  %3536 = vst [vmem:[#allocation10 + $0x8] sm:$0xff] %v3408_v9  ;;  %v2939_v50 = vsub.f32 %v4165_v46, %v2738_v20  ;;  %v2742_v41 = vadd.f32 %v5995_v7, %v5764_v26  ;;  %v2855_v49 = vadd.f32 %v5997_v32, %v5766_v56  ;;  %v4171_v32 = vld [vmem:[#allocation5 + $0xe8] sm:$0xff] }
 0x32b   :  { %v2744_v45 = vadd.f32 %v6005_v1, %v5770_v36  ;;  %3538 = vst [vmem:[#allocation10 + $0x18] sm:$0xff] %v3450_v61  ;;  %v2941_v28 = vsub.f32 %v4166_v25, %v2851_v18  ;;  %v2940_v12 = vsub.f32 %v4167_v14, %v2740_v39  ;;  %v2857_v5 = vadd.f32 %v6007_v30, %v5772_v19 }
 0x32c   :  { %v6071_v3 = vpop.f32.mrf.mxu0  ;;  %v2942_v42 = vsub.f32 %v4168_v43, %v2853_v47  ;;  %v3131_v54 = vmul.f32 %v5776_v2, %v2939_v50  ;;  %v2947_v7 = vsub.f32 %v4169_v17, %v2742_v41  ;;  %v2949_v0 = vsub.f32 %v4170_v38, %v2855_v49  ;;  %v6092_v1 = vpop.f32.mrf.mxu1 }
 0x32d   :  { %v2948_v35 = vsub.f32 %v4171_v32, %v2744_v45  ;;  %v3133_v37 = vmul.f32 %v5776_v2, %v2941_v28  ;;  %v3132_v21 = vmul.f32 %v5776_v2, %v2940_v12  ;;  %v2950_v30 = vsub.f32 %v4172_v10, %v2857_v5 }
 0x32e   :  { %v6090_v51 = vpop.f32.mrf.mxu0  ;;  %v3134_v44 = vmul.f32 %v5776_v2, %v2942_v42  ;;  %v3259_v9 = vmul.f32 %v3131_v54, %v3131_v54  ;;  %v3139_v20 = vmul.f32 %v5788_v27, %v2947_v7  ;;  %v3141_v61 = vmul.f32 %v5788_v27, %v2949_v0  ;;  %v6103_v2 = vpop.f32.mrf.mxu1 }
 0x32f   :  { %v3140_v18 = vmul.f32 %v5788_v27, %v2948_v35  ;;  %v3261_v39 = vmul.f32 %v3133_v37, %v3133_v37  ;;  %v3260_v47 = vmul.f32 %v3132_v21, %v3132_v21  ;;  %v3142_v50 = vmul.f32 %v5788_v27, %v2950_v30  ;;  %v4175_v35 = vld [vmem:[#allocation5 + $0x128] sm:$0xff] }
 0x330   :  { %v3262_v46 = vmul.f32 %v3134_v44, %v3134_v44  ;;  %v3452_v41 = vadd.f32 %v3451_v48, %v3259_v9  ;;  %v3267_v49 = vmul.f32 %v3139_v20, %v3139_v20  ;;  %v3269_v45 = vmul.f32 %v3141_v61, %v3141_v61  ;;  %v6101_v28 = vpop.f32.mrf.mxu0  ;;  %v4177_v61 = vld [vmem:[#allocation5 + $0x160] sm:$0xff] }
 0x331   :  { %v3268_v25 = vmul.f32 %v3140_v18, %v3140_v18  ;;  %v3494_v14 = vadd.f32 %v3493_v13, %v3261_v39  ;;  %v3473_v12 = vadd.f32 %v3472_v59, %v3260_v47  ;;  %v3270_v42 = vmul.f32 %v3142_v50, %v3142_v50  ;;  %v4173_v13 = vld [vmem:[#allocation5 + $0x120] sm:$0xff]  ;;  %v4178_v47 = vld [vmem:[#allocation5 + $0x170] sm:$0xff]  ;;  %v4179_v50 = vld [vmem:[#allocation5 + $0x168] sm:$0xff] }
 0x332   :  { %v3515_v43 = vadd.f32 %v3514_v29, %v3262_v46  ;;  %v3453_v5 = vadd.f32 %v3452_v41, %v3267_v49  ;;  %v2748_v54 = vadd.f32 %v6015_v22, %v5764_v26  ;;  %v2861_v17 = vadd.f32 %v6017_v63, %v5766_v56  ;;  %v4174_v29 = vld [vmem:[#allocation5 + $0x130] sm:$0xff]  ;;  %v6115_v21 = vpop.f32.mrf.mxu0  ;;  %v6117_v63 = vpop.f32.mrf.mxu1  ;;  %v4180_v41 = vld [vmem:[#allocation5 + $0x178] sm:$0xff] }
 0x333   :  { %v2750_v27 = vadd.f32 %v6025_v23, %v5770_v36  ;;  %v3495_v48 = vadd.f32 %v3494_v14, %v3269_v45  ;;  %v3474_v7 = vadd.f32 %v3473_v12, %v3268_v25  ;;  %v2863_v0 = vadd.f32 %v6027_v58, %v5772_v19  ;;  %v4176_v23 = vld [vmem:[#allocation5 + $0x138] sm:$0xff] }
 0x334   :  { %v3516_v38 = vadd.f32 %v3515_v43, %v3270_v42  ;;  %v2955_v59 = vsub.f32 %v4173_v13, %v2748_v54  ;;  %v2957_v32 = vsub.f32 %v4174_v29, %v2861_v17  ;;  %v2752_v22 = vadd.f32 %v6031_v8, %v5764_v26  ;;  %v6130_v14 = vpop.f32.mrf.mxu0  ;;  %v6132_v12 = vpop.f32.mrf.mxu1 }
 0x335   :  { %v2956_v37 = vsub.f32 %v4175_v35, %v2750_v27  ;;  %v2958_v44 = vsub.f32 %v4176_v23, %v2863_v0  ;;  %v2865_v10 = vadd.f32 %v6033_v62, %v5766_v56  ;;  %v2754_v58 = vadd.f32 %v6037_v57, %v5770_v36 }
 0x336   :  { %v2867_v30 = vadd.f32 %v6039_v40, %v5772_v19  ;;  %v3147_v9 = vmul.f32 %v5800_v6, %v2955_v59  ;;  %v3149_v20 = vmul.f32 %v5800_v6, %v2957_v32  ;;  %v2963_v18 = vsub.f32 %v4177_v61, %v2752_v22 }
 0x337   :  { %v3148_v8 = vmul.f32 %v5800_v6, %v2956_v37  ;;  %v3150_v39 = vmul.f32 %v5800_v6, %v2958_v44  ;;  %v2965_v46 = vsub.f32 %v4178_v47, %v2865_v10  ;;  %v2964_v62 = vsub.f32 %v4179_v50, %v2754_v58  ;;  %v6143_v10 = vpop.f32.mrf.mxu0  ;;  %v4181_v58 = vld [vmem:[#allocation5 + $0x1a0] sm:$0xff] }
 0x338   :  { %v2966_v49 = vsub.f32 %v4180_v41, %v2867_v30  ;;  %v3275_v57 = vmul.f32 %v3147_v9, %v3147_v9  ;;  %v3277_v45 = vmul.f32 %v3149_v20, %v3149_v20  ;;  %v3155_v40 = vmul.f32 %v5808_v53, %v2963_v18  ;;  %v4182_v9 = vld [vmem:[#allocation5 + $0x1b0] sm:$0xff]  ;;  %v4183_v20 = vld [vmem:[#allocation5 + $0x1a8] sm:$0xff] }
 0x339   :  { %v3276_v25 = vmul.f32 %v3148_v8, %v3148_v8  ;;  %v3278_v43 = vmul.f32 %v3150_v39, %v3150_v39  ;;  %v3157_v42 = vmul.f32 %v5808_v53, %v2965_v46  ;;  %v3156_v6 = vmul.f32 %v5808_v53, %v2964_v62  ;;  %v4185_v62 = vld [vmem:[#allocation5 + $0x1e0] sm:$0xff] }
 0x33a   :  { %v3158_v54 = vmul.f32 %v5808_v53, %v2966_v49  ;;  %v3454_v17 = vadd.f32 %v3453_v5, %v3275_v57  ;;  %v3496_v27 = vadd.f32 %v3495_v48, %v3277_v45  ;;  %v3283_v13 = vmul.f32 %v3155_v40, %v3155_v40  ;;  %v6145_v53 = vpop.f32.mrf.mxu1  ;;  %v4186_v57 = vld [vmem:[#allocation5 + $0x1f0] sm:$0xff]  ;;  %v4188_v40 = vld [vmem:[#allocation5 + $0x1f8] sm:$0xff] }
 0x33b   :  { %v3475_v0 = vadd.f32 %v3474_v7, %v3276_v25  ;;  %v3517_v59 = vadd.f32 %v3516_v38, %v3278_v43  ;;  %v3285_v29 = vmul.f32 %v3157_v42, %v3157_v42  ;;  %v3284_v32 = vmul.f32 %v3156_v6, %v3156_v6 }
 0x33c   :  { %v3286_v35 = vmul.f32 %v3158_v54, %v3158_v54  ;;  %v3455_v37 = vadd.f32 %v3454_v17, %v3283_v13  ;;  %v2758_v22 = vadd.f32 %v6045_v31, %v5764_v26  ;;  %v2871_v23 = vadd.f32 %v6047_v34, %v5766_v56  ;;  %v6162_v49 = vpop.f32.mrf.mxu1 }
 0x33d   :  { %v2760_v44 = vadd.f32 %v6053_v52, %v5770_v36  ;;  %v3497_v5 = vadd.f32 %v3496_v27, %v3285_v29  ;;  %v3476_v48 = vadd.f32 %v3475_v0, %v3284_v32  ;;  %v2873_v38 = vadd.f32 %v6055_v60, %v5772_v19  ;;  %v4184_v52 = vld [vmem:[#allocation5 + $0x1b8] sm:$0xff] }
 0x33e   :  { %v3518_v7 = vadd.f32 %v3517_v59, %v3286_v35  ;;  %v2971_v30 = vsub.f32 %v4181_v58, %v2758_v22  ;;  %v2973_v31 = vsub.f32 %v4182_v9, %v2871_v23  ;;  %v2762_v34 = vadd.f32 %v6059_v15, %v5764_v26  ;;  %v6160_v15 = vpop.f32.mrf.mxu0  ;;  %v6171_v22 = vpop.f32.mrf.mxu1 }
 0x33f   :  { %v2972_v8 = vsub.f32 %v4183_v20, %v2760_v44  ;;  %v2974_v61 = vsub.f32 %v4184_v52, %v2873_v38  ;;  %v2875_v18 = vadd.f32 %v6061_v11, %v5766_v56  ;;  %v2764_v39 = vadd.f32 %v6065_v16, %v5770_v36  ;;  %v4187_v16 = vld [vmem:[#allocation5 + $0x1e8] sm:$0xff] }
 0x340   :  { %v2877_v60 = vadd.f32 %v6067_v24, %v5772_v19  ;;  %v3163_v47 = vmul.f32 %v5820_v4, %v2971_v30  ;;  %v3165_v46 = vmul.f32 %v5820_v4, %v2973_v31  ;;  %v2979_v41 = vsub.f32 %v4185_v62, %v2762_v34  ;;  %v6169_v35 = vpop.f32.mrf.mxu0  ;;  %v4190_v34 = vld [vmem:[#allocation5 + $0x230] sm:$0xff] }
 0x341   :  { %v3164_v50 = vmul.f32 %v5820_v4, %v2972_v8  ;;  %v3166_v11 = vmul.f32 %v5820_v4, %v2974_v61  ;;  %v2981_v45 = vsub.f32 %v4186_v57, %v2875_v18  ;;  %v2980_v25 = vsub.f32 %v4187_v16, %v2764_v39  ;;  %v4191_v61 = vld [vmem:[#allocation5 + $0x228] sm:$0xff]  ;;  %v4194_v16 = vld [vmem:[#allocation5 + $0x270] sm:$0xff] }
 0x342   :  { %v2982_v24 = vsub.f32 %v4188_v40, %v2877_v60  ;;  %v3291_v43 = vmul.f32 %v3163_v47, %v3163_v47  ;;  %v3293_v42 = vmul.f32 %v3165_v46, %v3165_v46  ;;  %v3171_v54 = vmul.f32 %v5828_v33, %v2979_v41  ;;  %v6183_v39 = vpop.f32.mrf.mxu0  ;;  %v4195_v40 = vld [vmem:[#allocation5 + $0x268] sm:$0xff] }
 0x343   :  { %v3292_v6 = vmul.f32 %v3164_v50, %v3164_v50  ;;  %v3294_v17 = vmul.f32 %v3166_v11, %v3166_v11  ;;  %v3173_v27 = vmul.f32 %v5828_v33, %v2981_v45  ;;  %v3172_v0 = vmul.f32 %v5828_v33, %v2980_v25  ;;  %v6443_v50 = vld [vmem:[#allocation23_spill] sm:$0xff] }
 0x344   :  { %v3174_v13 = vmul.f32 %v5828_v33, %v2982_v24  ;;  %v3456_v59 = vadd.f32 %v3455_v37, %v3291_v43  ;;  %v3498_v4 = vadd.f32 %v3497_v5, %v3293_v42  ;;  %v3299_v32 = vmul.f32 %v3171_v54, %v3171_v54  ;;  %v4193_v11 = vld [vmem:[#allocation5 + $0x260] sm:$0xff]  ;;  %v4196_v24 = vld [vmem:[#allocation5 + $0x278] sm:$0xff] }
 0x345   :  { %v3477_v29 = vadd.f32 %v3476_v48, %v3292_v6  ;;  %v3519_v23 = vadd.f32 %v3518_v7, %v3294_v17  ;;  %v3301_v44 = vmul.f32 %v3173_v27, %v3173_v27  ;;  %v3300_v38 = vmul.f32 %v3172_v0, %v3172_v0  ;;  %v4189_v7 = vld [vmem:[#allocation5 + $0x220] sm:$0xff]  ;;  %v6198_v17 = vpop.f32.mrf.mxu0 }
 0x346   :  { %v3302_v58 = vmul.f32 %v3174_v13, %v3174_v13  ;;  %v3457_v30 = vadd.f32 %v3456_v59, %v3299_v32  ;;  %v2768_v9 = vadd.f32 %v6071_v3, %v5764_v26  ;;  %v2881_v31 = vadd.f32 %v6073_v55, %v5766_v56  ;;  %v6185_v55 = vpop.f32.mrf.mxu1 }
 0x347   :  { %v2770_v33 = vadd.f32 %v6090_v51, %v5770_v36  ;;  %v3499_v37 = vadd.f32 %v3498_v4, %v3301_v44  ;;  %v3478_v5 = vadd.f32 %v3477_v29, %v3300_v38  ;;  %v2883_v20 = vadd.f32 %v6092_v1, %v5772_v19  ;;  %v4192_v51 = vld [vmem:[#allocation5 + $0x238] sm:$0xff] }
 0x348   :  { %v3520_v48 = vadd.f32 %v3519_v23, %v3302_v58  ;;  %v2987_v8 = vsub.f32 %v4189_v7, %v2768_v9  ;;  %v2989_v52 = vsub.f32 %v4190_v34, %v2881_v31  ;;  %v2772_v3 = vadd.f32 %v6101_v28, %v5764_v26  ;;  %v6200_v27 = vpop.f32.mrf.mxu1  ;;  %v6211_v34 = vpop.f32.mrf.mxu0 }
 0x349   :  { %v2988_v18 = vsub.f32 %v4191_v61, %v2770_v33  ;;  %v2990_v60 = vsub.f32 %v4192_v51, %v2883_v20  ;;  %v2885_v47 = vadd.f32 %v6103_v2, %v5766_v56  ;;  %v2774_v1 = vadd.f32 %v6115_v21, %v5770_v36  ;;  %v4197_v61 = vld [vmem:[#allocation5 + $0x2a0] sm:$0xff]  ;;  %v4199_v51 = vld [vmem:[#allocation5 + $0x2a8] sm:$0xff] }
 0x34a   :  { %v2887_v46 = vadd.f32 %v6117_v63, %v5772_v19  ;;  %v3179_v62 = vmul.f32 %v6443_v50, %v2987_v8  ;;  %v3181_v41 = vmul.f32 %v6443_v50, %v2989_v52  ;;  %v2995_v57 = vsub.f32 %v4193_v11, %v2772_v3  ;;  %v6444_v63 = vld [vmem:[#allocation22_spill] sm:$0xff]  ;;  %v4198_v3 = vld [vmem:[#allocation5 + $0x2b0] sm:$0xff]  ;;  %v4201_v11 = vld [vmem:[#allocation5 + $0x2e0] sm:$0xff] }
 0x34b   :  { %v3180_v28 = vmul.f32 %v6443_v50, %v2988_v18  ;;  %v3182_v45 = vmul.f32 %v6443_v50, %v2990_v60  ;;  %v2997_v25 = vsub.f32 %v4194_v16, %v2885_v47  ;;  %v2996_v2 = vsub.f32 %v4195_v40, %v2774_v1  ;;  %v6445_v50 = vld [vmem:[#allocation26_spill] sm:$0xff]  ;;  %v4203_v40 = vld [vmem:[#allocation5 + $0x2e8] sm:$0xff] }
 0x34c   :  { %v2998_v43 = vsub.f32 %v4196_v24, %v2887_v46  ;;  %v3307_v21 = vmul.f32 %v3179_v62, %v3179_v62  ;;  %v3309_v42 = vmul.f32 %v3181_v41, %v3181_v41  ;;  %v3187_v54 = vmul.f32 %v6444_v63, %v2995_v57 }
 0x34d   :  { %v3308_v6 = vmul.f32 %v3180_v28, %v3180_v28  ;;  %v3310_v0 = vmul.f32 %v3182_v45, %v3182_v45  ;;  %v3189_v13 = vmul.f32 %v6444_v63, %v2997_v25  ;;  %v3188_v59 = vmul.f32 %v6444_v63, %v2996_v2  ;;  %v4202_v25 = vld [vmem:[#allocation5 + $0x2f0] sm:$0xff] }
 0x34e   :  { %v3190_v4 = vmul.f32 %v6444_v63, %v2998_v43  ;;  %v3458_v29 = vadd.f32 %v3457_v30, %v3307_v21  ;;  %v3500_v32 = vadd.f32 %v3499_v37, %v3309_v42  ;;  %v3315_v44 = vmul.f32 %v3187_v54, %v3187_v54  ;;  %v6213_v30 = vpop.f32.mrf.mxu1  ;;  %v6446_v42 = vld [vmem:[#allocation25_spill] sm:$0xff] }
 0x34f   :  { %v3479_v23 = vadd.f32 %v3478_v5, %v3308_v6  ;;  %v3521_v38 = vadd.f32 %v3520_v48, %v3310_v0  ;;  %v3317_v58 = vmul.f32 %v3189_v13, %v3189_v13  ;;  %v3316_v9 = vmul.f32 %v3188_v59, %v3188_v59 }
 0x350   :  { %v3318_v31 = vmul.f32 %v3190_v4, %v3190_v4  ;;  %v3459_v33 = vadd.f32 %v3458_v29, %v3315_v44  ;;  %v2778_v20 = vadd.f32 %v6130_v14, %v5764_v26  ;;  %v2891_v7 = vadd.f32 %v6132_v12, %v5766_v56  ;;  %v2906_v45 = vpop.f32.mrf.mxu1 }
 0x351   :  { %v2780_v8 = vadd.f32 %v6143_v10, %v5770_v36  ;;  %v3501_v37 = vadd.f32 %v3500_v32, %v3317_v58  ;;  %v3480_v5 = vadd.f32 %v3479_v23, %v3316_v9  ;;  %v2893_v52 = vadd.f32 %v6145_v53, %v5772_v19  ;;  %v4200_v10 = vld [vmem:[#allocation5 + $0x2b8] sm:$0xff] }
 0x352   :  { %v3522_v48 = vadd.f32 %v3521_v38, %v3318_v31  ;;  %v3003_v18 = vsub.f32 %v4197_v61, %v2778_v20  ;;  %v3005_v14 = vsub.f32 %v4198_v3, %v2891_v7  ;;  %v2782_v12 = vadd.f32 %v6160_v15, %v5764_v26  ;;  %v2793_v15 = vpop.f32.mrf.mxu0  ;;  %v2910_v44 = vpop.f32.mrf.mxu1  ;;  %v4206_v3 = vld [vmem:[#allocation5 + $0x330] sm:$0xff] }
 0x353   :  { %v3004_v60 = vsub.f32 %v4199_v51, %v2780_v8  ;;  %v3006_v47 = vsub.f32 %v4200_v10, %v2893_v52  ;;  %v2895_v1 = vadd.f32 %v6162_v49, %v5766_v56  ;;  %v2784_v46 = vadd.f32 %v6169_v35, %v5770_v36  ;;  %v4204_v35 = vld [vmem:[#allocation5 + $0x2f8] sm:$0xff]  ;;  %v4207_v51 = vld [vmem:[#allocation5 + $0x328] sm:$0xff] }
 0x354   :  { %v2897_v53 = vadd.f32 %v6171_v22, %v5772_v19  ;;  %v3195_v62 = vmul.f32 %v6445_v50, %v3003_v18  ;;  %v3197_v41 = vmul.f32 %v6445_v50, %v3005_v14  ;;  %v3011_v57 = vsub.f32 %v4201_v11, %v2782_v12  ;;  %v2797_v23 = vpop.f32.mrf.mxu0  ;;  %v4208_v10 = vld [vmem:[#allocation5 + $0x338] sm:$0xff]  ;;  %v4210_v11 = vld [vmem:[#allocation5 + $0x370] sm:$0xff] }
 0x355   :  { %v3196_v28 = vmul.f32 %v6445_v50, %v3004_v60  ;;  %v3198_v16 = vmul.f32 %v6445_v50, %v3006_v47  ;;  %v3013_v49 = vsub.f32 %v4202_v25, %v2895_v1  ;;  %v3012_v2 = vsub.f32 %v4203_v40, %v2784_v46  ;;  %v6447_v46 = vld [vmem:[#allocation27_spill] sm:$0xff] }
 0x356   :  { %v3014_v24 = vsub.f32 %v4204_v35, %v2897_v53  ;;  %v3323_v43 = vmul.f32 %v3195_v62, %v3195_v62  ;;  %v3325_v22 = vmul.f32 %v3197_v41, %v3197_v41  ;;  %v3203_v6 = vmul.f32 %v6446_v42, %v3011_v57  ;;  %v2799_v12 = vpop.f32.mrf.mxu0  ;;  %v4209_v41 = vld [vmem:[#allocation5 + $0x360] sm:$0xff] }
 0x357   :  { %v3324_v21 = vmul.f32 %v3196_v28, %v3196_v28  ;;  %v3326_v63 = vmul.f32 %v3198_v16, %v3198_v16  ;;  %v3205_v54 = vmul.f32 %v6446_v42, %v3013_v49  ;;  %v3204_v0 = vmul.f32 %v6446_v42, %v3012_v2  ;;  %v4211_v16 = vld [vmem:[#allocation5 + $0x368] sm:$0xff]  ;;  %v4212_v49 = vld [vmem:[#allocation5 + $0x378] sm:$0xff] }
 0x358   :  { %v3206_v13 = vmul.f32 %v6446_v42, %v3014_v24  ;;  %v3460_v59 = vadd.f32 %v3459_v33, %v3323_v43  ;;  %v3502_v4 = vadd.f32 %v3501_v37, %v3325_v22  ;;  %v3331_v32 = vmul.f32 %v3203_v6, %v3203_v6  ;;  %v2801_v24 = vpop.f32.mrf.mxu0 }
 0x359   :  { %v3481_v29 = vadd.f32 %v3480_v5, %v3324_v21  ;;  %v3523_v38 = vadd.f32 %v3522_v48, %v3326_v63  ;;  %v3333_v58 = vmul.f32 %v3205_v54, %v3205_v54  ;;  %v3332_v9 = vmul.f32 %v3204_v0, %v3204_v0  ;;  %v4205_v48 = vld [vmem:[#allocation5 + $0x320] sm:$0xff] }
 0x35a   :  { %v3334_v31 = vmul.f32 %v3206_v13, %v3206_v13  ;;  %v3461_v20 = vadd.f32 %v3460_v59, %v3331_v32  ;;  %v2788_v7 = vadd.f32 %v6183_v39, %v5764_v26  ;;  %v2901_v8 = vadd.f32 %v6185_v55, %v5766_v56  ;;  %v2912_v55 = vpop.f32.mrf.mxu1 }
 0x35b   :  { %v2790_v52 = vadd.f32 %v6198_v17, %v5770_v36  ;;  %v3503_v33 = vadd.f32 %v3502_v4, %v3333_v58  ;;  %v3482_v37 = vadd.f32 %v3481_v29, %v3332_v9  ;;  %v2903_v61 = vadd.f32 %v6200_v27, %v5772_v19 }
 0x35c   :  { %v3524_v5 = vadd.f32 %v3523_v38, %v3334_v31  ;;  %v3019_v18 = vsub.f32 %v4205_v48, %v2788_v7  ;;  %v3021_v14 = vsub.f32 %v4206_v3, %v2901_v8  ;;  %v2792_v39 = vadd.f32 %v6211_v34, %v5764_v26  ;;  %v2914_v43 = vpop.f32.mrf.mxu1  ;;  %v2803_v7 = vpop.f32.mrf.mxu0  ;;  %v4215_v3 = vld [vmem:[#allocation5 + $0x3a8] sm:$0xff] }
 0x35d   :  { %v3020_v60 = vsub.f32 %v4207_v51, %v2790_v52  ;;  %v3022_v47 = vsub.f32 %v4208_v10, %v2903_v61  ;;  %v2905_v17 = vadd.f32 %v6213_v30, %v5766_v56  ;;  %v2794_v1 = vadd.f32 %v2793_v15, %v5770_v36  ;;  %v6449_v10 = vld [vmem:[#allocation31_spill] sm:$0xff] }
 0x35e   :  { %v2907_v27 = vadd.f32 %v2906_v45, %v5772_v19  ;;  %v3211_v53 = vmul.f32 %v6447_v46, %v3019_v18  ;;  %v3213_v50 = vmul.f32 %v6447_v46, %v3021_v14  ;;  %v3027_v28 = vsub.f32 %v4209_v41, %v2792_v39  ;;  %v6448_v45 = vld [vmem:[#allocation32_spill] sm:$0xff]  ;;  %v2916_v8 = vpop.f32.mrf.mxu1  ;;  %v4220_v41 = vld [vmem:[#allocation5 + $0x3f8] sm:$0xff] }
 0x35f   :  { %v3212_v62 = vmul.f32 %v6447_v46, %v3020_v60  ;;  %v3214_v34 = vmul.f32 %v6447_v46, %v3022_v47  ;;  %v3029_v57 = vsub.f32 %v4210_v11, %v2905_v17  ;;  %v3028_v25 = vsub.f32 %v4211_v16, %v2794_v1  ;;  %v4217_v1 = vld [vmem:[#allocation5 + $0x3e0] sm:$0xff] }
 0x360   :  { %v3030_v30 = vsub.f32 %v4212_v49, %v2907_v27  ;;  %v3339_v40 = vmul.f32 %v3211_v53, %v3211_v53  ;;  %v3341_v15 = vmul.f32 %v3213_v50, %v3213_v50  ;;  %v3219_v35 = vmul.f32 %v6448_v45, %v3027_v28  ;;  %v4218_v53 = vld [vmem:[#allocation5 + $0x3f0] sm:$0xff]  ;;  %v4219_v50 = vld [vmem:[#allocation5 + $0x3e8] sm:$0xff] }
 0x361   :  { %v3340_v2 = vmul.f32 %v3212_v62, %v3212_v62  ;;  %v3342_v22 = vmul.f32 %v3214_v34, %v3214_v34  ;;  %v3221_v21 = vmul.f32 %v6448_v45, %v3029_v57  ;;  %v3220_v42 = vmul.f32 %v6448_v45, %v3028_v25 }
 0x362   :  { %v3222_v6 = vmul.f32 %v6448_v45, %v3030_v30  ;;  %v3462_v63 = vadd.f32 %v3461_v20, %v3339_v40  ;;  %v3504_v54 = vadd.f32 %v3503_v33, %v3341_v15  ;;  %v3347_v13 = vmul.f32 %v3219_v35, %v3219_v35  ;;  %v4213_v33 = vld [vmem:[#allocation5 + $0x3a0] sm:$0xff] }
 0x363   :  { %v3483_v0 = vadd.f32 %v3482_v37, %v3340_v2  ;;  %v3525_v59 = vadd.f32 %v3524_v5, %v3342_v22  ;;  %v3349_v4 = vmul.f32 %v3221_v21, %v3221_v21  ;;  %v3348_v29 = vmul.f32 %v3220_v42, %v3220_v42  ;;  %v4214_v5 = vld [vmem:[#allocation5 + $0x3b0] sm:$0xff] }
 0x364   :  { %v3350_v32 = vmul.f32 %v3222_v6, %v3222_v6  ;;  %v3463_v38 = vadd.f32 %v3462_v63, %v3347_v13  ;;  %v2798_v58 = vadd.f32 %v2797_v23, %v5764_v26  ;;  %v2911_v9 = vadd.f32 %v2910_v44, %v5766_v56  ;;  %v4216_v23 = vld [vmem:[#allocation5 + $0x3b8] sm:$0xff] }
 0x365   :  { %v2800_v31 = vadd.f32 %v2799_v12, %v5770_v36  ;;  %v3505_v52 = vadd.f32 %v3504_v54, %v3349_v4  ;;  %v3484_v61 = vadd.f32 %v3483_v0, %v3348_v29  ;;  %v2913_v20 = vadd.f32 %v2912_v55, %v5772_v19 }
 0x366   :  { %v3526_v48 = vadd.f32 %v3525_v59, %v3350_v32  ;;  %v3035_v37 = vsub.f32 %v4213_v33, %v2798_v58  ;;  %v3037_v18 = vsub.f32 %v4214_v5, %v2911_v9  ;;  %v2802_v51 = vadd.f32 %v2801_v24, %v5764_v26 }
 0x367   :  { %v3036_v14 = vsub.f32 %v4215_v3, %v2800_v31  ;;  %v3038_v60 = vsub.f32 %v4216_v23, %v2913_v20  ;;  %v2915_v44 = vadd.f32 %v2914_v43, %v5766_v56  ;;  %v2804_v39 = vadd.f32 %v2803_v7, %v5770_v36 }
 0x368   :  { %v2917_v12 = vadd.f32 %v2916_v8, %v5772_v19  ;;  %v3227_v47 = vmul.f32 %v6449_v10, %v3035_v37  ;;  %v3229_v55 = vmul.f32 %v6449_v10, %v3037_v18  ;;  %v3043_v27 = vsub.f32 %v4217_v1, %v2802_v51  ;;  %v6450_v19 = vld [vmem:[#allocation29_spill] sm:$0xff] }
 0x369   :  { %v3228_v17 = vmul.f32 %v6449_v10, %v3036_v14  ;;  %v3230_v46 = vmul.f32 %v6449_v10, %v3038_v60  ;;  %v3045_v26 = vsub.f32 %v4218_v53, %v2915_v44  ;;  %v3044_v62 = vsub.f32 %v4219_v50, %v2804_v39 }
 0x36a   :  { %v3046_v56 = vsub.f32 %v4220_v41, %v2917_v12  ;;  %v3355_v28 = vmul.f32 %v3227_v47, %v3227_v47  ;;  %v3357_v36 = vmul.f32 %v3229_v55, %v3229_v55  ;;  %v3235_v11 = vmul.f32 %v6450_v19, %v3043_v27 }
 0x36b   :  { %v3356_v34 = vmul.f32 %v3228_v17, %v3228_v17  ;;  %v3358_v57 = vmul.f32 %v3230_v46, %v3230_v46  ;;  %v3237_v16 = vmul.f32 %v6450_v19, %v3045_v26  ;;  %v3236_v25 = vmul.f32 %v6450_v19, %v3044_v62 }
 0x36c   :  { %v3238_v49 = vmul.f32 %v6450_v19, %v3046_v56  ;;  %v3464_v30 = vadd.f32 %v3463_v38, %v3355_v28  ;;  %v3506_v40 = vadd.f32 %v3505_v52, %v3357_v36  ;;  %v3363_v2 = vmul.f32 %v3235_v11, %v3235_v11 }
 0x36d   :  { %v3485_v15 = vadd.f32 %v3484_v61, %v3356_v34  ;;  %v3527_v45 = vadd.f32 %v3526_v48, %v3358_v57  ;;  %v3365_v35 = vmul.f32 %v3237_v16, %v3237_v16  ;;  %v3364_v24 = vmul.f32 %v3236_v25, %v3236_v25 }
 0x36e   :  { %v3366_v43 = vmul.f32 %v3238_v49, %v3238_v49  ;;  %v3465_v22 = vadd.f32 %v3464_v30, %v3363_v2 }
 0x36f   :  { %v3507_v21 = vadd.f32 %v3506_v40, %v3365_v35  ;;  %v3486_v42 = vadd.f32 %v3485_v15, %v3364_v24 }
 0x370   :  { %v3528_v6 = vadd.f32 %v3527_v45, %v3366_v43  ;;  %v3466_v63 = vrot.slane %v3465_v22, 4 }
 0x371   :  { %v3508_v54 = vrot.slane %v3507_v21, 4  ;;  %v3487_v0 = vrot.slane %v3486_v42, 4 }
 0x372   :  { %v3529_v13 = vrot.slane %v3528_v6, 4  ;;  %v3467_v59 = vadd.f32 %v3466_v63, %v3465_v22 }
 0x373   :  { %v3509_v4 = vadd.f32 %v3508_v54, %v3507_v21  ;;  %v3488_v29 = vadd.f32 %v3487_v0, %v3486_v42 }
 0x374   :  { %v3530_v32 = vadd.f32 %v3529_v13, %v3528_v6  ;;  %v3468_v38 = vrot.slane %v3467_v59, 2 }
 0x375   :  { %v3510_v58 = vrot.slane %v3509_v4, 2  ;;  %v3489_v9 = vrot.slane %v3488_v29, 2 }
 0x376   :  { %v3531_v31 = vrot.slane %v3530_v32, 2  ;;  %v3469_v7 = vadd.f32 %v3468_v38, %v3467_v59 }
 0x377   :  { %v3511_v8 = vadd.f32 %v3510_v58, %v3509_v4  ;;  %v3490_v52 = vadd.f32 %v3489_v9, %v3488_v29 }
 0x378   :  { %v3532_v61 = vadd.f32 %v3531_v31, %v3530_v32  ;;  %v3470_v48 = vrot.slane %v3469_v7, 1 }
 0x379   :  { %v3512_v20 = vrot.slane %v3511_v8, 1  ;;  %v3491_v33 = vrot.slane %v3490_v52, 1 }
 0x37a   :  { %v3533_v37 = vrot.slane %v3532_v61, 1  ;;  %v3471_v5 = vadd.f32 %v3470_v48, %v3469_v7 }
 0x37b   :  { %v3513_v18 = vadd.f32 %v3512_v20, %v3511_v8  ;;  %v3492_v3 = vadd.f32 %v3491_v33, %v3490_v52 }
 0x37c   :  { %v3534_v14 = vadd.f32 %v3533_v37, %v3532_v61  ;;  %3539 = vst [vmem:[#allocation10 + $0x20] sm:$0xff] %v3471_v5 }
 0x37d   :  { %3541 = vst [vmem:[#allocation10 + $0x30] sm:$0xff] %v3513_v18  ;;  %3540 = vst [vmem:[#allocation10 + $0x28] sm:$0xff] %v3492_v3 }
 0x37e   :  { %3542 = vst [vmem:[#allocation10 + $0x38] sm:$0xff] %v3534_v14 }
 0x37f   :  { %4312 = shalt.err (!%p4309_p10)
}
 0x380   :  { %3552 = dma.vmem_to_hbm [thread:$0]  %s3550_s21, 1024, %s6282_s8, [#allocation4]  }
 0x381   :  { %4327 = dma.done.wait [#allocation4], 1024  }
 0x382   :  { %4328 = vsyncadd [#allocation4], 4294966272 }
 0x383   :  { %3556 = vsyncpa [#allocation3], 1 }
 0x384   :  { %3557 = vsyncpa [#allocation6], 1 }
 0x385   :  { %3558 = vsyncpa [#allocation9], 1 }
 0x386   :  { %3559 = vsyncpa [#allocation4], 1 }

</bundles_post_ra>
